<compile_context>
chip_gen: v7x
topology: tpu7x:2x2x1
jax: 0.10.0
libtpu: 0.0.40
codegen_flags: <defaults>
</compile_context>

<pallas_src>
import functools

import jax
import jax.numpy as jnp
from jax import lax
from jax.experimental import pallas as pl
from jax.experimental.pallas import tpu as pltpu

IN_FEATURES = 128 * 318  # 40704, fixed by the module definition
FEA_NUM = 32             # fea_num for the synthetic instantiation


def _bottleneck_kernel(x_ref, w_ref, b_ref, o_ref):
    """Fused y = x @ W^T + b in a single grid step.

    x_ref: (B, K) activations (f32; cast to weight dtype on the VPU).
    w_ref: (N, K) weight, PyTorch layout, K lane-dense (bf16 by default).
    b_ref: (1, N) bias (f32).
    o_ref: (B, N) output (f32).
    """
    x = x_ref[...].astype(w_ref.dtype)
    # Contract axis 1 of BOTH operands (x @ W^T).  Mosaic lowers this to the
    # MXU transposed-RHS path (same pattern as q @ k^T); no materialized
    # XLU transpose of the (N, K) weight tile.
    acc = lax.dot_general(
        x,
        w_ref[...],
        dimension_numbers=(((1,), (1,)), ((), ())),
        preferred_element_type=jnp.float32,
    )
    o_ref[...] = (acc + b_ref[...]).astype(o_ref.dtype)


@jax.jit
def bottleneck_forward(x, weight, bias):
    """y = x @ weight.T + bias   (weight: (fea_num, K), bias: (fea_num,))."""
    B, K = x.shape
    N = weight.shape[0]
    assert K % 128 == 0, "K must be a multiple of 128 lanes"

    bias2d = bias.reshape(1, N).astype(jnp.float32)

    w_bytes = weight.size * jnp.dtype(weight.dtype).itemsize
    x_bytes = x.size * jnp.dtype(x.dtype).itemsize
    o_bytes = B * N * 4
    b_bytes = N * 4

    return pl.pallas_call(
        _bottleneck_kernel,
        out_shape=jax.ShapeDtypeStruct((B, N), jnp.float32),
        grid_spec=pltpu.PrefetchScalarGridSpec(
            num_scalar_prefetch=0,
            grid=(1,),
            in_specs=[
                pl.BlockSpec((B, K), lambda i: (0, 0)),   # activations
                pl.BlockSpec((N, K), lambda i: (0, 0)),   # weight, lane-dense in K
                pl.BlockSpec((1, N), lambda i: (0, 0)),   # bias
            ],
            out_specs=pl.BlockSpec((B, N), lambda i: (0, 0)),
        ),
        compiler_params=pltpu.CompilerParams(
            dimension_semantics=("arbitrary",),
            vmem_limit_bytes=32 * 1024 * 1024,
        ),
        cost_estimate=pl.CostEstimate(
            flops=2 * B * N * K,
            bytes_accessed=w_bytes + x_bytes + b_bytes + o_bytes,
            transcendentals=0,
        ),
    )(x, weight, bias2d)


def init_bottleneck_params(key, fea_num, in_features, dtype=jnp.float32):
    """Deterministic init mimicking nn.Linear's U(-1/sqrt(K), 1/sqrt(K))."""
    kw, kb = jax.random.split(key)
    bound = 1.0 / jnp.sqrt(jnp.float32(in_features))
    weight = jax.random.uniform(
        kw, (fea_num, in_features), dtype=dtype, minval=-bound, maxval=bound
    )
    bias = jax.random.uniform(
        kb, (fea_num,), dtype=dtype, minval=-bound, maxval=bound
    )
    return weight, bias


if __name__ == "__main__":
    key = jax.random.PRNGKey(0)
    kx, kp = jax.random.split(key)

    B = 2  # small batch
    x = jax.random.normal(kx, (B, IN_FEATURES), dtype=jnp.float32)
    weight_f32, bias = init_bottleneck_params(kp, FEA_NUM, IN_FEATURES)

    # One-time weight compression at parameter-load time (outside the jitted
    # forward) — the single biggest lever for this HBM-bound op.
    weight = weight_f32.astype(jnp.bfloat16)

    y = jax.block_until_ready(bottleneck_forward(x, weight, bias))

    # Reference 1: same bf16 operands, f32 accumulation (what the kernel computes).
    y_ref_bf16 = (
        jnp.dot(x.astype(jnp.bfloat16), weight.T, preferred_element_type=jnp.float32)
        + bias
    )
    # Reference 2: full-f32 nn.Linear semantics (module spec), loose tolerance
    # for the accepted bf16 weight-compression trade-off.
    y_ref_f32 = x @ weight_f32.T + bias

    assert y.shape == (B, FEA_NUM)
    assert jnp.allclose(y, y_ref_bf16, atol=2e-3, rtol=2e-3)
    assert jnp.allclose(y, y_ref_f32, atol=5e-2, rtol=5e-2)

    print("KERNEL_OK")
</pallas_src>

<mosaic_0001>
module attributes {stable_mosaic.version = 11 : i64} {
  func.func @_bottleneck_kernel(%arg0: i32, %arg1: memref<2x40704xf32, #tpu.memory_space<vmem>>, %arg2: memref<32x40704xbf16, #tpu.memory_space<vmem>>, %arg3: memref<1x32xf32, #tpu.memory_space<vmem>>, %arg4: memref<2x32xf32, #tpu.memory_space<vmem>>) attributes {dimension_semantics = [#tpu.dimension_semantics<arbitrary>], iteration_bounds = array<i64: 1>, scalar_prefetch = 0 : i64, scratch_operands = 0 : i64, tpu.core_type = #tpu.core_type<tc>, window_params = [{pipeline_mode = #tpu.pipeline_mode<synchronous>, transform_indices = @transform_0, window_bounds = array<i64: 2, 40704>}, {pipeline_mode = #tpu.pipeline_mode<synchronous>, transform_indices = @transform_1, window_bounds = array<i64: 32, 40704>}, {pipeline_mode = #tpu.pipeline_mode<synchronous>, transform_indices = @transform_2, window_bounds = array<i64: 1, 32>}, {pipeline_mode = #tpu.pipeline_mode<synchronous>, transform_indices = @transform_3, window_bounds = array<i64: 2, 32>}]} {
    %c0 = arith.constant 0 : index
    %c0_0 = arith.constant 0 : index
    %0 = vector.load %arg1[%c0, %c0_0] : memref<2x40704xf32, #tpu.memory_space<vmem>>, vector<2x40704xf32>
    %1 = arith.truncf %0 : vector<2x40704xf32> to vector<2x40704xbf16>
    %c0_1 = arith.constant 0 : index
    %c0_2 = arith.constant 0 : index
    %2 = vector.load %arg2[%c0_1, %c0_2] : memref<32x40704xbf16, #tpu.memory_space<vmem>>, vector<32x40704xbf16>
    %cst = arith.constant dense<0.000000e+00> : vector<2x32xf32>
    %3 = tpu.matmul %1, %2, %cst {dimension_numbers = #tpu.dot_dimension_numbers<[1], [1], [0], [0], [0, 0, 1, 0], [], []>} : vector<2x40704xbf16>, vector<32x40704xbf16>, vector<2x32xf32> -> vector<2x32xf32>
    %c0_3 = arith.constant 0 : index
    %c0_4 = arith.constant 0 : index
    %4 = vector.load %arg3[%c0_3, %c0_4] : memref<1x32xf32, #tpu.memory_space<vmem>>, vector<1x32xf32>
    %5 = vector.broadcast %4 : vector<1x32xf32> to vector<2x32xf32>
    %6 = arith.addf %3, %5 : vector<2x32xf32>
    %c0_5 = arith.constant 0 : index
    %c0_6 = arith.constant 0 : index
    %7 = vector.load %arg4[%c0_5, %c0_6] : memref<2x32xf32, #tpu.memory_space<vmem>>, vector<2x32xf32>
    tpu.vector_store %arg4[%c0_5, %c0_6], %6 {strides = array<i32>} : memref<2x32xf32, #tpu.memory_space<vmem>>, vector<2x32xf32>,
    return
  }
  func.func @transform_0(%arg0: i32) -> (i32, i32) {
    %c0_i32 = arith.constant 0 : i32
    %c0_i32_0 = arith.constant 0 : i32
    %c0_i32_1 = arith.constant 0 : i32
    return %c0_i32, %c0_i32_0 : i32, i32
  }
  func.func @transform_1(%arg0: i32) -> (i32, i32) {
    %c0_i32 = arith.constant 0 : i32
    %c0_i32_0 = arith.constant 0 : i32
    %c0_i32_1 = arith.constant 0 : i32
    return %c0_i32, %c0_i32_0 : i32, i32
  }
  func.func @transform_2(%arg0: i32) -> (i32, i32) {
    %c0_i32 = arith.constant 0 : i32
    %c0_i32_0 = arith.constant 0 : i32
    %c0_i32_1 = arith.constant 0 : i32
    return %c0_i32, %c0_i32_0 : i32, i32
  }
  func.func @transform_3(%arg0: i32) -> (i32, i32) {
    %c0_i32 = arith.constant 0 : i32
    %c0_i32_0 = arith.constant 0 : i32
    %c0_i32_1 = arith.constant 0 : i32
    return %c0_i32, %c0_i32_0 : i32, i32
  }
}

</mosaic_0001>

<bundles_post_ra>
// kernel: bottleneck_forward.1
= control target key start
LH: loop header
LB: loop body
LE: loop exit
PB: predicated region body
PF: predicated region fallthrough
CT: control target
= control target key end

     0   :  { %8 = vsyncpa [#allocation3], 0  ;;  %s15039_s0 = inlined_call_operand.hbm [shape: f32[2,40704], index: 0, kind: input, shape index: {}]   ;;  %s15040_s1 = inlined_call_operand.hbm [shape: bf16[32,40704], index: 1, kind: input, shape index: {}]   ;;  %s15041_s2 = inlined_call_operand.hbm [shape: f32[1,32], index: 2, kind: input, shape index: {}]   ;;  %s15042_s3 = inlined_call_operand.hbm [shape: f32[2,32], index: 3, kind: output, shape index: {}]  }
   0x1   :  { %9 = vsyncpa [#allocation6], 0 }
   0x2   :  { %10 = vsyncpa [#allocation4], 0  ;;  %s14805_s12 = smov [#allocation5]   ;;  %s14711_s16 = scalar_lea.hbm %s15040_s1, 81408 }
   0x3   :  { %s26_s13 = sshll.u32 %s14805_s12, 4  ;;  %p14712_p0 = scmp.ne.s32.totalorder %s15040_s1, %s14711_s16  ;;  %s27_s13 = int_to_ptr.vmem [resolvable:$true] %s26_s13 }
   0x4   :  { %p14715_p1 = scmp.lt.u32.totalorder %s14711_s16, %s15040_s1 }
   0x6   :  { %p14717_p2 = pnand %p14715_p1, %p14712_p0 }
   0x8   :  { %14720 = shalt.err (!%p14717_p2)
}
   0x9   :  { %s14721_s21 = scalar_lea.vmem %s27_s13, 81408  ;;  %p14726_p4 = scmp.lt.s32.totalorder %s27_s13, %s27_s13 }
   0xa   :  { %p14722_p3 = scmp.ne.s32.totalorder %s27_s13, %s14721_s21  ;;  %p14727_p5 = scmp.lt.s32.totalorder %s14721_s21, %s14721_s21 }
   0xc   :  { %p14728_p6 = por %p14727_p5, %p14726_p4 }
   0xe   :  { %p14729_p7 = pnand %p14728_p6, %p14722_p3 }
  0x10   :  { %14732 = shalt.err (!%p14729_p7)
}
  0x11   :  { %s14806_s22 = smov 20352   ;;  %s14807_s23 = smov 1272  }
  0x12   :  { %32 = dma.hbm_to_vmem [thread:$0]  %s15040_s1, 81408, %s27_s13, [#allocation6], %s14806_s22, %s14806_s22, %s14807_s23  }
  0x13   :  { %s14808_s26 = smov [#allocation2]   ;;  %s14809_s28 = smov [#allocation7]  }
  0x14   :  { %s17_s27 = sshll.u32 %s14808_s26, 4  ;;  %s39_s29 = sshll.u32 %s14809_s28, 4  ;;  %s18_s27 = int_to_ptr.vmem [resolvable:$true] %s17_s27  ;;  %s40_s29 = int_to_ptr.vmem [resolvable:$true] %s39_s29 }
  0x15   :  { %s14733_s5 = scalar_lea.hbm %s15039_s0, 10176 }
  0x16   :  { %p14734_p8 = scmp.ne.s32.totalorder %s15039_s0, %s14733_s5  ;;  %p14737_p9 = scmp.lt.u32.totalorder %s14733_s5, %s15039_s0 }
  0x18   :  { %p14739_p10 = pnand %p14737_p9, %p14734_p8 }
  0x1a   :  { %14742 = shalt.err (!%p14739_p10)
}
  0x1b   :  { %s14743_s1 = scalar_lea.vmem %s18_s27, 10176  ;;  %p14748_p12 = scmp.lt.s32.totalorder %s18_s27, %s18_s27 }
  0x1c   :  { %p14744_p11 = scmp.ne.s32.totalorder %s18_s27, %s14743_s1  ;;  %p14749_p13 = scmp.lt.s32.totalorder %s14743_s1, %s14743_s1 }
  0x1e   :  { %p14750_p0 = por %p14749_p13, %p14748_p12 }
  0x20   :  { %p14751_p1 = pnand %p14750_p0, %p14744_p11 }
  0x22   :  { %14754 = shalt.err (!%p14751_p1)
}
  0x23   :  { %20 = dma.hbm_to_vmem [thread:$0]  %s15039_s0, 10176, %s18_s27, [#allocation3]  }
  0x24   :  { %s14755_s14 = scalar_lea.hbm %s15041_s2, 16 }
  0x25   :  { %p14756_p2 = scmp.ne.s32.totalorder %s15041_s2, %s14755_s14  ;;  %p14759_p3 = scmp.lt.u32.totalorder %s14755_s14, %s15041_s2 }
  0x27   :  { %p14761_p4 = pnand %p14759_p3, %p14756_p2 }
  0x29   :  { %14764 = shalt.err (!%p14761_p4)
}
  0x2a   :  { %s14765_s19 = scalar_lea.vmem %s40_s29, 16  ;;  %s14769_s20 = scalar_lea.vmem %s40_s29, 32 }
  0x2b   :  { %p14766_p5 = scmp.ne.s32.totalorder %s40_s29, %s14765_s19  ;;  %p14770_p6 = scmp.lt.s32.totalorder %s40_s29, %s40_s29 }
  0x2c   :  { %p14771_p7 = scmp.lt.s32.totalorder %s14769_s20, %s14765_s19 }
  0x2e   :  { %p14772_p8 = por %p14771_p7, %p14770_p6 }
  0x30   :  { %p14773_p9 = pnand %p14772_p8, %p14766_p5 }
  0x32   :  { %14776 = shalt.err (!%p14773_p9)
}
  0x33   :  { %42 = dma.hbm_to_vmem [thread:$0]  %s15041_s2, 16, %s40_s29, [#allocation6]  }
  0x34   :  { %14799 = dma.done.wait [#allocation3], 10176  }
  0x35   :  { %14800 = vsyncadd [#allocation3], 4294957120 }
  0x36   :  { %14801 = dma.done.wait [#allocation6], 81424  }
  0x37   :  { %14802 = vsyncadd [#allocation6], 4294885872  ;;  %v14810_v0 = vmov 1983009808   ;;  %v217_v2 = vlaneseq  ;;  %v13676_v5 = vld [vmem:[#allocation5 + $0x4] ss:$1272 sps:$4 sm:$0xff]  }
  0x38   :  { %v215_v1 = vunpack.c.l.s4 %v14810_v0  ;;  %v13678_v6 = vld [vmem:[#allocation5 + $0x27c] ss:$1272 sps:$4 sm:$0xff]   ;;  %6023 = vmatprep.subr.bf16.mxu1 %v13676_v5  ;;  %v13680_v7 = vld [vmem:[#allocation5] ss:$1272 sps:$4 sm:$0xff]   ;;  %v13684_v11 = vld [vmem:[#allocation5 + $0xc6c] ss:$1272 sps:$4 sm:$0xff]  }
  0x39   :  { %v218_v4 = vshrl.u32 %v217_v2, 7  ;;  %v13681_v8 = vld [vmem:[#allocation5 + $0x278] ss:$1272 sps:$4 sm:$0xff]   ;;  %9183 = vmatprep.subr.bf16.mxu0 %v13678_v6  ;;  %v13682_v10 = vld [vmem:[#allocation5 + $0x9f4] ss:$1272 sps:$4 sm:$0xff]   ;;  %6024 = vmatpush1.bf16.xpose.msra.mxu1 %v13680_v7  ;;  %v53_v12 = vld [vmem:[#allocation2] sm:$0xff] }
  0x3a   :  { %v216_v3 = vunpack.c.0.s8 %v215_v1  ;;  %9184 = vmatpush1.bf16.xpose.msra.mxu0 %v13681_v8  ;;  %6025 = vmatprep.subr.bf16.mxu1 %v13682_v10  ;;  %v213_v13 = vcombine.high %v53_v12, %v53_v12  ;;  %v92_v15 = vld [vmem:[#allocation2 + $0x138] sm:$0xff]  ;;  %v13686_v16 = vld [vmem:[#allocation5 + $0x9f0] ss:$1272 sps:$4 sm:$0xff]   ;;  %v13691_v20 = vld [vmem:[#allocation5 + $0xc] ss:$1272 sps:$4 sm:$0xff]   ;;  %s14811_s2 = smov [#allocation8]  }
  0x3b   :  { %9185 = vmatprep.subr.bf16.mxu0 %v13684_v11  ;;  %v13687_v17 = vld [vmem:[#allocation5 + $0xc68] ss:$1272 sps:$4 sm:$0xff]   ;;  %v876_v19 = vcombine.high %v92_v15, %v92_v15  ;;  %v13695_v23 = vld [vmem:[#allocation5 + $0x284] ss:$1272 sps:$4 sm:$0xff]   ;;  %v13701_v36 = vld [vmem:[#allocation5 + $0xc74] ss:$1272 sps:$4 sm:$0xff]  }
  0x3c   :  { %v14868_v9 = vsub.s32 %v216_v3, %v218_v4  ;;  %v93_v26 = vld [vmem:[#allocation2 + $0x140] sm:$0xff]  ;;  %v13693_v34 = vld [vmem:[#allocation5 + $0x280] ss:$1272 sps:$4 sm:$0xff]   ;;  %v13698_v35 = vld [vmem:[#allocation5 + $0x9fc] ss:$1272 sps:$4 sm:$0xff]   ;;  %s12391_s22 = sshll.u32 %s14811_s2, 4  ;;  %s12392_s22 = int_to_ptr.vmem [resolvable:$true] %s12391_s22 }
  0x3d   :  { %v13689_v30 = vld [vmem:[#allocation5 + $0x8] ss:$1272 sps:$4 sm:$0xff]   ;;  %v893_v39 = vcombine.high %v93_v26, %v93_v26  ;;  %v13696_v40 = vld [vmem:[#allocation5 + $0x9f8] ss:$1272 sps:$4 sm:$0xff]   ;;  %v13704_v43 = vld [vmem:[#allocation5 + $0x14] ss:$1272 sps:$4 sm:$0xff]   ;;  %p14782_p11 = scmp.lt.s32.totalorder %s12392_s22, %s12392_s22 }
  0x3e   :  { %v220_v14 = vrot.slane %v53_v12, %v14868_v9  ;;  %v890_v22 = vrot.slane %v876_v19, %v14868_v9  ;;  %v227_v24 = vrot.slane %v213_v13, %v14868_v9  ;;  %v900_v27 = vrot.slane %v93_v26, %v14868_v9  ;;  %v54_v41 = vld [vmem:[#allocation2 + $0x8] sm:$0xff]  ;;  %v13705_v52 = vld [vmem:[#allocation5 + $0x288] ss:$1272 sps:$4 sm:$0xff]   ;;  %v13710_v53 = vld [vmem:[#allocation5 + $0xa04] ss:$1272 sps:$4 sm:$0xff]   ;;  %s14777_s23 = scalar_lea.vmem %s12392_s22, 32 }
  0x3f   :  { %v13699_v42 = vld [vmem:[#allocation5 + $0xc70] ss:$1272 sps:$4 sm:$0xff]   ;;  %v13707_v44 = vld [vmem:[#allocation5 + $0x28c] ss:$1272 sps:$4 sm:$0xff]   ;;  %v237_v45 = vrot.slane %v54_v41, %v14868_v9  ;;  %v907_v46 = vrot.slane %v893_v39, %v14868_v9  ;;  %v13713_v54 = vld [vmem:[#allocation5 + $0xc7c] ss:$1272 sps:$4 sm:$0xff]   ;;  %v230_v57 = vcombine.high %v54_v41, %v54_v41  ;;  %p14778_p10 = scmp.ne.s32.totalorder %s12392_s22, %s14777_s23  ;;  %p14783_p12 = scmp.lt.s32.totalorder %s14777_s23, %s14777_s23 }
  0x40   :  { %v228_v18 = vcombine.high %v220_v14, %v220_v14  ;;  %v892_v25 = vcombine.high %v890_v22, %v890_v22  ;;  %v229_v29 = vcombine.high %v227_v24, %v227_v24  ;;  %v1882_v31 = vpack.c.bf16 %v220_v14, %v220_v14  ;;  %v13702_v51 = vld [vmem:[#allocation5 + $0x10] ss:$1272 sps:$4 sm:$0xff]   ;;  %v13708_v58 = vld [vmem:[#allocation5 + $0xa00] ss:$1272 sps:$4 sm:$0xff]   ;;  %v13716_v61 = vld [vmem:[#allocation5 + $0x1c] ss:$1272 sps:$4 sm:$0xff]  }
  0x41   :  { %6026 = vmatpush1.bf16.xpose.msra.mxu1 %v13686_v16  ;;  %v2040_v32 = vpack.c.bf16 %v890_v22, %v890_v22  ;;  %v908_v33 = vcombine.high %v900_v27, %v900_v27  ;;  %v245_v47 = vcombine.high %v237_v45, %v237_v45  ;;  %v909_v48 = vcombine.high %v907_v46, %v907_v46  ;;  %v13711_v59 = vld [vmem:[#allocation5 + $0xc78] ss:$1272 sps:$4 sm:$0xff]   ;;  %v13720_v62 = vld [vmem:[#allocation5 + $0x294] ss:$1272 sps:$4 sm:$0xff]   ;;  %v13726_v8 = vld [vmem:[#allocation5 + $0xc84] ss:$1272 sps:$4 sm:$0xff]   ;;  %p14784_p13 = por %p14783_p12, %p14782_p11 }
  0x42   :  { %v1883_v21 = vpack.c.bf16 %v228_v18, %v228_v18  ;;  %9186 = vmatpush1.bf16.xpose.msra.mxu0 %v13687_v17  ;;  %6063 = vmatprep.subr.bf16.mxu1 %v13691_v20  ;;  %v2041_v28 = vpack.c.bf16 %v892_v25, %v892_v25  ;;  %v1885_v37 = vpack.c.bf16 %v229_v29, %v229_v29  ;;  %v94_v60 = vld [vmem:[#allocation2 + $0x148] sm:$0xff]  ;;  %v55_v13 = vld [vmem:[#allocation2 + $0x10] sm:$0xff]  ;;  %v13721_v14 = vld [vmem:[#allocation5 + $0xa08] ss:$1272 sps:$4 sm:$0xff]   ;;  %vm12383_vm0 = vcmask 254976  }
  0x43   :  { %9223 = vmatprep.subr.bf16.mxu0 %v13695_v23  ;;  %v2043_v38 = vpack.c.bf16 %v908_v33, %v908_v33  ;;  %v1884_v49 = vpack.c.bf16 %v227_v24, %v227_v24  ;;  %v2042_v50 = vpack.c.bf16 %v900_v27, %v900_v27  ;;  %v1887_v55 = vpack.c.bf16 %v245_v47, %v245_v47  ;;  %v13714_v3 = vld [vmem:[#allocation5 + $0x18] ss:$1272 sps:$4 sm:$0xff]   ;;  %v13723_v7 = vld [vmem:[#allocation5 + $0xa0c] ss:$1272 sps:$4 sm:$0xff]   ;;  %v13733_v17 = vld [vmem:[#allocation5 + $0x29c] ss:$1272 sps:$4 sm:$0xff]   ;;  %p14785_p0 = pnand %p14784_p13, %p14778_p10 }
  0x44   :  { %6055 = vmatprep.mubr.bf16.mxu1 %v1883_v21  ;;  %9215 = vmatprep.mubr.bf16.mxu0 %v2041_v28  ;;  %v2045_v56 = vpack.c.bf16 %v909_v48, %v909_v48  ;;  %v244_v63 = vrot.slane %v230_v57, %v14868_v9  ;;  %v917_v0 = vrot.slane %v94_v60, %v14868_v9  ;;  %v13718_v6 = vld [vmem:[#allocation5 + $0x290] ss:$1272 sps:$4 sm:$0xff]   ;;  %v13724_v15 = vld [vmem:[#allocation5 + $0xc80] ss:$1272 sps:$4 sm:$0xff]   ;;  %v13730_v16 = vld [vmem:[#allocation5 + $0x24] ss:$1272 sps:$4 sm:$0xff]  }
  0x45   :  { %v1886_v4 = vpack.c.bf16 %v237_v45, %v237_v45  ;;  %v2044_v5 = vpack.c.bf16 %v907_v46, %v907_v46  ;;  %v910_v12 = vcombine.high %v94_v60, %v94_v60  ;;  %v254_v18 = vrot.slane %v55_v13, %v14868_v9  ;;  %v13728_v22 = vld [vmem:[#allocation5 + $0x20] ss:$1272 sps:$4 sm:$0xff]   ;;  %v13736_v26 = vld [vmem:[#allocation5 + $0xa14] ss:$1272 sps:$4 sm:$0xff]  }
  0x46   :  { %v246_v1 = vcombine.high %v244_v63, %v244_v63  ;;  %v925_v2 = vcombine.high %v917_v0, %v917_v0  ;;  %v13731_v23 = vld [vmem:[#allocation5 + $0x298] ss:$1272 sps:$4 sm:$0xff]   ;;  %v1888_v24 = vpack.c.bf16 %v244_v63, %v244_v63  ;;  %v2046_v25 = vpack.c.bf16 %v917_v0, %v917_v0  ;;  %v13739_v27 = vld [vmem:[#allocation5 + $0xc8c] ss:$1272 sps:$4 sm:$0xff]   ;;  %v13737_v33 = vld [vmem:[#allocation5 + $0xc88] ss:$1272 sps:$4 sm:$0xff]  }
  0x47   :  { %v924_v19 = vrot.slane %v910_v12, %v14868_v9  ;;  %v262_v20 = vcombine.high %v254_v18, %v254_v18  ;;  %v13744_v39 = vld [vmem:[#allocation5 + $0x2a0] ss:$1272 sps:$4 sm:$0xff]   ;;  %v13752_v45 = vld [vmem:[#allocation5 + $0xc94] ss:$1272 sps:$4 sm:$0xff]   ;;  %v13770_v12 = vld [vmem:[#allocation5 + $0x2b0] ss:$1272 sps:$4 sm:$0xff]  }
  0x48   :  { %6056 = vmatmul.mubr.bf16.vlgmr.msra.gmra.mrb[0].mxu1 %v1882_v31  ;;  %v1889_v10 = vpack.c.bf16 %v246_v1, %v246_v1  ;;  %v2047_v11 = vpack.c.bf16 %v925_v2, %v925_v2  ;;  %v247_v31 = vcombine.high %v55_v13, %v55_v13  ;;  %v56_v48 = vld [vmem:[#allocation2 + $0x18] sm:$0xff] }
  0x49   :  { %9216 = vmatmul.mubr.bf16.vlgmr.msra.gmra.mrb[0].mxu0 %v2040_v32  ;;  %6064 = vmatpush1.bf16.xpose.msra.mxu1 %v13689_v30  ;;  %v926_v21 = vcombine.high %v924_v19, %v924_v19  ;;  %v1891_v28 = vpack.c.bf16 %v262_v20, %v262_v20  ;;  %v13734_v30 = vld [vmem:[#allocation5 + $0xa10] ss:$1272 sps:$4 sm:$0xff]   ;;  %v95_v32 = vld [vmem:[#allocation2 + $0x150] sm:$0xff]  ;;  %v96_v2 = vld [vmem:[#allocation2 + $0x158] sm:$0xff] }
  0x4a   :  { %9224 = vmatpush1.bf16.xpose.msra.mxu0 %v13693_v34  ;;  %6065 = vmatprep.subr.bf16.mxu1 %v13698_v35  ;;  %v13742_v34 = vld [vmem:[#allocation5 + $0x2c] ss:$1272 sps:$4 sm:$0xff]   ;;  %v13757_v57 = vld [vmem:[#allocation5 + $0x2a8] ss:$1272 sps:$4 sm:$0xff]   ;;  %v13765_v63 = vld [vmem:[#allocation5 + $0xc9c] ss:$1272 sps:$4 sm:$0xff]  }
  0x4b   :  { %9225 = vmatprep.subr.bf16.mxu0 %v13701_v36  ;;  %6095 = vmatprep.mubr.bf16.mxu1 %v1885_v37  ;;  %v2049_v29 = vpack.c.bf16 %v926_v21, %v926_v21  ;;  %v13746_v35 = vld [vmem:[#allocation5 + $0x2a4] ss:$1272 sps:$4 sm:$0xff]   ;;  %v261_v36 = vrot.slane %v247_v31, %v14868_v9  ;;  %v934_v37 = vrot.slane %v95_v32, %v14868_v9 }
  0x4c   :  { %9255 = vmatprep.mubr.bf16.mxu0 %v2043_v38  ;;  %v13740_v38 = vld [vmem:[#allocation5 + $0x28] ss:$1272 sps:$4 sm:$0xff]  }
  0x4d   :  { %v942_v41 = vcombine.high %v934_v37, %v934_v37  ;;  %v1892_v60 = vpack.c.bf16 %v261_v36, %v261_v36  ;;  %v57_v21 = vld [vmem:[#allocation2 + $0x20] sm:$0xff] }
  0x4f   :  { %v2051_v47 = vpack.c.bf16 %v942_v41, %v942_v41  ;;  %v13789_v41 = vld [vmem:[#allocation5 + $0xca8] ss:$1272 sps:$4 sm:$0xff]  }
  0x51   :  { %6066 = vmatpush1.bf16.xpose.msra.mxu1 %v13696_v40  ;;  %v263_v40 = vcombine.high %v261_v36, %v261_v36  ;;  %v13791_v36 = vld [vmem:[#allocation5 + $0xcac] ss:$1272 sps:$4 sm:$0xff]  }
  0x52   :  { %9226 = vmatpush1.bf16.xpose.msra.mxu0 %v13699_v42  ;;  %6103 = vmatprep.subr.bf16.mxu1 %v13704_v43  ;;  %v1890_v42 = vpack.c.bf16 %v254_v18, %v254_v18  ;;  %v2048_v43 = vpack.c.bf16 %v924_v19, %v924_v19  ;;  %v13778_v18 = vld [vmem:[#allocation5 + $0xca4] ss:$1272 sps:$4 sm:$0xff]  }
  0x53   :  { %9263 = vmatprep.subr.bf16.mxu0 %v13707_v44  ;;  %v13749_v44 = vld [vmem:[#allocation5 + $0xa1c] ss:$1272 sps:$4 sm:$0xff]   ;;  %v1893_v46 = vpack.c.bf16 %v263_v40, %v263_v40  ;;  %v13786_v40 = vld [vmem:[#allocation5 + $0xa30] ss:$1272 sps:$4 sm:$0xff]  }
  0x58   :  { %6096 = vmatmul.mubr.bf16.vlgmr.msra.gmra.mrb[0].mxu1 %v1884_v49  ;;  %v13747_v49 = vld [vmem:[#allocation5 + $0xa18] ss:$1272 sps:$4 sm:$0xff]  }
  0x59   :  { %9256 = vmatmul.mubr.bf16.vlgmr.msra.gmra.mrb[0].mxu0 %v2042_v50  ;;  %6104 = vmatpush1.bf16.xpose.msra.mxu1 %v13702_v51  ;;  %v13750_v50 = vld [vmem:[#allocation5 + $0xc90] ss:$1272 sps:$4 sm:$0xff]   ;;  %v927_v51 = vcombine.high %v95_v32, %v95_v32 }
  0x5a   :  { %9264 = vmatpush1.bf16.xpose.msra.mxu0 %v13705_v52  ;;  %6105 = vmatprep.subr.bf16.mxu1 %v13710_v53  ;;  %v13756_v52 = vld [vmem:[#allocation5 + $0x34] ss:$1272 sps:$4 sm:$0xff]  }
  0x5b   :  { %9265 = vmatprep.subr.bf16.mxu0 %v13713_v54  ;;  %6135 = vmatprep.mubr.bf16.mxu1 %v1887_v55  ;;  %v13759_v53 = vld [vmem:[#allocation5 + $0x2ac] ss:$1272 sps:$4 sm:$0xff]   ;;  %v271_v54 = vrot.slane %v56_v48, %v14868_v9  ;;  %v941_v55 = vrot.slane %v927_v51, %v14868_v9 }
  0x5c   :  { %9295 = vmatprep.mubr.bf16.mxu0 %v2045_v56  ;;  %v13754_v56 = vld [vmem:[#allocation5 + $0x30] ss:$1272 sps:$4 sm:$0xff]  }
  0x61   :  { %6106 = vmatpush1.bf16.xpose.msra.mxu1 %v13708_v58  ;;  %v279_v58 = vcombine.high %v271_v54, %v271_v54 }
  0x62   :  { %9266 = vmatpush1.bf16.xpose.msra.mxu0 %v13711_v59  ;;  %6143 = vmatprep.subr.bf16.mxu1 %v13716_v61  ;;  %v943_v59 = vcombine.high %v941_v55, %v941_v55  ;;  %v2050_v61 = vpack.c.bf16 %v934_v37, %v934_v37 }
  0x63   :  { %9303 = vmatprep.subr.bf16.mxu0 %v13720_v62  ;;  %v13762_v62 = vld [vmem:[#allocation5 + $0xa24] ss:$1272 sps:$4 sm:$0xff]   ;;  %v1895_v0 = vpack.c.bf16 %v279_v58, %v279_v58  ;;  %v13799_v58 = vld [vmem:[#allocation5 + $0xa38] ss:$1272 sps:$4 sm:$0xff]  }
  0x64   :  { %v2053_v1 = vpack.c.bf16 %v943_v59, %v943_v59  ;;  %v13802_v59 = vld [vmem:[#allocation5 + $0xcb0] ss:$1272 sps:$4 sm:$0xff]  }
  0x68   :  { %6136 = vmatmul.mubr.bf16.vlgmr.msra.gmra.mrb[0].mxu1 %v1886_v4  ;;  %v13763_v4 = vld [vmem:[#allocation5 + $0xc98] ss:$1272 sps:$4 sm:$0xff]  }
  0x69   :  { %9296 = vmatmul.mubr.bf16.vlgmr.msra.gmra.mrb[0].mxu0 %v2044_v5  ;;  %6144 = vmatpush1.bf16.xpose.msra.mxu1 %v13714_v3  ;;  %v13760_v3 = vld [vmem:[#allocation5 + $0xa20] ss:$1272 sps:$4 sm:$0xff]   ;;  %v264_v5 = vcombine.high %v56_v48, %v56_v48 }
  0x6a   :  { %9304 = vmatpush1.bf16.xpose.msra.mxu0 %v13718_v6  ;;  %6145 = vmatprep.subr.bf16.mxu1 %v13723_v7  ;;  %v13768_v6 = vld [vmem:[#allocation5 + $0x3c] ss:$1272 sps:$4 sm:$0xff]   ;;  %v13796_v48 = vld [vmem:[#allocation5 + $0x2c0] ss:$1272 sps:$4 sm:$0xff]  }
  0x6b   :  { %9305 = vmatprep.subr.bf16.mxu0 %v13726_v8  ;;  %6175 = vmatprep.mubr.bf16.mxu1 %v1889_v10  ;;  %v13772_v7 = vld [vmem:[#allocation5 + $0x2b4] ss:$1272 sps:$4 sm:$0xff]   ;;  %v278_v8 = vrot.slane %v264_v5, %v14868_v9  ;;  %v951_v10 = vrot.slane %v96_v2, %v14868_v9 }
  0x6c   :  { %9335 = vmatprep.mubr.bf16.mxu0 %v2047_v11  ;;  %v13766_v11 = vld [vmem:[#allocation5 + $0x38] ss:$1272 sps:$4 sm:$0xff]  }
  0x6d   :  { %v280_v13 = vcombine.high %v278_v8, %v278_v8 }
  0x6f   :  { %v1897_v19 = vpack.c.bf16 %v280_v13, %v280_v13  ;;  %v13812_v13 = vld [vmem:[#allocation5 + $0xa40] ss:$1272 sps:$4 sm:$0xff]  }
  0x71   :  { %6146 = vmatpush1.bf16.xpose.msra.mxu1 %v13721_v14  ;;  %v959_v14 = vcombine.high %v951_v10, %v951_v10 }
  0x72   :  { %9306 = vmatpush1.bf16.xpose.msra.mxu0 %v13724_v15  ;;  %6183 = vmatprep.subr.bf16.mxu1 %v13730_v16  ;;  %v1894_v15 = vpack.c.bf16 %v271_v54, %v271_v54  ;;  %v2052_v16 = vpack.c.bf16 %v941_v55, %v941_v55  ;;  %v13804_v54 = vld [vmem:[#allocation5 + $0xcb4] ss:$1272 sps:$4 sm:$0xff]  }
  0x73   :  { %9343 = vmatprep.subr.bf16.mxu0 %v13733_v17  ;;  %v13775_v17 = vld [vmem:[#allocation5 + $0xa2c] ss:$1272 sps:$4 sm:$0xff]   ;;  %v2055_v20 = vpack.c.bf16 %v959_v14, %v959_v14  ;;  %v13815_v14 = vld [vmem:[#allocation5 + $0xcb8] ss:$1272 sps:$4 sm:$0xff]  }
  0x78   :  { %6176 = vmatmul.mubr.bf16.vlgmr.msra.gmra.mrb[0].mxu1 %v1888_v24  ;;  %v944_v24 = vcombine.high %v96_v2, %v96_v2  ;;  %v13809_v2 = vld [vmem:[#allocation5 + $0x2c8] ss:$1272 sps:$4 sm:$0xff]  }
  0x79   :  { %9336 = vmatmul.mubr.bf16.vlgmr.msra.gmra.mrb[0].mxu0 %v2046_v25  ;;  %6184 = vmatpush1.bf16.xpose.msra.mxu1 %v13728_v22  ;;  %v13773_v22 = vld [vmem:[#allocation5 + $0xa28] ss:$1272 sps:$4 sm:$0xff]   ;;  %v13782_v25 = vld [vmem:[#allocation5 + $0x44] ss:$1272 sps:$4 sm:$0xff]  }
  0x7a   :  { %9344 = vmatpush1.bf16.xpose.msra.mxu0 %v13731_v23  ;;  %6185 = vmatprep.subr.bf16.mxu1 %v13736_v26  ;;  %v13776_v23 = vld [vmem:[#allocation5 + $0xca0] ss:$1272 sps:$4 sm:$0xff]   ;;  %v13785_v26 = vld [vmem:[#allocation5 + $0x2bc] ss:$1272 sps:$4 sm:$0xff]  }
  0x7b   :  { %9345 = vmatprep.subr.bf16.mxu0 %v13739_v27  ;;  %6215 = vmatprep.mubr.bf16.mxu1 %v1891_v28  ;;  %v288_v27 = vrot.slane %v57_v21, %v14868_v9  ;;  %v958_v28 = vrot.slane %v944_v24, %v14868_v9 }
  0x7c   :  { %9375 = vmatprep.mubr.bf16.mxu0 %v2049_v29  ;;  %v13780_v29 = vld [vmem:[#allocation5 + $0x40] ss:$1272 sps:$4 sm:$0xff]  }
  0x7d   :  { %v296_v31 = vcombine.high %v288_v27, %v288_v27  ;;  %v960_v32 = vcombine.high %v958_v28, %v958_v28  ;;  %v1898_v51 = vpack.c.bf16 %v288_v27, %v288_v27  ;;  %v13830_v27 = vld [vmem:[#allocation5 + $0xcc4] ss:$1272 sps:$4 sm:$0xff]  }
  0x7f   :  { %v1899_v37 = vpack.c.bf16 %v296_v31, %v296_v31  ;;  %v13825_v31 = vld [vmem:[#allocation5 + $0xa48] ss:$1272 sps:$4 sm:$0xff]  }
  0x81   :  { %6186 = vmatpush1.bf16.xpose.msra.mxu1 %v13734_v30  ;;  %v13783_v30 = vld [vmem:[#allocation5 + $0x2b8] ss:$1272 sps:$4 sm:$0xff]  }
  0x82   :  { %9346 = vmatpush1.bf16.xpose.msra.mxu0 %v13737_v33  ;;  %6223 = vmatprep.subr.bf16.mxu1 %v13742_v34  ;;  %v1896_v33 = vpack.c.bf16 %v278_v8, %v278_v8  ;;  %v2054_v34 = vpack.c.bf16 %v951_v10, %v951_v10  ;;  %v13817_v8 = vld [vmem:[#allocation5 + $0xcbc] ss:$1272 sps:$4 sm:$0xff]  }
  0x83   :  { %9383 = vmatprep.subr.bf16.mxu0 %v13746_v35  ;;  %v13788_v35 = vld [vmem:[#allocation5 + $0xa34] ss:$1272 sps:$4 sm:$0xff]  }
  0x88   :  { %6216 = vmatmul.mubr.bf16.vlgmr.msra.gmra.mrb[0].mxu1 %v1890_v42  ;;  %v281_v42 = vcombine.high %v57_v21, %v57_v21  ;;  %v13822_v21 = vld [vmem:[#allocation5 + $0x2d0] ss:$1272 sps:$4 sm:$0xff]  }
  0x89   :  { %9376 = vmatmul.mubr.bf16.vlgmr.msra.gmra.mrb[0].mxu0 %v2048_v43  ;;  %6224 = vmatpush1.bf16.xpose.msra.mxu1 %v13740_v38  ;;  %v2057_v38 = vpack.c.bf16 %v960_v32, %v960_v32  ;;  %v13794_v43 = vld [vmem:[#allocation5 + $0x4c] ss:$1272 sps:$4 sm:$0xff]   ;;  %v13828_v32 = vld [vmem:[#allocation5 + $0xcc0] ss:$1272 sps:$4 sm:$0xff]  }
  0x8a   :  { %9384 = vmatpush1.bf16.xpose.msra.mxu0 %v13744_v39  ;;  %6225 = vmatprep.subr.bf16.mxu1 %v13749_v44  ;;  %v97_v39 = vld [vmem:[#allocation2 + $0x160] sm:$0xff] }
  0x8b   :  { %9385 = vmatprep.subr.bf16.mxu0 %v13752_v45  ;;  %6255 = vmatprep.mubr.bf16.mxu1 %v1893_v46  ;;  %v13798_v44 = vld [vmem:[#allocation5 + $0x2c4] ss:$1272 sps:$4 sm:$0xff]   ;;  %v295_v45 = vrot.slane %v281_v42, %v14868_v9  ;;  %v968_v46 = vrot.slane %v97_v39, %v14868_v9 }
  0x8c   :  { %9415 = vmatprep.mubr.bf16.mxu0 %v2051_v47  ;;  %v13792_v47 = vld [vmem:[#allocation5 + $0x48] ss:$1272 sps:$4 sm:$0xff]  }
  0x8d   :  { %v1900_v5 = vpack.c.bf16 %v295_v45, %v295_v45 }
  0x91   :  { %6226 = vmatpush1.bf16.xpose.msra.mxu1 %v13747_v49  ;;  %v297_v49 = vcombine.high %v295_v45, %v295_v45  ;;  %v13843_v45 = vld [vmem:[#allocation5 + $0xccc] ss:$1272 sps:$4 sm:$0xff]  }
  0x92   :  { %9386 = vmatpush1.bf16.xpose.msra.mxu0 %v13750_v50  ;;  %6263 = vmatprep.subr.bf16.mxu1 %v13756_v52  ;;  %v976_v50 = vcombine.high %v968_v46, %v968_v46  ;;  %v2056_v52 = vpack.c.bf16 %v958_v28, %v958_v28 }
  0x93   :  { %9423 = vmatprep.subr.bf16.mxu0 %v13759_v53  ;;  %v13801_v53 = vld [vmem:[#allocation5 + $0xa3c] ss:$1272 sps:$4 sm:$0xff]   ;;  %v1901_v55 = vpack.c.bf16 %v297_v49, %v297_v49  ;;  %v13838_v49 = vld [vmem:[#allocation5 + $0xa50] ss:$1272 sps:$4 sm:$0xff]  }
  0x98   :  { %6256 = vmatmul.mubr.bf16.vlgmr.msra.gmra.mrb[0].mxu1 %v1892_v60  ;;  %v961_v60 = vcombine.high %v97_v39, %v97_v39  ;;  %v13835_v39 = vld [vmem:[#allocation5 + $0x2d8] ss:$1272 sps:$4 sm:$0xff]  }
  0x99   :  { %9416 = vmatmul.mubr.bf16.vlgmr.msra.gmra.mrb[0].mxu0 %v2050_v61  ;;  %6264 = vmatpush1.bf16.xpose.msra.mxu1 %v13754_v56  ;;  %v2059_v56 = vpack.c.bf16 %v976_v50, %v976_v50  ;;  %v13808_v61 = vld [vmem:[#allocation5 + $0x54] ss:$1272 sps:$4 sm:$0xff]   ;;  %v13841_v50 = vld [vmem:[#allocation5 + $0xcc8] ss:$1272 sps:$4 sm:$0xff]  }
  0x9a   :  { %9424 = vmatpush1.bf16.xpose.msra.mxu0 %v13757_v57  ;;  %6265 = vmatprep.subr.bf16.mxu1 %v13762_v62  ;;  %v58_v57 = vld [vmem:[#allocation2 + $0x28] sm:$0xff] }
  0x9b   :  { %9425 = vmatprep.subr.bf16.mxu0 %v13765_v63  ;;  %6295 = vmatprep.mubr.bf16.mxu1 %v1895_v0  ;;  %v13811_v62 = vld [vmem:[#allocation5 + $0x2cc] ss:$1272 sps:$4 sm:$0xff]   ;;  %v305_v63 = vrot.slane %v58_v57, %v14868_v9  ;;  %v975_v0 = vrot.slane %v961_v60, %v14868_v9 }
  0x9c   :  { %9455 = vmatprep.mubr.bf16.mxu0 %v2053_v1  ;;  %v13806_v1 = vld [vmem:[#allocation5 + $0x50] ss:$1272 sps:$4 sm:$0xff]  }
  0x9d   :  { %v1902_v24 = vpack.c.bf16 %v305_v63, %v305_v63 }
  0xa1   :  { %6266 = vmatpush1.bf16.xpose.msra.mxu1 %v13760_v3  ;;  %v313_v3 = vcombine.high %v305_v63, %v305_v63  ;;  %v13856_v63 = vld [vmem:[#allocation5 + $0xcd4] ss:$1272 sps:$4 sm:$0xff]  }
  0xa2   :  { %9426 = vmatpush1.bf16.xpose.msra.mxu0 %v13763_v4  ;;  %6303 = vmatprep.subr.bf16.mxu1 %v13768_v6  ;;  %v977_v4 = vcombine.high %v975_v0, %v975_v0  ;;  %v2058_v6 = vpack.c.bf16 %v968_v46, %v968_v46 }
  0xa3   :  { %9463 = vmatprep.subr.bf16.mxu0 %v13772_v7  ;;  %v13814_v7 = vld [vmem:[#allocation5 + $0xa44] ss:$1272 sps:$4 sm:$0xff]   ;;  %v1903_v10 = vpack.c.bf16 %v313_v3, %v313_v3  ;;  %v13851_v3 = vld [vmem:[#allocation5 + $0xa58] ss:$1272 sps:$4 sm:$0xff]  }
  0xa8   :  { %6296 = vmatmul.mubr.bf16.vlgmr.msra.gmra.mrb[0].mxu1 %v1894_v15  ;;  %v298_v15 = vcombine.high %v58_v57, %v58_v57  ;;  %v13848_v57 = vld [vmem:[#allocation5 + $0x2e0] ss:$1272 sps:$4 sm:$0xff]  }
  0xa9   :  { %9456 = vmatmul.mubr.bf16.vlgmr.msra.gmra.mrb[0].mxu0 %v2052_v16  ;;  %6304 = vmatpush1.bf16.xpose.msra.mxu1 %v13766_v11  ;;  %v2061_v11 = vpack.c.bf16 %v977_v4, %v977_v4  ;;  %v13820_v16 = vld [vmem:[#allocation5 + $0x5c] ss:$1272 sps:$4 sm:$0xff]   ;;  %v13854_v4 = vld [vmem:[#allocation5 + $0xcd0] ss:$1272 sps:$4 sm:$0xff]  }
  0xaa   :  { %9464 = vmatpush1.bf16.xpose.msra.mxu0 %v13770_v12  ;;  %6305 = vmatprep.subr.bf16.mxu1 %v13775_v17  ;;  %v98_v12 = vld [vmem:[#allocation2 + $0x168] sm:$0xff] }
  0xab   :  { %9465 = vmatprep.subr.bf16.mxu0 %v13778_v18  ;;  %6335 = vmatprep.mubr.bf16.mxu1 %v1897_v19  ;;  %v13824_v17 = vld [vmem:[#allocation5 + $0x2d4] ss:$1272 sps:$4 sm:$0xff]   ;;  %v312_v18 = vrot.slane %v298_v15, %v14868_v9  ;;  %v985_v19 = vrot.slane %v98_v12, %v14868_v9 }
  0xac   :  { %9495 = vmatprep.mubr.bf16.mxu0 %v2055_v20  ;;  %v13818_v20 = vld [vmem:[#allocation5 + $0x58] ss:$1272 sps:$4 sm:$0xff]  }
  0xad   :  { %v1904_v42 = vpack.c.bf16 %v312_v18, %v312_v18 }
  0xb1   :  { %6306 = vmatpush1.bf16.xpose.msra.mxu1 %v13773_v22  ;;  %v314_v22 = vcombine.high %v312_v18, %v312_v18  ;;  %v13869_v18 = vld [vmem:[#allocation5 + $0xcdc] ss:$1272 sps:$4 sm:$0xff]  }
  0xb2   :  { %9466 = vmatpush1.bf16.xpose.msra.mxu0 %v13776_v23  ;;  %6343 = vmatprep.subr.bf16.mxu1 %v13782_v25  ;;  %v993_v23 = vcombine.high %v985_v19, %v985_v19  ;;  %v2060_v25 = vpack.c.bf16 %v975_v0, %v975_v0 }
  0xb3   :  { %9503 = vmatprep.subr.bf16.mxu0 %v13785_v26  ;;  %v13827_v26 = vld [vmem:[#allocation5 + $0xa4c] ss:$1272 sps:$4 sm:$0xff]   ;;  %v1905_v28 = vpack.c.bf16 %v314_v22, %v314_v22  ;;  %v13864_v22 = vld [vmem:[#allocation5 + $0xa60] ss:$1272 sps:$4 sm:$0xff]  }
  0xb8   :  { %6336 = vmatmul.mubr.bf16.vlgmr.msra.gmra.mrb[0].mxu1 %v1896_v33  ;;  %v978_v33 = vcombine.high %v98_v12, %v98_v12  ;;  %v13861_v12 = vld [vmem:[#allocation5 + $0x2e8] ss:$1272 sps:$4 sm:$0xff]  }
  0xb9   :  { %9496 = vmatmul.mubr.bf16.vlgmr.msra.gmra.mrb[0].mxu0 %v2054_v34  ;;  %6344 = vmatpush1.bf16.xpose.msra.mxu1 %v13780_v29  ;;  %v2063_v29 = vpack.c.bf16 %v993_v23, %v993_v23  ;;  %v13834_v34 = vld [vmem:[#allocation5 + $0x64] ss:$1272 sps:$4 sm:$0xff]   ;;  %v13867_v23 = vld [vmem:[#allocation5 + $0xcd8] ss:$1272 sps:$4 sm:$0xff]  }
  0xba   :  { %9504 = vmatpush1.bf16.xpose.msra.mxu0 %v13783_v30  ;;  %6345 = vmatprep.subr.bf16.mxu1 %v13788_v35  ;;  %v59_v30 = vld [vmem:[#allocation2 + $0x30] sm:$0xff] }
  0xbb   :  { %9505 = vmatprep.subr.bf16.mxu0 %v13791_v36  ;;  %6375 = vmatprep.mubr.bf16.mxu1 %v1899_v37  ;;  %v13837_v35 = vld [vmem:[#allocation5 + $0x2dc] ss:$1272 sps:$4 sm:$0xff]   ;;  %v322_v36 = vrot.slane %v59_v30, %v14868_v9  ;;  %v992_v37 = vrot.slane %v978_v33, %v14868_v9 }
  0xbc   :  { %9535 = vmatprep.mubr.bf16.mxu0 %v2057_v38  ;;  %v13832_v38 = vld [vmem:[#allocation5 + $0x60] ss:$1272 sps:$4 sm:$0xff]  }
  0xbd   :  { %v1906_v60 = vpack.c.bf16 %v322_v36, %v322_v36 }
  0xc1   :  { %6346 = vmatpush1.bf16.xpose.msra.mxu1 %v13786_v40  ;;  %v330_v40 = vcombine.high %v322_v36, %v322_v36  ;;  %v13882_v36 = vld [vmem:[#allocation5 + $0xce4] ss:$1272 sps:$4 sm:$0xff]  }
  0xc2   :  { %9506 = vmatpush1.bf16.xpose.msra.mxu0 %v13789_v41  ;;  %6383 = vmatprep.subr.bf16.mxu1 %v13794_v43  ;;  %v994_v41 = vcombine.high %v992_v37, %v992_v37  ;;  %v2062_v43 = vpack.c.bf16 %v985_v19, %v985_v19 }
  0xc3   :  { %9543 = vmatprep.subr.bf16.mxu0 %v13798_v44  ;;  %v13840_v44 = vld [vmem:[#allocation5 + $0xa54] ss:$1272 sps:$4 sm:$0xff]   ;;  %v1907_v46 = vpack.c.bf16 %v330_v40, %v330_v40  ;;  %v13877_v40 = vld [vmem:[#allocation5 + $0xa68] ss:$1272 sps:$4 sm:$0xff]  }
  0xc8   :  { %6376 = vmatmul.mubr.bf16.vlgmr.msra.gmra.mrb[0].mxu1 %v1898_v51  ;;  %v315_v51 = vcombine.high %v59_v30, %v59_v30  ;;  %v13874_v30 = vld [vmem:[#allocation5 + $0x2f0] ss:$1272 sps:$4 sm:$0xff]  }
  0xc9   :  { %9536 = vmatmul.mubr.bf16.vlgmr.msra.gmra.mrb[0].mxu0 %v2056_v52  ;;  %6384 = vmatpush1.bf16.xpose.msra.mxu1 %v13792_v47  ;;  %v2065_v47 = vpack.c.bf16 %v994_v41, %v994_v41  ;;  %v13846_v52 = vld [vmem:[#allocation5 + $0x6c] ss:$1272 sps:$4 sm:$0xff]   ;;  %v13880_v41 = vld [vmem:[#allocation5 + $0xce0] ss:$1272 sps:$4 sm:$0xff]  }
  0xca   :  { %9544 = vmatpush1.bf16.xpose.msra.mxu0 %v13796_v48  ;;  %6385 = vmatprep.subr.bf16.mxu1 %v13801_v53  ;;  %v99_v48 = vld [vmem:[#allocation2 + $0x170] sm:$0xff]  ;;  %v13850_v53 = vld [vmem:[#allocation5 + $0x2e4] ss:$1272 sps:$4 sm:$0xff]  }
  0xcb   :  { %9545 = vmatprep.subr.bf16.mxu0 %v13804_v54  ;;  %6415 = vmatprep.mubr.bf16.mxu1 %v1901_v55  ;;  %v329_v54 = vrot.slane %v315_v51, %v14868_v9  ;;  %v1002_v55 = vrot.slane %v99_v48, %v14868_v9 }
  0xcc   :  { %9575 = vmatprep.mubr.bf16.mxu0 %v2059_v56  ;;  %v13844_v56 = vld [vmem:[#allocation5 + $0x68] ss:$1272 sps:$4 sm:$0xff]  }
  0xcd   :  { %v1908_v15 = vpack.c.bf16 %v329_v54, %v329_v54 }
  0xd1   :  { %6386 = vmatpush1.bf16.xpose.msra.mxu1 %v13799_v58  ;;  %v331_v58 = vcombine.high %v329_v54, %v329_v54  ;;  %v13895_v54 = vld [vmem:[#allocation5 + $0xcec] ss:$1272 sps:$4 sm:$0xff]  }
  0xd2   :  { %9546 = vmatpush1.bf16.xpose.msra.mxu0 %v13802_v59  ;;  %6423 = vmatprep.subr.bf16.mxu1 %v13808_v61  ;;  %v1010_v59 = vcombine.high %v1002_v55, %v1002_v55  ;;  %v2064_v61 = vpack.c.bf16 %v992_v37, %v992_v37 }
  0xd3   :  { %9583 = vmatprep.subr.bf16.mxu0 %v13811_v62  ;;  %v13853_v62 = vld [vmem:[#allocation5 + $0xa5c] ss:$1272 sps:$4 sm:$0xff]   ;;  %v1909_v0 = vpack.c.bf16 %v331_v58, %v331_v58  ;;  %v13890_v58 = vld [vmem:[#allocation5 + $0xa70] ss:$1272 sps:$4 sm:$0xff]  }
  0xd8   :  { %6416 = vmatmul.mubr.bf16.vlgmr.msra.gmra.mrb[0].mxu1 %v1900_v5  ;;  %v995_v5 = vcombine.high %v99_v48, %v99_v48  ;;  %v13887_v48 = vld [vmem:[#allocation5 + $0x2f8] ss:$1272 sps:$4 sm:$0xff]  }
  0xd9   :  { %9576 = vmatmul.mubr.bf16.vlgmr.msra.gmra.mrb[0].mxu0 %v2058_v6  ;;  %6424 = vmatpush1.bf16.xpose.msra.mxu1 %v13806_v1  ;;  %v2067_v1 = vpack.c.bf16 %v1010_v59, %v1010_v59  ;;  %v13860_v6 = vld [vmem:[#allocation5 + $0x74] ss:$1272 sps:$4 sm:$0xff]   ;;  %v13893_v59 = vld [vmem:[#allocation5 + $0xce8] ss:$1272 sps:$4 sm:$0xff]  }
  0xda   :  { %9584 = vmatpush1.bf16.xpose.msra.mxu0 %v13809_v2  ;;  %6425 = vmatprep.subr.bf16.mxu1 %v13814_v7  ;;  %v60_v2 = vld [vmem:[#allocation2 + $0x38] sm:$0xff]  ;;  %v13863_v7 = vld [vmem:[#allocation5 + $0x2ec] ss:$1272 sps:$4 sm:$0xff]  }
  0xdb   :  { %9585 = vmatprep.subr.bf16.mxu0 %v13817_v8  ;;  %6455 = vmatprep.mubr.bf16.mxu1 %v1903_v10  ;;  %v339_v8 = vrot.slane %v60_v2, %v14868_v9  ;;  %v1009_v10 = vrot.slane %v995_v5, %v14868_v9 }
  0xdc   :  { %9615 = vmatprep.mubr.bf16.mxu0 %v2061_v11  ;;  %v13858_v11 = vld [vmem:[#allocation5 + $0x70] ss:$1272 sps:$4 sm:$0xff]  }
  0xdd   :  { %v1910_v33 = vpack.c.bf16 %v339_v8, %v339_v8 }
  0xe1   :  { %6426 = vmatpush1.bf16.xpose.msra.mxu1 %v13812_v13  ;;  %v347_v13 = vcombine.high %v339_v8, %v339_v8  ;;  %v13908_v8 = vld [vmem:[#allocation5 + $0xcf4] ss:$1272 sps:$4 sm:$0xff]  }
  0xe2   :  { %9586 = vmatpush1.bf16.xpose.msra.mxu0 %v13815_v14  ;;  %6463 = vmatprep.subr.bf16.mxu1 %v13820_v16  ;;  %v1011_v14 = vcombine.high %v1009_v10, %v1009_v10  ;;  %v2066_v16 = vpack.c.bf16 %v1002_v55, %v1002_v55 }
  0xe3   :  { %9623 = vmatprep.subr.bf16.mxu0 %v13824_v17  ;;  %v13866_v17 = vld [vmem:[#allocation5 + $0xa64] ss:$1272 sps:$4 sm:$0xff]   ;;  %v1911_v19 = vpack.c.bf16 %v347_v13, %v347_v13  ;;  %v13903_v13 = vld [vmem:[#allocation5 + $0xa78] ss:$1272 sps:$4 sm:$0xff]  }
  0xe8   :  { %6456 = vmatmul.mubr.bf16.vlgmr.msra.gmra.mrb[0].mxu1 %v1902_v24  ;;  %v332_v24 = vcombine.high %v60_v2, %v60_v2  ;;  %v13900_v2 = vld [vmem:[#allocation5 + $0x300] ss:$1272 sps:$4 sm:$0xff]  }
  0xe9   :  { %9616 = vmatmul.mubr.bf16.vlgmr.msra.gmra.mrb[0].mxu0 %v2060_v25  ;;  %6464 = vmatpush1.bf16.xpose.msra.mxu1 %v13818_v20  ;;  %v2069_v20 = vpack.c.bf16 %v1011_v14, %v1011_v14  ;;  %v13872_v25 = vld [vmem:[#allocation5 + $0x7c] ss:$1272 sps:$4 sm:$0xff]   ;;  %v13906_v14 = vld [vmem:[#allocation5 + $0xcf0] ss:$1272 sps:$4 sm:$0xff]  }
  0xea   :  { %9624 = vmatpush1.bf16.xpose.msra.mxu0 %v13822_v21  ;;  %6465 = vmatprep.subr.bf16.mxu1 %v13827_v26  ;;  %v100_v21 = vld [vmem:[#allocation2 + $0x178] sm:$0xff]  ;;  %v13876_v26 = vld [vmem:[#allocation5 + $0x2f4] ss:$1272 sps:$4 sm:$0xff]  }
  0xeb   :  { %9625 = vmatprep.subr.bf16.mxu0 %v13830_v27  ;;  %6495 = vmatprep.mubr.bf16.mxu1 %v1905_v28  ;;  %v346_v27 = vrot.slane %v332_v24, %v14868_v9  ;;  %v1019_v28 = vrot.slane %v100_v21, %v14868_v9 }
  0xec   :  { %9655 = vmatprep.mubr.bf16.mxu0 %v2063_v29  ;;  %v13870_v29 = vld [vmem:[#allocation5 + $0x78] ss:$1272 sps:$4 sm:$0xff]  }
  0xed   :  { %v1912_v51 = vpack.c.bf16 %v346_v27, %v346_v27 }
  0xf1   :  { %6466 = vmatpush1.bf16.xpose.msra.mxu1 %v13825_v31  ;;  %v348_v31 = vcombine.high %v346_v27, %v346_v27  ;;  %v13921_v27 = vld [vmem:[#allocation5 + $0xcfc] ss:$1272 sps:$4 sm:$0xff]  }
  0xf2   :  { %9626 = vmatpush1.bf16.xpose.msra.mxu0 %v13828_v32  ;;  %6503 = vmatprep.subr.bf16.mxu1 %v13834_v34  ;;  %v1027_v32 = vcombine.high %v1019_v28, %v1019_v28  ;;  %v2068_v34 = vpack.c.bf16 %v1009_v10, %v1009_v10 }
  0xf3   :  { %9663 = vmatprep.subr.bf16.mxu0 %v13837_v35  ;;  %v13879_v35 = vld [vmem:[#allocation5 + $0xa6c] ss:$1272 sps:$4 sm:$0xff]   ;;  %v1913_v37 = vpack.c.bf16 %v348_v31, %v348_v31 }
  0xf4   :  { %v102_v31 = vld [vmem:[#allocation2 + $0x188] sm:$0xff] }
  0xf8   :  { %6496 = vmatmul.mubr.bf16.vlgmr.msra.gmra.mrb[0].mxu1 %v1904_v42  ;;  %v1012_v42 = vcombine.high %v100_v21, %v100_v21  ;;  %v13913_v21 = vld [vmem:[#allocation5 + $0x308] ss:$1272 sps:$4 sm:$0xff]  }
  0xf9   :  { %9656 = vmatmul.mubr.bf16.vlgmr.msra.gmra.mrb[0].mxu0 %v2062_v43  ;;  %6504 = vmatpush1.bf16.xpose.msra.mxu1 %v13832_v38  ;;  %v2071_v38 = vpack.c.bf16 %v1027_v32, %v1027_v32  ;;  %v13886_v43 = vld [vmem:[#allocation5 + $0x84] ss:$1272 sps:$4 sm:$0xff]   ;;  %v13916_v32 = vld [vmem:[#allocation5 + $0xa80] ss:$1272 sps:$4 sm:$0xff]  }
  0xfa   :  { %9664 = vmatpush1.bf16.xpose.msra.mxu0 %v13835_v39  ;;  %6505 = vmatprep.subr.bf16.mxu1 %v13840_v44  ;;  %v61_v39 = vld [vmem:[#allocation2 + $0x40] sm:$0xff]  ;;  %v13889_v44 = vld [vmem:[#allocation5 + $0x2fc] ss:$1272 sps:$4 sm:$0xff]  }
  0xfb   :  { %9665 = vmatprep.subr.bf16.mxu0 %v13843_v45  ;;  %6535 = vmatprep.mubr.bf16.mxu1 %v1907_v46  ;;  %v356_v45 = vrot.slane %v61_v39, %v14868_v9  ;;  %v1026_v46 = vrot.slane %v1012_v42, %v14868_v9  ;;  %v13922_v42 = vld [vmem:[#allocation5 + $0x98] ss:$1272 sps:$4 sm:$0xff]  }
  0xfc   :  { %9695 = vmatprep.mubr.bf16.mxu0 %v2065_v47  ;;  %v13884_v47 = vld [vmem:[#allocation5 + $0x80] ss:$1272 sps:$4 sm:$0xff]  }
  0xfd   :  { %v1914_v5 = vpack.c.bf16 %v356_v45, %v356_v45 }
 0x101   :  { %6506 = vmatpush1.bf16.xpose.msra.mxu1 %v13838_v49  ;;  %v364_v49 = vcombine.high %v356_v45, %v356_v45  ;;  %v13934_v45 = vld [vmem:[#allocation5 + $0xd04] ss:$1272 sps:$4 sm:$0xff]  }
 0x102   :  { %9666 = vmatpush1.bf16.xpose.msra.mxu0 %v13841_v50  ;;  %6543 = vmatprep.subr.bf16.mxu1 %v13846_v52  ;;  %v1028_v50 = vcombine.high %v1026_v46, %v1026_v46  ;;  %v2070_v52 = vpack.c.bf16 %v1019_v28, %v1019_v28 }
 0x103   :  { %9703 = vmatprep.subr.bf16.mxu0 %v13850_v53  ;;  %v13892_v53 = vld [vmem:[#allocation5 + $0xa74] ss:$1272 sps:$4 sm:$0xff]   ;;  %v1915_v55 = vpack.c.bf16 %v364_v49, %v364_v49 }
 0x104   :  { %v63_v49 = vld [vmem:[#allocation2 + $0x50] sm:$0xff] }
 0x108   :  { %6536 = vmatmul.mubr.bf16.vlgmr.msra.gmra.mrb[0].mxu1 %v1906_v60  ;;  %v349_v60 = vcombine.high %v61_v39, %v61_v39 }
 0x109   :  { %9696 = vmatmul.mubr.bf16.vlgmr.msra.gmra.mrb[0].mxu0 %v2064_v61  ;;  %6544 = vmatpush1.bf16.xpose.msra.mxu1 %v13844_v56  ;;  %v2073_v56 = vpack.c.bf16 %v1028_v50, %v1028_v50  ;;  %v13898_v61 = vld [vmem:[#allocation5 + $0x8c] ss:$1272 sps:$4 sm:$0xff]   ;;  %v13929_v50 = vld [vmem:[#allocation5 + $0xa88] ss:$1272 sps:$4 sm:$0xff]  }
 0x10a   :  { %9704 = vmatpush1.bf16.xpose.msra.mxu0 %v13848_v57  ;;  %6545 = vmatprep.subr.bf16.mxu1 %v13853_v62  ;;  %v101_v57 = vld [vmem:[#allocation2 + $0x180] sm:$0xff] }
 0x10b   :  { %9705 = vmatprep.subr.bf16.mxu0 %v13856_v63  ;;  %6575 = vmatprep.mubr.bf16.mxu1 %v1909_v0  ;;  %v13902_v62 = vld [vmem:[#allocation5 + $0x304] ss:$1272 sps:$4 sm:$0xff]   ;;  %v363_v63 = vrot.slane %v349_v60, %v14868_v9  ;;  %v1036_v0 = vrot.slane %v101_v57, %v14868_v9  ;;  %v13936_v60 = vld [vmem:[#allocation5 + $0xa0] ss:$1272 sps:$4 sm:$0xff]  }
 0x10c   :  { %9735 = vmatprep.mubr.bf16.mxu0 %v2067_v1  ;;  %v13896_v1 = vld [vmem:[#allocation5 + $0x88] ss:$1272 sps:$4 sm:$0xff]  }
 0x10d   :  { %v1916_v24 = vpack.c.bf16 %v363_v63, %v363_v63 }
 0x111   :  { %6546 = vmatpush1.bf16.xpose.msra.mxu1 %v13851_v3  ;;  %v365_v3 = vcombine.high %v363_v63, %v363_v63  ;;  %v13947_v63 = vld [vmem:[#allocation5 + $0xd0c] ss:$1272 sps:$4 sm:$0xff]  }
 0x112   :  { %9706 = vmatpush1.bf16.xpose.msra.mxu0 %v13854_v4  ;;  %6583 = vmatprep.subr.bf16.mxu1 %v13860_v6  ;;  %v1044_v4 = vcombine.high %v1036_v0, %v1036_v0  ;;  %v2072_v6 = vpack.c.bf16 %v1026_v46, %v1026_v46 }
 0x113   :  { %9743 = vmatprep.subr.bf16.mxu0 %v13863_v7  ;;  %v13905_v7 = vld [vmem:[#allocation5 + $0xa7c] ss:$1272 sps:$4 sm:$0xff]   ;;  %v1917_v10 = vpack.c.bf16 %v365_v3, %v365_v3 }
 0x114   :  { %v103_v3 = vld [vmem:[#allocation2 + $0x190] sm:$0xff] }
 0x118   :  { %6576 = vmatmul.mubr.bf16.vlgmr.msra.gmra.mrb[0].mxu1 %v1908_v15  ;;  %v1029_v15 = vcombine.high %v101_v57, %v101_v57 }
 0x119   :  { %9736 = vmatmul.mubr.bf16.vlgmr.msra.gmra.mrb[0].mxu0 %v2066_v16  ;;  %6584 = vmatpush1.bf16.xpose.msra.mxu1 %v13858_v11  ;;  %v2075_v11 = vpack.c.bf16 %v1044_v4, %v1044_v4  ;;  %v13912_v16 = vld [vmem:[#allocation5 + $0x94] ss:$1272 sps:$4 sm:$0xff]   ;;  %v13942_v4 = vld [vmem:[#allocation5 + $0xa90] ss:$1272 sps:$4 sm:$0xff]  }
 0x11a   :  { %9744 = vmatpush1.bf16.xpose.msra.mxu0 %v13861_v12  ;;  %6585 = vmatprep.subr.bf16.mxu1 %v13866_v17  ;;  %v62_v12 = vld [vmem:[#allocation2 + $0x48] sm:$0xff] }
 0x11b   :  { %9745 = vmatprep.subr.bf16.mxu0 %v13869_v18  ;;  %6615 = vmatprep.mubr.bf16.mxu1 %v1911_v19  ;;  %v13915_v17 = vld [vmem:[#allocation5 + $0x30c] ss:$1272 sps:$4 sm:$0xff]   ;;  %v373_v18 = vrot.slane %v62_v12, %v14868_v9  ;;  %v1043_v19 = vrot.slane %v1029_v15, %v14868_v9  ;;  %v13948_v15 = vld [vmem:[#allocation5 + $0xa8] ss:$1272 sps:$4 sm:$0xff]  }
 0x11c   :  { %9775 = vmatprep.mubr.bf16.mxu0 %v2069_v20  ;;  %v13910_v20 = vld [vmem:[#allocation5 + $0x90] ss:$1272 sps:$4 sm:$0xff]  }
 0x121   :  { %6586 = vmatpush1.bf16.xpose.msra.mxu1 %v13864_v22  ;;  %v381_v22 = vcombine.high %v373_v18, %v373_v18 }
 0x122   :  { %9746 = vmatpush1.bf16.xpose.msra.mxu0 %v13867_v23  ;;  %6623 = vmatprep.subr.bf16.mxu1 %v13872_v25  ;;  %v1045_v23 = vcombine.high %v1043_v19, %v1043_v19  ;;  %v2074_v25 = vpack.c.bf16 %v1036_v0, %v1036_v0 }
 0x123   :  { %9783 = vmatprep.subr.bf16.mxu0 %v13876_v26  ;;  %v13918_v26 = vld [vmem:[#allocation5 + $0xa84] ss:$1272 sps:$4 sm:$0xff]   ;;  %v1919_v28 = vpack.c.bf16 %v381_v22, %v381_v22 }
 0x124   :  { %v64_v22 = vld [vmem:[#allocation2 + $0x58] sm:$0xff] }
 0x128   :  { %6616 = vmatmul.mubr.bf16.vlgmr.msra.gmra.mrb[0].mxu1 %v1910_v33  ;;  %v13919_v33 = vld [vmem:[#allocation5 + $0xcf8] ss:$1272 sps:$4 sm:$0xff]  }
 0x129   :  { %9776 = vmatmul.mubr.bf16.vlgmr.msra.gmra.mrb[0].mxu0 %v2068_v34  ;;  %6624 = vmatpush1.bf16.xpose.msra.mxu1 %v13870_v29  ;;  %v2077_v29 = vpack.c.bf16 %v1045_v23, %v1045_v23  ;;  %v13924_v34 = vld [vmem:[#allocation5 + $0x9c] ss:$1272 sps:$4 sm:$0xff]   ;;  %v13955_v23 = vld [vmem:[#allocation5 + $0xa98] ss:$1272 sps:$4 sm:$0xff]  }
 0x12a   :  { %9784 = vmatpush1.bf16.xpose.msra.mxu0 %v13874_v30  ;;  %6625 = vmatprep.subr.bf16.mxu1 %v13879_v35  ;;  %v366_v30 = vcombine.high %v62_v12, %v62_v12  ;;  %v13928_v35 = vld [vmem:[#allocation5 + $0x314] ss:$1272 sps:$4 sm:$0xff]  }
 0x12b   :  { %9785 = vmatprep.subr.bf16.mxu0 %v13882_v36  ;;  %6655 = vmatprep.mubr.bf16.mxu1 %v1913_v37  ;;  %v1053_v37 = vrot.slane %v102_v31, %v14868_v9 }
 0x12c   :  { %9815 = vmatprep.mubr.bf16.mxu0 %v2071_v38  ;;  %v380_v36 = vrot.slane %v366_v30, %v14868_v9 }
 0x12d   :  { %v1061_v39 = vcombine.high %v1053_v37, %v1053_v37 }
 0x12e   :  { %v382_v38 = vcombine.high %v380_v36, %v380_v36 }
 0x130   :  { %v1921_v46 = vpack.c.bf16 %v382_v38, %v382_v38 }
 0x131   :  { %6626 = vmatpush1.bf16.xpose.msra.mxu1 %v13877_v40  ;;  %v1918_v40 = vpack.c.bf16 %v373_v18, %v373_v18  ;;  %v13960_v18 = vld [vmem:[#allocation5 + $0xd14] ss:$1272 sps:$4 sm:$0xff]  }
 0x132   :  { %9786 = vmatpush1.bf16.xpose.msra.mxu0 %v13880_v41  ;;  %6663 = vmatprep.subr.bf16.mxu1 %v13886_v43  ;;  %v2076_v41 = vpack.c.bf16 %v1043_v19, %v1043_v19  ;;  %v13926_v43 = vld [vmem:[#allocation5 + $0x310] ss:$1272 sps:$4 sm:$0xff]  }
 0x133   :  { %9823 = vmatprep.subr.bf16.mxu0 %v13889_v44  ;;  %v13931_v44 = vld [vmem:[#allocation5 + $0xa8c] ss:$1272 sps:$4 sm:$0xff]  }
 0x138   :  { %6656 = vmatmul.mubr.bf16.vlgmr.msra.gmra.mrb[0].mxu1 %v1912_v51  ;;  %v13932_v51 = vld [vmem:[#allocation5 + $0xd00] ss:$1272 sps:$4 sm:$0xff]  }
 0x139   :  { %9816 = vmatmul.mubr.bf16.vlgmr.msra.gmra.mrb[0].mxu0 %v2070_v52  ;;  %6664 = vmatpush1.bf16.xpose.msra.mxu1 %v13884_v47  ;;  %v2079_v47 = vpack.c.bf16 %v1061_v39, %v1061_v39  ;;  %v13938_v52 = vld [vmem:[#allocation5 + $0xa4] ss:$1272 sps:$4 sm:$0xff]   ;;  %v400_v39 = vcombine.high %v64_v22, %v64_v22 }
 0x13a   :  { %9824 = vmatpush1.bf16.xpose.msra.mxu0 %v13887_v48  ;;  %6665 = vmatprep.subr.bf16.mxu1 %v13892_v53  ;;  %v1046_v48 = vcombine.high %v102_v31, %v102_v31  ;;  %v13941_v53 = vld [vmem:[#allocation5 + $0x31c] ss:$1272 sps:$4 sm:$0xff]  }
 0x13b   :  { %9825 = vmatprep.subr.bf16.mxu0 %v13895_v54  ;;  %6695 = vmatprep.mubr.bf16.mxu1 %v1915_v55  ;;  %v390_v54 = vrot.slane %v63_v49, %v14868_v9 }
 0x13c   :  { %9855 = vmatprep.mubr.bf16.mxu0 %v2073_v56  ;;  %v1060_v55 = vrot.slane %v1046_v48, %v14868_v9 }
 0x13d   :  { %v398_v56 = vcombine.high %v390_v54, %v390_v54 }
 0x13e   :  { %v1062_v57 = vcombine.high %v1060_v55, %v1060_v55 }
 0x13f   :  { %v1923_v0 = vpack.c.bf16 %v398_v56, %v398_v56 }
 0x141   :  { %6666 = vmatpush1.bf16.xpose.msra.mxu1 %v13890_v58  ;;  %v1920_v58 = vpack.c.bf16 %v380_v36, %v380_v36  ;;  %v13973_v36 = vld [vmem:[#allocation5 + $0xd1c] ss:$1272 sps:$4 sm:$0xff]  }
 0x142   :  { %9826 = vmatpush1.bf16.xpose.msra.mxu0 %v13893_v59  ;;  %6703 = vmatprep.subr.bf16.mxu1 %v13898_v61  ;;  %v2078_v59 = vpack.c.bf16 %v1053_v37, %v1053_v37  ;;  %v13939_v61 = vld [vmem:[#allocation5 + $0x318] ss:$1272 sps:$4 sm:$0xff]  }
 0x143   :  { %9863 = vmatprep.subr.bf16.mxu0 %v13902_v62  ;;  %v13944_v62 = vld [vmem:[#allocation5 + $0xa94] ss:$1272 sps:$4 sm:$0xff]  }
 0x148   :  { %6696 = vmatmul.mubr.bf16.vlgmr.msra.gmra.mrb[0].mxu1 %v1914_v5  ;;  %v13945_v5 = vld [vmem:[#allocation5 + $0xd08] ss:$1272 sps:$4 sm:$0xff]  }
 0x149   :  { %9856 = vmatmul.mubr.bf16.vlgmr.msra.gmra.mrb[0].mxu0 %v2072_v6  ;;  %6704 = vmatpush1.bf16.xpose.msra.mxu1 %v13896_v1  ;;  %v2081_v1 = vpack.c.bf16 %v1062_v57, %v1062_v57  ;;  %v13950_v6 = vld [vmem:[#allocation5 + $0xac] ss:$1272 sps:$4 sm:$0xff]  }
 0x14a   :  { %9864 = vmatpush1.bf16.xpose.msra.mxu0 %v13900_v2  ;;  %6705 = vmatprep.subr.bf16.mxu1 %v13905_v7  ;;  %v383_v2 = vcombine.high %v63_v49, %v63_v49  ;;  %v13954_v7 = vld [vmem:[#allocation5 + $0x324] ss:$1272 sps:$4 sm:$0xff]  }
 0x14b   :  { %9865 = vmatprep.subr.bf16.mxu0 %v13908_v8  ;;  %6735 = vmatprep.mubr.bf16.mxu1 %v1917_v10  ;;  %v1070_v10 = vrot.slane %v103_v3, %v14868_v9 }
 0x14c   :  { %9895 = vmatprep.mubr.bf16.mxu0 %v2075_v11  ;;  %v397_v8 = vrot.slane %v383_v2, %v14868_v9 }
 0x14d   :  { %v1078_v12 = vcombine.high %v1070_v10, %v1070_v10 }
 0x14e   :  { %v399_v11 = vcombine.high %v397_v8, %v397_v8  ;;  %v1924_v31 = vpack.c.bf16 %v397_v8, %v397_v8  ;;  %v13999_v8 = vld [vmem:[#allocation5 + $0xd2c] ss:$1272 sps:$4 sm:$0xff]  }
 0x150   :  { %v1925_v19 = vpack.c.bf16 %v399_v11, %v399_v11 }
 0x151   :  { %6706 = vmatpush1.bf16.xpose.msra.mxu1 %v13903_v13  ;;  %v1922_v13 = vpack.c.bf16 %v390_v54, %v390_v54  ;;  %v13986_v54 = vld [vmem:[#allocation5 + $0xd24] ss:$1272 sps:$4 sm:$0xff]  }
 0x152   :  { %9866 = vmatpush1.bf16.xpose.msra.mxu0 %v13906_v14  ;;  %6743 = vmatprep.subr.bf16.mxu1 %v13912_v16  ;;  %v2080_v14 = vpack.c.bf16 %v1060_v55, %v1060_v55  ;;  %v13952_v16 = vld [vmem:[#allocation5 + $0x320] ss:$1272 sps:$4 sm:$0xff]  }
 0x153   :  { %9903 = vmatprep.subr.bf16.mxu0 %v13915_v17  ;;  %v13957_v17 = vld [vmem:[#allocation5 + $0xa9c] ss:$1272 sps:$4 sm:$0xff]  }
 0x158   :  { %6736 = vmatmul.mubr.bf16.vlgmr.msra.gmra.mrb[0].mxu1 %v1916_v24  ;;  %v13958_v24 = vld [vmem:[#allocation5 + $0xd10] ss:$1272 sps:$4 sm:$0xff]  }
 0x159   :  { %9896 = vmatmul.mubr.bf16.vlgmr.msra.gmra.mrb[0].mxu0 %v2074_v25  ;;  %6744 = vmatpush1.bf16.xpose.msra.mxu1 %v13910_v20  ;;  %v2083_v20 = vpack.c.bf16 %v1078_v12, %v1078_v12  ;;  %v13964_v25 = vld [vmem:[#allocation5 + $0xb4] ss:$1272 sps:$4 sm:$0xff]  }
 0x15a   :  { %9904 = vmatpush1.bf16.xpose.msra.mxu0 %v13913_v21  ;;  %6745 = vmatprep.subr.bf16.mxu1 %v13918_v26  ;;  %v1063_v21 = vcombine.high %v103_v3, %v103_v3  ;;  %v13967_v26 = vld [vmem:[#allocation5 + $0x32c] ss:$1272 sps:$4 sm:$0xff]  }
 0x15b   :  { %9905 = vmatprep.subr.bf16.mxu0 %v13921_v27  ;;  %6775 = vmatprep.mubr.bf16.mxu1 %v1919_v28  ;;  %v407_v27 = vrot.slane %v64_v22, %v14868_v9 }
 0x15c   :  { %9935 = vmatprep.mubr.bf16.mxu0 %v2077_v29  ;;  %v1077_v28 = vrot.slane %v1063_v21, %v14868_v9 }
 0x15d   :  { %v415_v29 = vcombine.high %v407_v27, %v407_v27  ;;  %v1926_v49 = vpack.c.bf16 %v407_v27, %v407_v27  ;;  %v14012_v27 = vld [vmem:[#allocation5 + $0xd34] ss:$1272 sps:$4 sm:$0xff]  }
 0x15e   :  { %v1079_v30 = vcombine.high %v1077_v28, %v1077_v28 }
 0x15f   :  { %v1927_v37 = vpack.c.bf16 %v415_v29, %v415_v29 }
 0x160   :  { %v2085_v38 = vpack.c.bf16 %v1079_v30, %v1079_v30 }
 0x161   :  { %6746 = vmatpush1.bf16.xpose.msra.mxu1 %v13916_v32  ;;  %v2082_v32 = vpack.c.bf16 %v1070_v10, %v1070_v10 }
 0x162   :  { %9906 = vmatpush1.bf16.xpose.msra.mxu0 %v13919_v33  ;;  %6783 = vmatprep.subr.bf16.mxu1 %v13924_v34  ;;  %v13962_v33 = vld [vmem:[#allocation5 + $0xb0] ss:$1272 sps:$4 sm:$0xff]  }
 0x163   :  { %9943 = vmatprep.subr.bf16.mxu0 %v13928_v35  ;;  %v13965_v34 = vld [vmem:[#allocation5 + $0x328] ss:$1272 sps:$4 sm:$0xff]   ;;  %v13970_v35 = vld [vmem:[#allocation5 + $0xaa4] ss:$1272 sps:$4 sm:$0xff]  }
 0x168   :  { %6776 = vmatmul.mubr.bf16.vlgmr.msra.gmra.mrb[0].mxu1 %v1918_v40  ;;  %v104_v40 = vld [vmem:[#allocation2 + $0x198] sm:$0xff] }
 0x169   :  { %9936 = vmatmul.mubr.bf16.vlgmr.msra.gmra.mrb[0].mxu0 %v2076_v41  ;;  %6784 = vmatpush1.bf16.xpose.msra.mxu1 %v13922_v42  ;;  %v13968_v41 = vld [vmem:[#allocation5 + $0xaa0] ss:$1272 sps:$4 sm:$0xff]   ;;  %v1080_v57 = vcombine.high %v104_v40, %v104_v40 }
 0x16a   :  { %9944 = vmatpush1.bf16.xpose.msra.mxu0 %v13926_v43  ;;  %6785 = vmatprep.subr.bf16.mxu1 %v13931_v44  ;;  %v13971_v42 = vld [vmem:[#allocation5 + $0xd18] ss:$1272 sps:$4 sm:$0xff]   ;;  %v13976_v43 = vld [vmem:[#allocation5 + $0xbc] ss:$1272 sps:$4 sm:$0xff]  }
 0x16b   :  { %9945 = vmatprep.subr.bf16.mxu0 %v13934_v45  ;;  %6815 = vmatprep.mubr.bf16.mxu1 %v1921_v46  ;;  %v13980_v44 = vld [vmem:[#allocation5 + $0x334] ss:$1272 sps:$4 sm:$0xff]   ;;  %v414_v45 = vrot.slane %v400_v39, %v14868_v9  ;;  %v1087_v46 = vrot.slane %v104_v40, %v14868_v9 }
 0x16c   :  { %9975 = vmatprep.mubr.bf16.mxu0 %v2079_v47 }
 0x16d   :  { %v416_v47 = vcombine.high %v414_v45, %v414_v45  ;;  %v1095_v48 = vcombine.high %v1087_v46, %v1087_v46  ;;  %v1928_v3 = vpack.c.bf16 %v414_v45, %v414_v45  ;;  %v14025_v45 = vld [vmem:[#allocation5 + $0xd3c] ss:$1272 sps:$4 sm:$0xff]  }
 0x16f   :  { %v1929_v55 = vpack.c.bf16 %v416_v47, %v416_v47  ;;  %v2087_v56 = vpack.c.bf16 %v1095_v48, %v1095_v48 }
 0x171   :  { %6786 = vmatpush1.bf16.xpose.msra.mxu1 %v13929_v50  ;;  %v2084_v50 = vpack.c.bf16 %v1077_v28, %v1077_v28 }
 0x172   :  { %9946 = vmatpush1.bf16.xpose.msra.mxu0 %v13932_v51  ;;  %6823 = vmatprep.subr.bf16.mxu1 %v13938_v52  ;;  %v13974_v51 = vld [vmem:[#allocation5 + $0xb8] ss:$1272 sps:$4 sm:$0xff]  }
 0x173   :  { %9983 = vmatprep.subr.bf16.mxu0 %v13941_v53  ;;  %v13978_v52 = vld [vmem:[#allocation5 + $0x330] ss:$1272 sps:$4 sm:$0xff]   ;;  %v13983_v53 = vld [vmem:[#allocation5 + $0xaac] ss:$1272 sps:$4 sm:$0xff]  }
 0x178   :  { %6816 = vmatmul.mubr.bf16.vlgmr.msra.gmra.mrb[0].mxu1 %v1920_v58  ;;  %v65_v58 = vld [vmem:[#allocation2 + $0x60] sm:$0xff] }
 0x179   :  { %9976 = vmatmul.mubr.bf16.vlgmr.msra.gmra.mrb[0].mxu0 %v2078_v59  ;;  %6824 = vmatpush1.bf16.xpose.msra.mxu1 %v13936_v60  ;;  %v13981_v59 = vld [vmem:[#allocation5 + $0xaa8] ss:$1272 sps:$4 sm:$0xff]   ;;  %v417_v12 = vcombine.high %v65_v58, %v65_v58 }
 0x17a   :  { %9984 = vmatpush1.bf16.xpose.msra.mxu0 %v13939_v61  ;;  %6825 = vmatprep.subr.bf16.mxu1 %v13944_v62  ;;  %v13984_v60 = vld [vmem:[#allocation5 + $0xd20] ss:$1272 sps:$4 sm:$0xff]   ;;  %v13990_v61 = vld [vmem:[#allocation5 + $0xc4] ss:$1272 sps:$4 sm:$0xff]  }
 0x17b   :  { %9985 = vmatprep.subr.bf16.mxu0 %v13947_v63  ;;  %6855 = vmatprep.mubr.bf16.mxu1 %v1923_v0  ;;  %v13993_v62 = vld [vmem:[#allocation5 + $0x33c] ss:$1272 sps:$4 sm:$0xff]   ;;  %v424_v63 = vrot.slane %v65_v58, %v14868_v9  ;;  %v1094_v0 = vrot.slane %v1080_v57, %v14868_v9 }
 0x17c   :  { %10015 = vmatprep.mubr.bf16.mxu0 %v2081_v1 }
 0x17d   :  { %v432_v1 = vcombine.high %v424_v63, %v424_v63  ;;  %v1096_v2 = vcombine.high %v1094_v0, %v1094_v0  ;;  %v1930_v22 = vpack.c.bf16 %v424_v63, %v424_v63  ;;  %v14038_v63 = vld [vmem:[#allocation5 + $0xd44] ss:$1272 sps:$4 sm:$0xff]  }
 0x17f   :  { %v1931_v10 = vpack.c.bf16 %v432_v1, %v432_v1  ;;  %v2089_v11 = vpack.c.bf16 %v1096_v2, %v1096_v2 }
 0x181   :  { %6826 = vmatpush1.bf16.xpose.msra.mxu1 %v13942_v4  ;;  %v2086_v4 = vpack.c.bf16 %v1087_v46, %v1087_v46 }
 0x182   :  { %9986 = vmatpush1.bf16.xpose.msra.mxu0 %v13945_v5  ;;  %6863 = vmatprep.subr.bf16.mxu1 %v13950_v6  ;;  %v13988_v5 = vld [vmem:[#allocation5 + $0xc0] ss:$1272 sps:$4 sm:$0xff]  }
 0x183   :  { %10023 = vmatprep.subr.bf16.mxu0 %v13954_v7  ;;  %v13991_v6 = vld [vmem:[#allocation5 + $0x338] ss:$1272 sps:$4 sm:$0xff]   ;;  %v13996_v7 = vld [vmem:[#allocation5 + $0xab4] ss:$1272 sps:$4 sm:$0xff]  }
 0x188   :  { %6856 = vmatmul.mubr.bf16.vlgmr.msra.gmra.mrb[0].mxu1 %v1922_v13  ;;  %v105_v13 = vld [vmem:[#allocation2 + $0x1a0] sm:$0xff] }
 0x189   :  { %10016 = vmatmul.mubr.bf16.vlgmr.msra.gmra.mrb[0].mxu0 %v2080_v14  ;;  %6864 = vmatpush1.bf16.xpose.msra.mxu1 %v13948_v15  ;;  %v13994_v14 = vld [vmem:[#allocation5 + $0xab0] ss:$1272 sps:$4 sm:$0xff]   ;;  %v1097_v30 = vcombine.high %v105_v13, %v105_v13 }
 0x18a   :  { %10024 = vmatpush1.bf16.xpose.msra.mxu0 %v13952_v16  ;;  %6865 = vmatprep.subr.bf16.mxu1 %v13957_v17  ;;  %v13997_v15 = vld [vmem:[#allocation5 + $0xd28] ss:$1272 sps:$4 sm:$0xff]   ;;  %v14002_v16 = vld [vmem:[#allocation5 + $0xcc] ss:$1272 sps:$4 sm:$0xff]  }
 0x18b   :  { %10025 = vmatprep.subr.bf16.mxu0 %v13960_v18  ;;  %6895 = vmatprep.mubr.bf16.mxu1 %v1925_v19  ;;  %v14006_v17 = vld [vmem:[#allocation5 + $0x344] ss:$1272 sps:$4 sm:$0xff]   ;;  %v431_v18 = vrot.slane %v417_v12, %v14868_v9  ;;  %v1104_v19 = vrot.slane %v105_v13, %v14868_v9 }
 0x18c   :  { %10055 = vmatprep.mubr.bf16.mxu0 %v2083_v20 }
 0x18d   :  { %v433_v20 = vcombine.high %v431_v18, %v431_v18  ;;  %v1112_v21 = vcombine.high %v1104_v19, %v1104_v19  ;;  %v1932_v40 = vpack.c.bf16 %v431_v18, %v431_v18  ;;  %v14051_v18 = vld [vmem:[#allocation5 + $0xd4c] ss:$1272 sps:$4 sm:$0xff]  }
 0x18f   :  { %v1933_v28 = vpack.c.bf16 %v433_v20, %v433_v20  ;;  %v2091_v29 = vpack.c.bf16 %v1112_v21, %v1112_v21 }
 0x191   :  { %6866 = vmatpush1.bf16.xpose.msra.mxu1 %v13955_v23  ;;  %v2088_v23 = vpack.c.bf16 %v1094_v0, %v1094_v0 }
 0x192   :  { %10026 = vmatpush1.bf16.xpose.msra.mxu0 %v13958_v24  ;;  %6903 = vmatprep.subr.bf16.mxu1 %v13964_v25  ;;  %v14000_v24 = vld [vmem:[#allocation5 + $0xc8] ss:$1272 sps:$4 sm:$0xff]  }
 0x193   :  { %10063 = vmatprep.subr.bf16.mxu0 %v13967_v26  ;;  %v14004_v25 = vld [vmem:[#allocation5 + $0x340] ss:$1272 sps:$4 sm:$0xff]   ;;  %v14009_v26 = vld [vmem:[#allocation5 + $0xabc] ss:$1272 sps:$4 sm:$0xff]  }
 0x198   :  { %6896 = vmatmul.mubr.bf16.vlgmr.msra.gmra.mrb[0].mxu1 %v1924_v31  ;;  %v66_v31 = vld [vmem:[#allocation2 + $0x68] sm:$0xff] }
 0x199   :  { %10056 = vmatmul.mubr.bf16.vlgmr.msra.gmra.mrb[0].mxu0 %v2082_v32  ;;  %6904 = vmatpush1.bf16.xpose.msra.mxu1 %v13962_v33  ;;  %v14007_v32 = vld [vmem:[#allocation5 + $0xab8] ss:$1272 sps:$4 sm:$0xff]   ;;  %v434_v48 = vcombine.high %v66_v31, %v66_v31 }
 0x19a   :  { %10064 = vmatpush1.bf16.xpose.msra.mxu0 %v13965_v34  ;;  %6905 = vmatprep.subr.bf16.mxu1 %v13970_v35  ;;  %v14010_v33 = vld [vmem:[#allocation5 + $0xd30] ss:$1272 sps:$4 sm:$0xff]   ;;  %v14016_v34 = vld [vmem:[#allocation5 + $0xd4] ss:$1272 sps:$4 sm:$0xff]  }
 0x19b   :  { %10065 = vmatprep.subr.bf16.mxu0 %v13973_v36  ;;  %6935 = vmatprep.mubr.bf16.mxu1 %v1927_v37  ;;  %v14019_v35 = vld [vmem:[#allocation5 + $0x34c] ss:$1272 sps:$4 sm:$0xff]   ;;  %v441_v36 = vrot.slane %v66_v31, %v14868_v9  ;;  %v1111_v37 = vrot.slane %v1097_v30, %v14868_v9 }
 0x19c   :  { %10095 = vmatprep.mubr.bf16.mxu0 %v2085_v38 }
 0x19d   :  { %v449_v38 = vcombine.high %v441_v36, %v441_v36  ;;  %v1113_v39 = vcombine.high %v1111_v37, %v1111_v37  ;;  %v1934_v58 = vpack.c.bf16 %v441_v36, %v441_v36  ;;  %v14064_v36 = vld [vmem:[#allocation5 + $0xd54] ss:$1272 sps:$4 sm:$0xff]  }
 0x19f   :  { %v1935_v46 = vpack.c.bf16 %v449_v38, %v449_v38  ;;  %v2093_v47 = vpack.c.bf16 %v1113_v39, %v1113_v39 }
 0x1a1   :  { %6906 = vmatpush1.bf16.xpose.msra.mxu1 %v13968_v41  ;;  %v2090_v41 = vpack.c.bf16 %v1104_v19, %v1104_v19 }
 0x1a2   :  { %10066 = vmatpush1.bf16.xpose.msra.mxu0 %v13971_v42  ;;  %6943 = vmatprep.subr.bf16.mxu1 %v13976_v43  ;;  %v14014_v42 = vld [vmem:[#allocation5 + $0xd0] ss:$1272 sps:$4 sm:$0xff]  }
 0x1a3   :  { %10103 = vmatprep.subr.bf16.mxu0 %v13980_v44  ;;  %v14017_v43 = vld [vmem:[#allocation5 + $0x348] ss:$1272 sps:$4 sm:$0xff]   ;;  %v14022_v44 = vld [vmem:[#allocation5 + $0xac4] ss:$1272 sps:$4 sm:$0xff]  }
 0x1a8   :  { %6936 = vmatmul.mubr.bf16.vlgmr.msra.gmra.mrb[0].mxu1 %v1926_v49  ;;  %v106_v49 = vld [vmem:[#allocation2 + $0x1a8] sm:$0xff] }
 0x1a9   :  { %10096 = vmatmul.mubr.bf16.vlgmr.msra.gmra.mrb[0].mxu0 %v2084_v50  ;;  %6944 = vmatpush1.bf16.xpose.msra.mxu1 %v13974_v51  ;;  %v14020_v50 = vld [vmem:[#allocation5 + $0xac0] ss:$1272 sps:$4 sm:$0xff]   ;;  %v1114_v2 = vcombine.high %v106_v49, %v106_v49 }
 0x1aa   :  { %10104 = vmatpush1.bf16.xpose.msra.mxu0 %v13978_v52  ;;  %6945 = vmatprep.subr.bf16.mxu1 %v13983_v53  ;;  %v14023_v51 = vld [vmem:[#allocation5 + $0xd38] ss:$1272 sps:$4 sm:$0xff]   ;;  %v14028_v52 = vld [vmem:[#allocation5 + $0xdc] ss:$1272 sps:$4 sm:$0xff]  }
 0x1ab   :  { %10105 = vmatprep.subr.bf16.mxu0 %v13986_v54  ;;  %6975 = vmatprep.mubr.bf16.mxu1 %v1929_v55  ;;  %v14032_v53 = vld [vmem:[#allocation5 + $0x354] ss:$1272 sps:$4 sm:$0xff]   ;;  %v448_v54 = vrot.slane %v434_v48, %v14868_v9  ;;  %v1121_v55 = vrot.slane %v106_v49, %v14868_v9 }
 0x1ac   :  { %10135 = vmatprep.mubr.bf16.mxu0 %v2087_v56 }
 0x1ad   :  { %v450_v56 = vcombine.high %v448_v54, %v448_v54  ;;  %v1129_v57 = vcombine.high %v1121_v55, %v1121_v55  ;;  %v1936_v13 = vpack.c.bf16 %v448_v54, %v448_v54  ;;  %v14077_v54 = vld [vmem:[#allocation5 + $0xd5c] ss:$1272 sps:$4 sm:$0xff]  }
 0x1af   :  { %v1937_v0 = vpack.c.bf16 %v450_v56, %v450_v56  ;;  %v2095_v1 = vpack.c.bf16 %v1129_v57, %v1129_v57 }
 0x1b1   :  { %6946 = vmatpush1.bf16.xpose.msra.mxu1 %v13981_v59  ;;  %v2092_v59 = vpack.c.bf16 %v1111_v37, %v1111_v37 }
 0x1b2   :  { %10106 = vmatpush1.bf16.xpose.msra.mxu0 %v13984_v60  ;;  %6983 = vmatprep.subr.bf16.mxu1 %v13990_v61  ;;  %v14026_v60 = vld [vmem:[#allocation5 + $0xd8] ss:$1272 sps:$4 sm:$0xff]  }
 0x1b3   :  { %10143 = vmatprep.subr.bf16.mxu0 %v13993_v62  ;;  %v14030_v61 = vld [vmem:[#allocation5 + $0x350] ss:$1272 sps:$4 sm:$0xff]   ;;  %v14035_v62 = vld [vmem:[#allocation5 + $0xacc] ss:$1272 sps:$4 sm:$0xff]  }
 0x1b8   :  { %6976 = vmatmul.mubr.bf16.vlgmr.msra.gmra.mrb[0].mxu1 %v1928_v3  ;;  %v67_v3 = vld [vmem:[#allocation2 + $0x70] sm:$0xff] }
 0x1b9   :  { %10136 = vmatmul.mubr.bf16.vlgmr.msra.gmra.mrb[0].mxu0 %v2086_v4  ;;  %6984 = vmatpush1.bf16.xpose.msra.mxu1 %v13988_v5  ;;  %v14033_v4 = vld [vmem:[#allocation5 + $0xac8] ss:$1272 sps:$4 sm:$0xff]   ;;  %v451_v21 = vcombine.high %v67_v3, %v67_v3 }
 0x1ba   :  { %10144 = vmatpush1.bf16.xpose.msra.mxu0 %v13991_v6  ;;  %6985 = vmatprep.subr.bf16.mxu1 %v13996_v7  ;;  %v14036_v5 = vld [vmem:[#allocation5 + $0xd40] ss:$1272 sps:$4 sm:$0xff]   ;;  %v14042_v6 = vld [vmem:[#allocation5 + $0xe4] ss:$1272 sps:$4 sm:$0xff]  }
 0x1bb   :  { %10145 = vmatprep.subr.bf16.mxu0 %v13999_v8  ;;  %7015 = vmatprep.mubr.bf16.mxu1 %v1931_v10  ;;  %v14045_v7 = vld [vmem:[#allocation5 + $0x35c] ss:$1272 sps:$4 sm:$0xff]   ;;  %v458_v8 = vrot.slane %v67_v3, %v14868_v9  ;;  %v1128_v10 = vrot.slane %v1114_v2, %v14868_v9 }
 0x1bc   :  { %10175 = vmatprep.mubr.bf16.mxu0 %v2089_v11 }
 0x1bd   :  { %v466_v11 = vcombine.high %v458_v8, %v458_v8  ;;  %v1130_v12 = vcombine.high %v1128_v10, %v1128_v10  ;;  %v1938_v31 = vpack.c.bf16 %v458_v8, %v458_v8  ;;  %v14090_v8 = vld [vmem:[#allocation5 + $0xd64] ss:$1272 sps:$4 sm:$0xff]  }
 0x1bf   :  { %v1939_v19 = vpack.c.bf16 %v466_v11, %v466_v11  ;;  %v2097_v20 = vpack.c.bf16 %v1130_v12, %v1130_v12 }
 0x1c1   :  { %6986 = vmatpush1.bf16.xpose.msra.mxu1 %v13994_v14  ;;  %v2094_v14 = vpack.c.bf16 %v1121_v55, %v1121_v55 }
 0x1c2   :  { %10146 = vmatpush1.bf16.xpose.msra.mxu0 %v13997_v15  ;;  %7023 = vmatprep.subr.bf16.mxu1 %v14002_v16  ;;  %v14040_v15 = vld [vmem:[#allocation5 + $0xe0] ss:$1272 sps:$4 sm:$0xff]  }
 0x1c3   :  { %10183 = vmatprep.subr.bf16.mxu0 %v14006_v17  ;;  %v14043_v16 = vld [vmem:[#allocation5 + $0x358] ss:$1272 sps:$4 sm:$0xff]   ;;  %v14048_v17 = vld [vmem:[#allocation5 + $0xad4] ss:$1272 sps:$4 sm:$0xff]  }
 0x1c8   :  { %7016 = vmatmul.mubr.bf16.vlgmr.msra.gmra.mrb[0].mxu1 %v1930_v22  ;;  %v107_v22 = vld [vmem:[#allocation2 + $0x1b0] sm:$0xff] }
 0x1c9   :  { %10176 = vmatmul.mubr.bf16.vlgmr.msra.gmra.mrb[0].mxu0 %v2088_v23  ;;  %7024 = vmatpush1.bf16.xpose.msra.mxu1 %v14000_v24  ;;  %v14046_v23 = vld [vmem:[#allocation5 + $0xad0] ss:$1272 sps:$4 sm:$0xff]   ;;  %v1131_v39 = vcombine.high %v107_v22, %v107_v22 }
 0x1ca   :  { %10184 = vmatpush1.bf16.xpose.msra.mxu0 %v14004_v25  ;;  %7025 = vmatprep.subr.bf16.mxu1 %v14009_v26  ;;  %v14049_v24 = vld [vmem:[#allocation5 + $0xd48] ss:$1272 sps:$4 sm:$0xff]   ;;  %v14054_v25 = vld [vmem:[#allocation5 + $0xec] ss:$1272 sps:$4 sm:$0xff]  }
 0x1cb   :  { %10185 = vmatprep.subr.bf16.mxu0 %v14012_v27  ;;  %7055 = vmatprep.mubr.bf16.mxu1 %v1933_v28  ;;  %v14058_v26 = vld [vmem:[#allocation5 + $0x364] ss:$1272 sps:$4 sm:$0xff]   ;;  %v465_v27 = vrot.slane %v451_v21, %v14868_v9  ;;  %v1138_v28 = vrot.slane %v107_v22, %v14868_v9 }
 0x1cc   :  { %10215 = vmatprep.mubr.bf16.mxu0 %v2091_v29 }
 0x1cd   :  { %v467_v29 = vcombine.high %v465_v27, %v465_v27  ;;  %v1146_v30 = vcombine.high %v1138_v28, %v1138_v28  ;;  %v1940_v49 = vpack.c.bf16 %v465_v27, %v465_v27  ;;  %v14103_v27 = vld [vmem:[#allocation5 + $0xd6c] ss:$1272 sps:$4 sm:$0xff]  }
 0x1cf   :  { %v1941_v37 = vpack.c.bf16 %v467_v29, %v467_v29  ;;  %v2099_v38 = vpack.c.bf16 %v1146_v30, %v1146_v30 }
 0x1d1   :  { %7026 = vmatpush1.bf16.xpose.msra.mxu1 %v14007_v32  ;;  %v2096_v32 = vpack.c.bf16 %v1128_v10, %v1128_v10 }
 0x1d2   :  { %10186 = vmatpush1.bf16.xpose.msra.mxu0 %v14010_v33  ;;  %7063 = vmatprep.subr.bf16.mxu1 %v14016_v34  ;;  %v14052_v33 = vld [vmem:[#allocation5 + $0xe8] ss:$1272 sps:$4 sm:$0xff]  }
 0x1d3   :  { %10223 = vmatprep.subr.bf16.mxu0 %v14019_v35  ;;  %v14056_v34 = vld [vmem:[#allocation5 + $0x360] ss:$1272 sps:$4 sm:$0xff]   ;;  %v14061_v35 = vld [vmem:[#allocation5 + $0xadc] ss:$1272 sps:$4 sm:$0xff]  }
 0x1d8   :  { %7056 = vmatmul.mubr.bf16.vlgmr.msra.gmra.mrb[0].mxu1 %v1932_v40  ;;  %v68_v40 = vld [vmem:[#allocation2 + $0x78] sm:$0xff] }
 0x1d9   :  { %10216 = vmatmul.mubr.bf16.vlgmr.msra.gmra.mrb[0].mxu0 %v2090_v41  ;;  %7064 = vmatpush1.bf16.xpose.msra.mxu1 %v14014_v42  ;;  %v14059_v41 = vld [vmem:[#allocation5 + $0xad8] ss:$1272 sps:$4 sm:$0xff]   ;;  %v468_v57 = vcombine.high %v68_v40, %v68_v40 }
 0x1da   :  { %10224 = vmatpush1.bf16.xpose.msra.mxu0 %v14017_v43  ;;  %7065 = vmatprep.subr.bf16.mxu1 %v14022_v44  ;;  %v14062_v42 = vld [vmem:[#allocation5 + $0xd50] ss:$1272 sps:$4 sm:$0xff]   ;;  %v14068_v43 = vld [vmem:[#allocation5 + $0xf4] ss:$1272 sps:$4 sm:$0xff]  }
 0x1db   :  { %10225 = vmatprep.subr.bf16.mxu0 %v14025_v45  ;;  %7095 = vmatprep.mubr.bf16.mxu1 %v1935_v46  ;;  %v14071_v44 = vld [vmem:[#allocation5 + $0x36c] ss:$1272 sps:$4 sm:$0xff]   ;;  %v475_v45 = vrot.slane %v68_v40, %v14868_v9  ;;  %v1145_v46 = vrot.slane %v1131_v39, %v14868_v9 }
 0x1dc   :  { %10255 = vmatprep.mubr.bf16.mxu0 %v2093_v47 }
 0x1dd   :  { %v483_v47 = vcombine.high %v475_v45, %v475_v45  ;;  %v1147_v48 = vcombine.high %v1145_v46, %v1145_v46  ;;  %v1942_v3 = vpack.c.bf16 %v475_v45, %v475_v45  ;;  %v14116_v45 = vld [vmem:[#allocation5 + $0xd74] ss:$1272 sps:$4 sm:$0xff]  }
 0x1df   :  { %v1943_v55 = vpack.c.bf16 %v483_v47, %v483_v47  ;;  %v2101_v56 = vpack.c.bf16 %v1147_v48, %v1147_v48 }
 0x1e1   :  { %7066 = vmatpush1.bf16.xpose.msra.mxu1 %v14020_v50  ;;  %v2098_v50 = vpack.c.bf16 %v1138_v28, %v1138_v28 }
 0x1e2   :  { %10226 = vmatpush1.bf16.xpose.msra.mxu0 %v14023_v51  ;;  %7103 = vmatprep.subr.bf16.mxu1 %v14028_v52  ;;  %v14066_v51 = vld [vmem:[#allocation5 + $0xf0] ss:$1272 sps:$4 sm:$0xff]  }
 0x1e3   :  { %10263 = vmatprep.subr.bf16.mxu0 %v14032_v53  ;;  %v14069_v52 = vld [vmem:[#allocation5 + $0x368] ss:$1272 sps:$4 sm:$0xff]   ;;  %v14074_v53 = vld [vmem:[#allocation5 + $0xae4] ss:$1272 sps:$4 sm:$0xff]  }
 0x1e8   :  { %7096 = vmatmul.mubr.bf16.vlgmr.msra.gmra.mrb[0].mxu1 %v1934_v58  ;;  %v108_v58 = vld [vmem:[#allocation2 + $0x1b8] sm:$0xff] }
 0x1e9   :  { %10256 = vmatmul.mubr.bf16.vlgmr.msra.gmra.mrb[0].mxu0 %v2092_v59  ;;  %7104 = vmatpush1.bf16.xpose.msra.mxu1 %v14026_v60  ;;  %v14072_v59 = vld [vmem:[#allocation5 + $0xae0] ss:$1272 sps:$4 sm:$0xff]   ;;  %v1148_v12 = vcombine.high %v108_v58, %v108_v58 }
 0x1ea   :  { %10264 = vmatpush1.bf16.xpose.msra.mxu0 %v14030_v61  ;;  %7105 = vmatprep.subr.bf16.mxu1 %v14035_v62  ;;  %v14075_v60 = vld [vmem:[#allocation5 + $0xd58] ss:$1272 sps:$4 sm:$0xff]   ;;  %v14080_v61 = vld [vmem:[#allocation5 + $0xfc] ss:$1272 sps:$4 sm:$0xff]  }
 0x1eb   :  { %10265 = vmatprep.subr.bf16.mxu0 %v14038_v63  ;;  %7135 = vmatprep.mubr.bf16.mxu1 %v1937_v0  ;;  %v14084_v62 = vld [vmem:[#allocation5 + $0x374] ss:$1272 sps:$4 sm:$0xff]   ;;  %v482_v63 = vrot.slane %v468_v57, %v14868_v9  ;;  %v1155_v0 = vrot.slane %v108_v58, %v14868_v9 }
 0x1ec   :  { %10295 = vmatprep.mubr.bf16.mxu0 %v2095_v1 }
 0x1ed   :  { %v484_v1 = vcombine.high %v482_v63, %v482_v63  ;;  %v1163_v2 = vcombine.high %v1155_v0, %v1155_v0  ;;  %v1944_v22 = vpack.c.bf16 %v482_v63, %v482_v63  ;;  %v14129_v63 = vld [vmem:[#allocation5 + $0xd7c] ss:$1272 sps:$4 sm:$0xff]  }
 0x1ef   :  { %v1945_v10 = vpack.c.bf16 %v484_v1, %v484_v1  ;;  %v2103_v11 = vpack.c.bf16 %v1163_v2, %v1163_v2 }
 0x1f1   :  { %7106 = vmatpush1.bf16.xpose.msra.mxu1 %v14033_v4  ;;  %v2100_v4 = vpack.c.bf16 %v1145_v46, %v1145_v46 }
 0x1f2   :  { %10266 = vmatpush1.bf16.xpose.msra.mxu0 %v14036_v5  ;;  %7143 = vmatprep.subr.bf16.mxu1 %v14042_v6  ;;  %v14078_v5 = vld [vmem:[#allocation5 + $0xf8] ss:$1272 sps:$4 sm:$0xff]  }
 0x1f3   :  { %10303 = vmatprep.subr.bf16.mxu0 %v14045_v7  ;;  %v14082_v6 = vld [vmem:[#allocation5 + $0x370] ss:$1272 sps:$4 sm:$0xff]   ;;  %v14087_v7 = vld [vmem:[#allocation5 + $0xaec] ss:$1272 sps:$4 sm:$0xff]  }
 0x1f8   :  { %7136 = vmatmul.mubr.bf16.vlgmr.msra.gmra.mrb[0].mxu1 %v1936_v13  ;;  %v69_v13 = vld [vmem:[#allocation2 + $0x80] sm:$0xff] }
 0x1f9   :  { %10296 = vmatmul.mubr.bf16.vlgmr.msra.gmra.mrb[0].mxu0 %v2094_v14  ;;  %7144 = vmatpush1.bf16.xpose.msra.mxu1 %v14040_v15  ;;  %v14085_v14 = vld [vmem:[#allocation5 + $0xae8] ss:$1272 sps:$4 sm:$0xff]   ;;  %v485_v30 = vcombine.high %v69_v13, %v69_v13 }
 0x1fa   :  { %10304 = vmatpush1.bf16.xpose.msra.mxu0 %v14043_v16  ;;  %7145 = vmatprep.subr.bf16.mxu1 %v14048_v17  ;;  %v14088_v15 = vld [vmem:[#allocation5 + $0xd60] ss:$1272 sps:$4 sm:$0xff]   ;;  %v14094_v16 = vld [vmem:[#allocation5 + $0x104] ss:$1272 sps:$4 sm:$0xff]  }
 0x1fb   :  { %10305 = vmatprep.subr.bf16.mxu0 %v14051_v18  ;;  %7175 = vmatprep.mubr.bf16.mxu1 %v1939_v19  ;;  %v14097_v17 = vld [vmem:[#allocation5 + $0x37c] ss:$1272 sps:$4 sm:$0xff]   ;;  %v492_v18 = vrot.slane %v69_v13, %v14868_v9  ;;  %v1162_v19 = vrot.slane %v1148_v12, %v14868_v9 }
 0x1fc   :  { %10335 = vmatprep.mubr.bf16.mxu0 %v2097_v20 }
 0x1fd   :  { %v500_v20 = vcombine.high %v492_v18, %v492_v18  ;;  %v1164_v21 = vcombine.high %v1162_v19, %v1162_v19  ;;  %v1946_v40 = vpack.c.bf16 %v492_v18, %v492_v18  ;;  %v14142_v18 = vld [vmem:[#allocation5 + $0xd84] ss:$1272 sps:$4 sm:$0xff]  }
 0x1ff   :  { %v1947_v28 = vpack.c.bf16 %v500_v20, %v500_v20  ;;  %v2105_v29 = vpack.c.bf16 %v1164_v21, %v1164_v21 }
 0x201   :  { %7146 = vmatpush1.bf16.xpose.msra.mxu1 %v14046_v23  ;;  %v2102_v23 = vpack.c.bf16 %v1155_v0, %v1155_v0 }
 0x202   :  { %10306 = vmatpush1.bf16.xpose.msra.mxu0 %v14049_v24  ;;  %7183 = vmatprep.subr.bf16.mxu1 %v14054_v25  ;;  %v14092_v24 = vld [vmem:[#allocation5 + $0x100] ss:$1272 sps:$4 sm:$0xff]  }
 0x203   :  { %10343 = vmatprep.subr.bf16.mxu0 %v14058_v26  ;;  %v14095_v25 = vld [vmem:[#allocation5 + $0x378] ss:$1272 sps:$4 sm:$0xff]   ;;  %v14100_v26 = vld [vmem:[#allocation5 + $0xaf4] ss:$1272 sps:$4 sm:$0xff]  }
 0x208   :  { %7176 = vmatmul.mubr.bf16.vlgmr.msra.gmra.mrb[0].mxu1 %v1938_v31  ;;  %v109_v31 = vld [vmem:[#allocation2 + $0x1c0] sm:$0xff] }
 0x209   :  { %10336 = vmatmul.mubr.bf16.vlgmr.msra.gmra.mrb[0].mxu0 %v2096_v32  ;;  %7184 = vmatpush1.bf16.xpose.msra.mxu1 %v14052_v33  ;;  %v14098_v32 = vld [vmem:[#allocation5 + $0xaf0] ss:$1272 sps:$4 sm:$0xff]   ;;  %v1165_v48 = vcombine.high %v109_v31, %v109_v31 }
 0x20a   :  { %10344 = vmatpush1.bf16.xpose.msra.mxu0 %v14056_v34  ;;  %7185 = vmatprep.subr.bf16.mxu1 %v14061_v35  ;;  %v14101_v33 = vld [vmem:[#allocation5 + $0xd68] ss:$1272 sps:$4 sm:$0xff]   ;;  %v14106_v34 = vld [vmem:[#allocation5 + $0x10c] ss:$1272 sps:$4 sm:$0xff]  }
 0x20b   :  { %10345 = vmatprep.subr.bf16.mxu0 %v14064_v36  ;;  %7215 = vmatprep.mubr.bf16.mxu1 %v1941_v37  ;;  %v14110_v35 = vld [vmem:[#allocation5 + $0x384] ss:$1272 sps:$4 sm:$0xff]   ;;  %v499_v36 = vrot.slane %v485_v30, %v14868_v9  ;;  %v1172_v37 = vrot.slane %v109_v31, %v14868_v9 }
 0x20c   :  { %10375 = vmatprep.mubr.bf16.mxu0 %v2099_v38 }
 0x20d   :  { %v501_v38 = vcombine.high %v499_v36, %v499_v36  ;;  %v1180_v39 = vcombine.high %v1172_v37, %v1172_v37  ;;  %v1948_v58 = vpack.c.bf16 %v499_v36, %v499_v36  ;;  %v14155_v36 = vld [vmem:[#allocation5 + $0xd8c] ss:$1272 sps:$4 sm:$0xff]  }
 0x20f   :  { %v1949_v46 = vpack.c.bf16 %v501_v38, %v501_v38  ;;  %v2107_v47 = vpack.c.bf16 %v1180_v39, %v1180_v39 }
 0x211   :  { %7186 = vmatpush1.bf16.xpose.msra.mxu1 %v14059_v41  ;;  %v2104_v41 = vpack.c.bf16 %v1162_v19, %v1162_v19 }
 0x212   :  { %10346 = vmatpush1.bf16.xpose.msra.mxu0 %v14062_v42  ;;  %7223 = vmatprep.subr.bf16.mxu1 %v14068_v43  ;;  %v14104_v42 = vld [vmem:[#allocation5 + $0x108] ss:$1272 sps:$4 sm:$0xff]  }
 0x213   :  { %10383 = vmatprep.subr.bf16.mxu0 %v14071_v44  ;;  %v14108_v43 = vld [vmem:[#allocation5 + $0x380] ss:$1272 sps:$4 sm:$0xff]   ;;  %v14113_v44 = vld [vmem:[#allocation5 + $0xafc] ss:$1272 sps:$4 sm:$0xff]  }
 0x218   :  { %7216 = vmatmul.mubr.bf16.vlgmr.msra.gmra.mrb[0].mxu1 %v1940_v49  ;;  %v70_v49 = vld [vmem:[#allocation2 + $0x88] sm:$0xff] }
 0x219   :  { %10376 = vmatmul.mubr.bf16.vlgmr.msra.gmra.mrb[0].mxu0 %v2098_v50  ;;  %7224 = vmatpush1.bf16.xpose.msra.mxu1 %v14066_v51  ;;  %v14111_v50 = vld [vmem:[#allocation5 + $0xaf8] ss:$1272 sps:$4 sm:$0xff]   ;;  %v502_v2 = vcombine.high %v70_v49, %v70_v49 }
 0x21a   :  { %10384 = vmatpush1.bf16.xpose.msra.mxu0 %v14069_v52  ;;  %7225 = vmatprep.subr.bf16.mxu1 %v14074_v53  ;;  %v14114_v51 = vld [vmem:[#allocation5 + $0xd70] ss:$1272 sps:$4 sm:$0xff]   ;;  %v14120_v52 = vld [vmem:[#allocation5 + $0x114] ss:$1272 sps:$4 sm:$0xff]  }
 0x21b   :  { %10385 = vmatprep.subr.bf16.mxu0 %v14077_v54  ;;  %7255 = vmatprep.mubr.bf16.mxu1 %v1943_v55  ;;  %v14123_v53 = vld [vmem:[#allocation5 + $0x38c] ss:$1272 sps:$4 sm:$0xff]   ;;  %v509_v54 = vrot.slane %v70_v49, %v14868_v9  ;;  %v1179_v55 = vrot.slane %v1165_v48, %v14868_v9 }
 0x21c   :  { %10415 = vmatprep.mubr.bf16.mxu0 %v2101_v56 }
 0x21d   :  { %v517_v56 = vcombine.high %v509_v54, %v509_v54  ;;  %v1181_v57 = vcombine.high %v1179_v55, %v1179_v55  ;;  %v1950_v13 = vpack.c.bf16 %v509_v54, %v509_v54  ;;  %v14168_v54 = vld [vmem:[#allocation5 + $0xd94] ss:$1272 sps:$4 sm:$0xff]  }
 0x21f   :  { %v1951_v0 = vpack.c.bf16 %v517_v56, %v517_v56  ;;  %v2109_v1 = vpack.c.bf16 %v1181_v57, %v1181_v57 }
 0x221   :  { %7226 = vmatpush1.bf16.xpose.msra.mxu1 %v14072_v59  ;;  %v2106_v59 = vpack.c.bf16 %v1172_v37, %v1172_v37 }
 0x222   :  { %10386 = vmatpush1.bf16.xpose.msra.mxu0 %v14075_v60  ;;  %7263 = vmatprep.subr.bf16.mxu1 %v14080_v61  ;;  %v14118_v60 = vld [vmem:[#allocation5 + $0x110] ss:$1272 sps:$4 sm:$0xff]  }
 0x223   :  { %10423 = vmatprep.subr.bf16.mxu0 %v14084_v62  ;;  %v14121_v61 = vld [vmem:[#allocation5 + $0x388] ss:$1272 sps:$4 sm:$0xff]   ;;  %v14126_v62 = vld [vmem:[#allocation5 + $0xb04] ss:$1272 sps:$4 sm:$0xff]  }
 0x228   :  { %7256 = vmatmul.mubr.bf16.vlgmr.msra.gmra.mrb[0].mxu1 %v1942_v3  ;;  %v110_v3 = vld [vmem:[#allocation2 + $0x1c8] sm:$0xff] }
 0x229   :  { %10416 = vmatmul.mubr.bf16.vlgmr.msra.gmra.mrb[0].mxu0 %v2100_v4  ;;  %7264 = vmatpush1.bf16.xpose.msra.mxu1 %v14078_v5  ;;  %v14124_v4 = vld [vmem:[#allocation5 + $0xb00] ss:$1272 sps:$4 sm:$0xff]   ;;  %v1182_v21 = vcombine.high %v110_v3, %v110_v3 }
 0x22a   :  { %10424 = vmatpush1.bf16.xpose.msra.mxu0 %v14082_v6  ;;  %7265 = vmatprep.subr.bf16.mxu1 %v14087_v7  ;;  %v14127_v5 = vld [vmem:[#allocation5 + $0xd78] ss:$1272 sps:$4 sm:$0xff]   ;;  %v14132_v6 = vld [vmem:[#allocation5 + $0x11c] ss:$1272 sps:$4 sm:$0xff]  }
 0x22b   :  { %10425 = vmatprep.subr.bf16.mxu0 %v14090_v8  ;;  %7295 = vmatprep.mubr.bf16.mxu1 %v1945_v10  ;;  %v14136_v7 = vld [vmem:[#allocation5 + $0x394] ss:$1272 sps:$4 sm:$0xff]   ;;  %v516_v8 = vrot.slane %v502_v2, %v14868_v9  ;;  %v1189_v10 = vrot.slane %v110_v3, %v14868_v9 }
 0x22c   :  { %10455 = vmatprep.mubr.bf16.mxu0 %v2103_v11 }
 0x22d   :  { %v518_v11 = vcombine.high %v516_v8, %v516_v8  ;;  %v1197_v12 = vcombine.high %v1189_v10, %v1189_v10  ;;  %v1952_v31 = vpack.c.bf16 %v516_v8, %v516_v8  ;;  %v14181_v8 = vld [vmem:[#allocation5 + $0xd9c] ss:$1272 sps:$4 sm:$0xff]  }
 0x22f   :  { %v1953_v19 = vpack.c.bf16 %v518_v11, %v518_v11  ;;  %v2111_v20 = vpack.c.bf16 %v1197_v12, %v1197_v12 }
 0x231   :  { %7266 = vmatpush1.bf16.xpose.msra.mxu1 %v14085_v14  ;;  %v2108_v14 = vpack.c.bf16 %v1179_v55, %v1179_v55 }
 0x232   :  { %10426 = vmatpush1.bf16.xpose.msra.mxu0 %v14088_v15  ;;  %7303 = vmatprep.subr.bf16.mxu1 %v14094_v16  ;;  %v14130_v15 = vld [vmem:[#allocation5 + $0x118] ss:$1272 sps:$4 sm:$0xff]  }
 0x233   :  { %10463 = vmatprep.subr.bf16.mxu0 %v14097_v17  ;;  %v14134_v16 = vld [vmem:[#allocation5 + $0x390] ss:$1272 sps:$4 sm:$0xff]   ;;  %v14139_v17 = vld [vmem:[#allocation5 + $0xb0c] ss:$1272 sps:$4 sm:$0xff]  }
 0x238   :  { %7296 = vmatmul.mubr.bf16.vlgmr.msra.gmra.mrb[0].mxu1 %v1944_v22  ;;  %v71_v22 = vld [vmem:[#allocation2 + $0x90] sm:$0xff] }
 0x239   :  { %10456 = vmatmul.mubr.bf16.vlgmr.msra.gmra.mrb[0].mxu0 %v2102_v23  ;;  %7304 = vmatpush1.bf16.xpose.msra.mxu1 %v14092_v24  ;;  %v14137_v23 = vld [vmem:[#allocation5 + $0xb08] ss:$1272 sps:$4 sm:$0xff]   ;;  %v519_v39 = vcombine.high %v71_v22, %v71_v22 }
 0x23a   :  { %10464 = vmatpush1.bf16.xpose.msra.mxu0 %v14095_v25  ;;  %7305 = vmatprep.subr.bf16.mxu1 %v14100_v26  ;;  %v14140_v24 = vld [vmem:[#allocation5 + $0xd80] ss:$1272 sps:$4 sm:$0xff]   ;;  %v14146_v25 = vld [vmem:[#allocation5 + $0x124] ss:$1272 sps:$4 sm:$0xff]  }
 0x23b   :  { %10465 = vmatprep.subr.bf16.mxu0 %v14103_v27  ;;  %7335 = vmatprep.mubr.bf16.mxu1 %v1947_v28  ;;  %v14149_v26 = vld [vmem:[#allocation5 + $0x39c] ss:$1272 sps:$4 sm:$0xff]   ;;  %v526_v27 = vrot.slane %v71_v22, %v14868_v9  ;;  %v1196_v28 = vrot.slane %v1182_v21, %v14868_v9 }
 0x23c   :  { %10495 = vmatprep.mubr.bf16.mxu0 %v2105_v29 }
 0x23d   :  { %v534_v29 = vcombine.high %v526_v27, %v526_v27  ;;  %v1198_v30 = vcombine.high %v1196_v28, %v1196_v28  ;;  %v1954_v49 = vpack.c.bf16 %v526_v27, %v526_v27  ;;  %v14194_v27 = vld [vmem:[#allocation5 + $0xda4] ss:$1272 sps:$4 sm:$0xff]  }
 0x23f   :  { %v1955_v37 = vpack.c.bf16 %v534_v29, %v534_v29  ;;  %v2113_v38 = vpack.c.bf16 %v1198_v30, %v1198_v30 }
 0x241   :  { %7306 = vmatpush1.bf16.xpose.msra.mxu1 %v14098_v32  ;;  %v2110_v32 = vpack.c.bf16 %v1189_v10, %v1189_v10 }
 0x242   :  { %10466 = vmatpush1.bf16.xpose.msra.mxu0 %v14101_v33  ;;  %7343 = vmatprep.subr.bf16.mxu1 %v14106_v34  ;;  %v14144_v33 = vld [vmem:[#allocation5 + $0x120] ss:$1272 sps:$4 sm:$0xff]  }
 0x243   :  { %10503 = vmatprep.subr.bf16.mxu0 %v14110_v35  ;;  %v14147_v34 = vld [vmem:[#allocation5 + $0x398] ss:$1272 sps:$4 sm:$0xff]   ;;  %v14152_v35 = vld [vmem:[#allocation5 + $0xb14] ss:$1272 sps:$4 sm:$0xff]  }
 0x248   :  { %7336 = vmatmul.mubr.bf16.vlgmr.msra.gmra.mrb[0].mxu1 %v1946_v40  ;;  %v111_v40 = vld [vmem:[#allocation2 + $0x1d0] sm:$0xff] }
 0x249   :  { %10496 = vmatmul.mubr.bf16.vlgmr.msra.gmra.mrb[0].mxu0 %v2104_v41  ;;  %7344 = vmatpush1.bf16.xpose.msra.mxu1 %v14104_v42  ;;  %v14150_v41 = vld [vmem:[#allocation5 + $0xb10] ss:$1272 sps:$4 sm:$0xff]   ;;  %v1199_v57 = vcombine.high %v111_v40, %v111_v40 }
 0x24a   :  { %10504 = vmatpush1.bf16.xpose.msra.mxu0 %v14108_v43  ;;  %7345 = vmatprep.subr.bf16.mxu1 %v14113_v44  ;;  %v14153_v42 = vld [vmem:[#allocation5 + $0xd88] ss:$1272 sps:$4 sm:$0xff]   ;;  %v14158_v43 = vld [vmem:[#allocation5 + $0x12c] ss:$1272 sps:$4 sm:$0xff]  }
 0x24b   :  { %10505 = vmatprep.subr.bf16.mxu0 %v14116_v45  ;;  %7375 = vmatprep.mubr.bf16.mxu1 %v1949_v46  ;;  %v14162_v44 = vld [vmem:[#allocation5 + $0x3a4] ss:$1272 sps:$4 sm:$0xff]   ;;  %v533_v45 = vrot.slane %v519_v39, %v14868_v9  ;;  %v1206_v46 = vrot.slane %v111_v40, %v14868_v9 }
 0x24c   :  { %10535 = vmatprep.mubr.bf16.mxu0 %v2107_v47 }
 0x24d   :  { %v535_v47 = vcombine.high %v533_v45, %v533_v45  ;;  %v1214_v48 = vcombine.high %v1206_v46, %v1206_v46  ;;  %v1956_v3 = vpack.c.bf16 %v533_v45, %v533_v45  ;;  %v14207_v45 = vld [vmem:[#allocation5 + $0xdac] ss:$1272 sps:$4 sm:$0xff]  }
 0x24f   :  { %v1957_v55 = vpack.c.bf16 %v535_v47, %v535_v47  ;;  %v2115_v56 = vpack.c.bf16 %v1214_v48, %v1214_v48 }
 0x251   :  { %7346 = vmatpush1.bf16.xpose.msra.mxu1 %v14111_v50  ;;  %v2112_v50 = vpack.c.bf16 %v1196_v28, %v1196_v28 }
 0x252   :  { %10506 = vmatpush1.bf16.xpose.msra.mxu0 %v14114_v51  ;;  %7383 = vmatprep.subr.bf16.mxu1 %v14120_v52  ;;  %v14156_v51 = vld [vmem:[#allocation5 + $0x128] ss:$1272 sps:$4 sm:$0xff]  }
 0x253   :  { %10543 = vmatprep.subr.bf16.mxu0 %v14123_v53  ;;  %v14160_v52 = vld [vmem:[#allocation5 + $0x3a0] ss:$1272 sps:$4 sm:$0xff]   ;;  %v14165_v53 = vld [vmem:[#allocation5 + $0xb1c] ss:$1272 sps:$4 sm:$0xff]  }
 0x258   :  { %7376 = vmatmul.mubr.bf16.vlgmr.msra.gmra.mrb[0].mxu1 %v1948_v58  ;;  %v72_v58 = vld [vmem:[#allocation2 + $0x98] sm:$0xff] }
 0x259   :  { %10536 = vmatmul.mubr.bf16.vlgmr.msra.gmra.mrb[0].mxu0 %v2106_v59  ;;  %7384 = vmatpush1.bf16.xpose.msra.mxu1 %v14118_v60  ;;  %v14163_v59 = vld [vmem:[#allocation5 + $0xb18] ss:$1272 sps:$4 sm:$0xff]   ;;  %v536_v12 = vcombine.high %v72_v58, %v72_v58 }
 0x25a   :  { %10544 = vmatpush1.bf16.xpose.msra.mxu0 %v14121_v61  ;;  %7385 = vmatprep.subr.bf16.mxu1 %v14126_v62  ;;  %v14166_v60 = vld [vmem:[#allocation5 + $0xd90] ss:$1272 sps:$4 sm:$0xff]   ;;  %v14172_v61 = vld [vmem:[#allocation5 + $0x134] ss:$1272 sps:$4 sm:$0xff]  }
 0x25b   :  { %10545 = vmatprep.subr.bf16.mxu0 %v14129_v63  ;;  %7415 = vmatprep.mubr.bf16.mxu1 %v1951_v0  ;;  %v14175_v62 = vld [vmem:[#allocation5 + $0x3ac] ss:$1272 sps:$4 sm:$0xff]   ;;  %v543_v63 = vrot.slane %v72_v58, %v14868_v9  ;;  %v1213_v0 = vrot.slane %v1199_v57, %v14868_v9 }
 0x25c   :  { %10575 = vmatprep.mubr.bf16.mxu0 %v2109_v1 }
 0x25d   :  { %v551_v1 = vcombine.high %v543_v63, %v543_v63  ;;  %v1215_v2 = vcombine.high %v1213_v0, %v1213_v0  ;;  %v1958_v22 = vpack.c.bf16 %v543_v63, %v543_v63  ;;  %v14220_v63 = vld [vmem:[#allocation5 + $0xdb4] ss:$1272 sps:$4 sm:$0xff]  }
 0x25f   :  { %v1959_v10 = vpack.c.bf16 %v551_v1, %v551_v1  ;;  %v2117_v11 = vpack.c.bf16 %v1215_v2, %v1215_v2 }
 0x261   :  { %7386 = vmatpush1.bf16.xpose.msra.mxu1 %v14124_v4  ;;  %v2114_v4 = vpack.c.bf16 %v1206_v46, %v1206_v46 }
 0x262   :  { %10546 = vmatpush1.bf16.xpose.msra.mxu0 %v14127_v5  ;;  %7423 = vmatprep.subr.bf16.mxu1 %v14132_v6  ;;  %v14170_v5 = vld [vmem:[#allocation5 + $0x130] ss:$1272 sps:$4 sm:$0xff]  }
 0x263   :  { %10583 = vmatprep.subr.bf16.mxu0 %v14136_v7  ;;  %v14173_v6 = vld [vmem:[#allocation5 + $0x3a8] ss:$1272 sps:$4 sm:$0xff]   ;;  %v14178_v7 = vld [vmem:[#allocation5 + $0xb24] ss:$1272 sps:$4 sm:$0xff]  }
 0x268   :  { %7416 = vmatmul.mubr.bf16.vlgmr.msra.gmra.mrb[0].mxu1 %v1950_v13  ;;  %v112_v13 = vld [vmem:[#allocation2 + $0x1d8] sm:$0xff] }
 0x269   :  { %10576 = vmatmul.mubr.bf16.vlgmr.msra.gmra.mrb[0].mxu0 %v2108_v14  ;;  %7424 = vmatpush1.bf16.xpose.msra.mxu1 %v14130_v15  ;;  %v14176_v14 = vld [vmem:[#allocation5 + $0xb20] ss:$1272 sps:$4 sm:$0xff]   ;;  %v1216_v30 = vcombine.high %v112_v13, %v112_v13 }
 0x26a   :  { %10584 = vmatpush1.bf16.xpose.msra.mxu0 %v14134_v16  ;;  %7425 = vmatprep.subr.bf16.mxu1 %v14139_v17  ;;  %v14179_v15 = vld [vmem:[#allocation5 + $0xd98] ss:$1272 sps:$4 sm:$0xff]   ;;  %v14184_v16 = vld [vmem:[#allocation5 + $0x13c] ss:$1272 sps:$4 sm:$0xff]  }
 0x26b   :  { %10585 = vmatprep.subr.bf16.mxu0 %v14142_v18  ;;  %7455 = vmatprep.mubr.bf16.mxu1 %v1953_v19  ;;  %v14188_v17 = vld [vmem:[#allocation5 + $0x3b4] ss:$1272 sps:$4 sm:$0xff]   ;;  %v550_v18 = vrot.slane %v536_v12, %v14868_v9  ;;  %v1223_v19 = vrot.slane %v112_v13, %v14868_v9 }
 0x26c   :  { %10615 = vmatprep.mubr.bf16.mxu0 %v2111_v20 }
 0x26d   :  { %v552_v20 = vcombine.high %v550_v18, %v550_v18  ;;  %v1231_v21 = vcombine.high %v1223_v19, %v1223_v19  ;;  %v1960_v40 = vpack.c.bf16 %v550_v18, %v550_v18  ;;  %v14233_v18 = vld [vmem:[#allocation5 + $0xdbc] ss:$1272 sps:$4 sm:$0xff]  }
 0x26f   :  { %v1961_v28 = vpack.c.bf16 %v552_v20, %v552_v20  ;;  %v2119_v29 = vpack.c.bf16 %v1231_v21, %v1231_v21 }
 0x271   :  { %7426 = vmatpush1.bf16.xpose.msra.mxu1 %v14137_v23  ;;  %v2116_v23 = vpack.c.bf16 %v1213_v0, %v1213_v0 }
 0x272   :  { %10586 = vmatpush1.bf16.xpose.msra.mxu0 %v14140_v24  ;;  %7463 = vmatprep.subr.bf16.mxu1 %v14146_v25  ;;  %v14182_v24 = vld [vmem:[#allocation5 + $0x138] ss:$1272 sps:$4 sm:$0xff]  }
 0x273   :  { %10623 = vmatprep.subr.bf16.mxu0 %v14149_v26  ;;  %v14186_v25 = vld [vmem:[#allocation5 + $0x3b0] ss:$1272 sps:$4 sm:$0xff]   ;;  %v14191_v26 = vld [vmem:[#allocation5 + $0xb2c] ss:$1272 sps:$4 sm:$0xff]  }
 0x278   :  { %7456 = vmatmul.mubr.bf16.vlgmr.msra.gmra.mrb[0].mxu1 %v1952_v31  ;;  %v73_v31 = vld [vmem:[#allocation2 + $0xa0] sm:$0xff] }
 0x279   :  { %10616 = vmatmul.mubr.bf16.vlgmr.msra.gmra.mrb[0].mxu0 %v2110_v32  ;;  %7464 = vmatpush1.bf16.xpose.msra.mxu1 %v14144_v33  ;;  %v14189_v32 = vld [vmem:[#allocation5 + $0xb28] ss:$1272 sps:$4 sm:$0xff]   ;;  %v553_v48 = vcombine.high %v73_v31, %v73_v31 }
 0x27a   :  { %10624 = vmatpush1.bf16.xpose.msra.mxu0 %v14147_v34  ;;  %7465 = vmatprep.subr.bf16.mxu1 %v14152_v35  ;;  %v14192_v33 = vld [vmem:[#allocation5 + $0xda0] ss:$1272 sps:$4 sm:$0xff]   ;;  %v14198_v34 = vld [vmem:[#allocation5 + $0x144] ss:$1272 sps:$4 sm:$0xff]  }
 0x27b   :  { %10625 = vmatprep.subr.bf16.mxu0 %v14155_v36  ;;  %7495 = vmatprep.mubr.bf16.mxu1 %v1955_v37  ;;  %v14201_v35 = vld [vmem:[#allocation5 + $0x3bc] ss:$1272 sps:$4 sm:$0xff]   ;;  %v560_v36 = vrot.slane %v73_v31, %v14868_v9  ;;  %v1230_v37 = vrot.slane %v1216_v30, %v14868_v9 }
 0x27c   :  { %10655 = vmatprep.mubr.bf16.mxu0 %v2113_v38 }
 0x27d   :  { %v568_v38 = vcombine.high %v560_v36, %v560_v36  ;;  %v1232_v39 = vcombine.high %v1230_v37, %v1230_v37  ;;  %v1962_v58 = vpack.c.bf16 %v560_v36, %v560_v36  ;;  %v14246_v36 = vld [vmem:[#allocation5 + $0xdc4] ss:$1272 sps:$4 sm:$0xff]  }
 0x27f   :  { %v1963_v46 = vpack.c.bf16 %v568_v38, %v568_v38  ;;  %v2121_v47 = vpack.c.bf16 %v1232_v39, %v1232_v39 }
 0x281   :  { %7466 = vmatpush1.bf16.xpose.msra.mxu1 %v14150_v41  ;;  %v2118_v41 = vpack.c.bf16 %v1223_v19, %v1223_v19 }
 0x282   :  { %10626 = vmatpush1.bf16.xpose.msra.mxu0 %v14153_v42  ;;  %7503 = vmatprep.subr.bf16.mxu1 %v14158_v43  ;;  %v14196_v42 = vld [vmem:[#allocation5 + $0x140] ss:$1272 sps:$4 sm:$0xff]  }
 0x283   :  { %10663 = vmatprep.subr.bf16.mxu0 %v14162_v44  ;;  %v14199_v43 = vld [vmem:[#allocation5 + $0x3b8] ss:$1272 sps:$4 sm:$0xff]   ;;  %v14204_v44 = vld [vmem:[#allocation5 + $0xb34] ss:$1272 sps:$4 sm:$0xff]  }
 0x288   :  { %7496 = vmatmul.mubr.bf16.vlgmr.msra.gmra.mrb[0].mxu1 %v1954_v49  ;;  %v113_v49 = vld [vmem:[#allocation2 + $0x1e0] sm:$0xff] }
 0x289   :  { %10656 = vmatmul.mubr.bf16.vlgmr.msra.gmra.mrb[0].mxu0 %v2112_v50  ;;  %7504 = vmatpush1.bf16.xpose.msra.mxu1 %v14156_v51  ;;  %v14202_v50 = vld [vmem:[#allocation5 + $0xb30] ss:$1272 sps:$4 sm:$0xff]   ;;  %v1233_v2 = vcombine.high %v113_v49, %v113_v49 }
 0x28a   :  { %10664 = vmatpush1.bf16.xpose.msra.mxu0 %v14160_v52  ;;  %7505 = vmatprep.subr.bf16.mxu1 %v14165_v53  ;;  %v14205_v51 = vld [vmem:[#allocation5 + $0xda8] ss:$1272 sps:$4 sm:$0xff]   ;;  %v14210_v52 = vld [vmem:[#allocation5 + $0x14c] ss:$1272 sps:$4 sm:$0xff]  }
 0x28b   :  { %10665 = vmatprep.subr.bf16.mxu0 %v14168_v54  ;;  %7535 = vmatprep.mubr.bf16.mxu1 %v1957_v55  ;;  %v14214_v53 = vld [vmem:[#allocation5 + $0x3c4] ss:$1272 sps:$4 sm:$0xff]   ;;  %v567_v54 = vrot.slane %v553_v48, %v14868_v9  ;;  %v1240_v55 = vrot.slane %v113_v49, %v14868_v9 }
 0x28c   :  { %10695 = vmatprep.mubr.bf16.mxu0 %v2115_v56 }
 0x28d   :  { %v569_v56 = vcombine.high %v567_v54, %v567_v54  ;;  %v1248_v57 = vcombine.high %v1240_v55, %v1240_v55  ;;  %v1964_v13 = vpack.c.bf16 %v567_v54, %v567_v54  ;;  %v14259_v54 = vld [vmem:[#allocation5 + $0xdcc] ss:$1272 sps:$4 sm:$0xff]  }
 0x28f   :  { %v1965_v0 = vpack.c.bf16 %v569_v56, %v569_v56  ;;  %v2123_v1 = vpack.c.bf16 %v1248_v57, %v1248_v57 }
 0x291   :  { %7506 = vmatpush1.bf16.xpose.msra.mxu1 %v14163_v59  ;;  %v2120_v59 = vpack.c.bf16 %v1230_v37, %v1230_v37 }
 0x292   :  { %10666 = vmatpush1.bf16.xpose.msra.mxu0 %v14166_v60  ;;  %7543 = vmatprep.subr.bf16.mxu1 %v14172_v61  ;;  %v14208_v60 = vld [vmem:[#allocation5 + $0x148] ss:$1272 sps:$4 sm:$0xff]  }
 0x293   :  { %10703 = vmatprep.subr.bf16.mxu0 %v14175_v62  ;;  %v14212_v61 = vld [vmem:[#allocation5 + $0x3c0] ss:$1272 sps:$4 sm:$0xff]   ;;  %v14217_v62 = vld [vmem:[#allocation5 + $0xb3c] ss:$1272 sps:$4 sm:$0xff]  }
 0x298   :  { %7536 = vmatmul.mubr.bf16.vlgmr.msra.gmra.mrb[0].mxu1 %v1956_v3  ;;  %v74_v3 = vld [vmem:[#allocation2 + $0xa8] sm:$0xff] }
 0x299   :  { %10696 = vmatmul.mubr.bf16.vlgmr.msra.gmra.mrb[0].mxu0 %v2114_v4  ;;  %7544 = vmatpush1.bf16.xpose.msra.mxu1 %v14170_v5  ;;  %v14215_v4 = vld [vmem:[#allocation5 + $0xb38] ss:$1272 sps:$4 sm:$0xff]   ;;  %v570_v21 = vcombine.high %v74_v3, %v74_v3 }
 0x29a   :  { %10704 = vmatpush1.bf16.xpose.msra.mxu0 %v14173_v6  ;;  %7545 = vmatprep.subr.bf16.mxu1 %v14178_v7  ;;  %v14218_v5 = vld [vmem:[#allocation5 + $0xdb0] ss:$1272 sps:$4 sm:$0xff]   ;;  %v14224_v6 = vld [vmem:[#allocation5 + $0x154] ss:$1272 sps:$4 sm:$0xff]  }
 0x29b   :  { %10705 = vmatprep.subr.bf16.mxu0 %v14181_v8  ;;  %7575 = vmatprep.mubr.bf16.mxu1 %v1959_v10  ;;  %v14227_v7 = vld [vmem:[#allocation5 + $0x3cc] ss:$1272 sps:$4 sm:$0xff]   ;;  %v577_v8 = vrot.slane %v74_v3, %v14868_v9  ;;  %v1247_v10 = vrot.slane %v1233_v2, %v14868_v9 }
 0x29c   :  { %10735 = vmatprep.mubr.bf16.mxu0 %v2117_v11 }
 0x29d   :  { %v585_v11 = vcombine.high %v577_v8, %v577_v8  ;;  %v1249_v12 = vcombine.high %v1247_v10, %v1247_v10  ;;  %v1966_v31 = vpack.c.bf16 %v577_v8, %v577_v8  ;;  %v14272_v8 = vld [vmem:[#allocation5 + $0xdd4] ss:$1272 sps:$4 sm:$0xff]  }
 0x29f   :  { %v1967_v19 = vpack.c.bf16 %v585_v11, %v585_v11  ;;  %v2125_v20 = vpack.c.bf16 %v1249_v12, %v1249_v12 }
 0x2a1   :  { %7546 = vmatpush1.bf16.xpose.msra.mxu1 %v14176_v14  ;;  %v2122_v14 = vpack.c.bf16 %v1240_v55, %v1240_v55 }
 0x2a2   :  { %10706 = vmatpush1.bf16.xpose.msra.mxu0 %v14179_v15  ;;  %7583 = vmatprep.subr.bf16.mxu1 %v14184_v16  ;;  %v14222_v15 = vld [vmem:[#allocation5 + $0x150] ss:$1272 sps:$4 sm:$0xff]  }
 0x2a3   :  { %10743 = vmatprep.subr.bf16.mxu0 %v14188_v17  ;;  %v14225_v16 = vld [vmem:[#allocation5 + $0x3c8] ss:$1272 sps:$4 sm:$0xff]   ;;  %v14230_v17 = vld [vmem:[#allocation5 + $0xb44] ss:$1272 sps:$4 sm:$0xff]  }
 0x2a8   :  { %7576 = vmatmul.mubr.bf16.vlgmr.msra.gmra.mrb[0].mxu1 %v1958_v22  ;;  %v114_v22 = vld [vmem:[#allocation2 + $0x1e8] sm:$0xff] }
 0x2a9   :  { %10736 = vmatmul.mubr.bf16.vlgmr.msra.gmra.mrb[0].mxu0 %v2116_v23  ;;  %7584 = vmatpush1.bf16.xpose.msra.mxu1 %v14182_v24  ;;  %v14228_v23 = vld [vmem:[#allocation5 + $0xb40] ss:$1272 sps:$4 sm:$0xff]   ;;  %v1250_v39 = vcombine.high %v114_v22, %v114_v22 }
 0x2aa   :  { %10744 = vmatpush1.bf16.xpose.msra.mxu0 %v14186_v25  ;;  %7585 = vmatprep.subr.bf16.mxu1 %v14191_v26  ;;  %v14231_v24 = vld [vmem:[#allocation5 + $0xdb8] ss:$1272 sps:$4 sm:$0xff]   ;;  %v14236_v25 = vld [vmem:[#allocation5 + $0x15c] ss:$1272 sps:$4 sm:$0xff]  }
 0x2ab   :  { %10745 = vmatprep.subr.bf16.mxu0 %v14194_v27  ;;  %7615 = vmatprep.mubr.bf16.mxu1 %v1961_v28  ;;  %v14240_v26 = vld [vmem:[#allocation5 + $0x3d4] ss:$1272 sps:$4 sm:$0xff]   ;;  %v584_v27 = vrot.slane %v570_v21, %v14868_v9  ;;  %v1257_v28 = vrot.slane %v114_v22, %v14868_v9 }
 0x2ac   :  { %10775 = vmatprep.mubr.bf16.mxu0 %v2119_v29 }
 0x2ad   :  { %v586_v29 = vcombine.high %v584_v27, %v584_v27  ;;  %v1265_v30 = vcombine.high %v1257_v28, %v1257_v28  ;;  %v1968_v49 = vpack.c.bf16 %v584_v27, %v584_v27  ;;  %v14285_v27 = vld [vmem:[#allocation5 + $0xddc] ss:$1272 sps:$4 sm:$0xff]  }
 0x2af   :  { %v1969_v37 = vpack.c.bf16 %v586_v29, %v586_v29  ;;  %v2127_v38 = vpack.c.bf16 %v1265_v30, %v1265_v30 }
 0x2b1   :  { %7586 = vmatpush1.bf16.xpose.msra.mxu1 %v14189_v32  ;;  %v2124_v32 = vpack.c.bf16 %v1247_v10, %v1247_v10 }
 0x2b2   :  { %10746 = vmatpush1.bf16.xpose.msra.mxu0 %v14192_v33  ;;  %7623 = vmatprep.subr.bf16.mxu1 %v14198_v34  ;;  %v14234_v33 = vld [vmem:[#allocation5 + $0x158] ss:$1272 sps:$4 sm:$0xff]  }
 0x2b3   :  { %10783 = vmatprep.subr.bf16.mxu0 %v14201_v35  ;;  %v14238_v34 = vld [vmem:[#allocation5 + $0x3d0] ss:$1272 sps:$4 sm:$0xff]   ;;  %v14243_v35 = vld [vmem:[#allocation5 + $0xb4c] ss:$1272 sps:$4 sm:$0xff]  }
 0x2b8   :  { %7616 = vmatmul.mubr.bf16.vlgmr.msra.gmra.mrb[0].mxu1 %v1960_v40  ;;  %v75_v40 = vld [vmem:[#allocation2 + $0xb0] sm:$0xff] }
 0x2b9   :  { %10776 = vmatmul.mubr.bf16.vlgmr.msra.gmra.mrb[0].mxu0 %v2118_v41  ;;  %7624 = vmatpush1.bf16.xpose.msra.mxu1 %v14196_v42  ;;  %v14241_v41 = vld [vmem:[#allocation5 + $0xb48] ss:$1272 sps:$4 sm:$0xff]   ;;  %v587_v57 = vcombine.high %v75_v40, %v75_v40 }
 0x2ba   :  { %10784 = vmatpush1.bf16.xpose.msra.mxu0 %v14199_v43  ;;  %7625 = vmatprep.subr.bf16.mxu1 %v14204_v44  ;;  %v14244_v42 = vld [vmem:[#allocation5 + $0xdc0] ss:$1272 sps:$4 sm:$0xff]   ;;  %v14250_v43 = vld [vmem:[#allocation5 + $0x164] ss:$1272 sps:$4 sm:$0xff]  }
 0x2bb   :  { %10785 = vmatprep.subr.bf16.mxu0 %v14207_v45  ;;  %7655 = vmatprep.mubr.bf16.mxu1 %v1963_v46  ;;  %v14253_v44 = vld [vmem:[#allocation5 + $0x3dc] ss:$1272 sps:$4 sm:$0xff]   ;;  %v594_v45 = vrot.slane %v75_v40, %v14868_v9  ;;  %v1264_v46 = vrot.slane %v1250_v39, %v14868_v9 }
 0x2bc   :  { %10815 = vmatprep.mubr.bf16.mxu0 %v2121_v47 }
 0x2bd   :  { %v602_v47 = vcombine.high %v594_v45, %v594_v45  ;;  %v1266_v48 = vcombine.high %v1264_v46, %v1264_v46  ;;  %v1970_v3 = vpack.c.bf16 %v594_v45, %v594_v45  ;;  %v14298_v45 = vld [vmem:[#allocation5 + $0xde4] ss:$1272 sps:$4 sm:$0xff]  }
 0x2bf   :  { %v1971_v55 = vpack.c.bf16 %v602_v47, %v602_v47  ;;  %v2129_v56 = vpack.c.bf16 %v1266_v48, %v1266_v48 }
 0x2c1   :  { %7626 = vmatpush1.bf16.xpose.msra.mxu1 %v14202_v50  ;;  %v2126_v50 = vpack.c.bf16 %v1257_v28, %v1257_v28 }
 0x2c2   :  { %10786 = vmatpush1.bf16.xpose.msra.mxu0 %v14205_v51  ;;  %7663 = vmatprep.subr.bf16.mxu1 %v14210_v52  ;;  %v14248_v51 = vld [vmem:[#allocation5 + $0x160] ss:$1272 sps:$4 sm:$0xff]  }
 0x2c3   :  { %10823 = vmatprep.subr.bf16.mxu0 %v14214_v53  ;;  %v14251_v52 = vld [vmem:[#allocation5 + $0x3d8] ss:$1272 sps:$4 sm:$0xff]   ;;  %v14256_v53 = vld [vmem:[#allocation5 + $0xb54] ss:$1272 sps:$4 sm:$0xff]  }
 0x2c8   :  { %7656 = vmatmul.mubr.bf16.vlgmr.msra.gmra.mrb[0].mxu1 %v1962_v58  ;;  %v115_v58 = vld [vmem:[#allocation2 + $0x1f0] sm:$0xff] }
 0x2c9   :  { %10816 = vmatmul.mubr.bf16.vlgmr.msra.gmra.mrb[0].mxu0 %v2120_v59  ;;  %7664 = vmatpush1.bf16.xpose.msra.mxu1 %v14208_v60  ;;  %v14254_v59 = vld [vmem:[#allocation5 + $0xb50] ss:$1272 sps:$4 sm:$0xff]   ;;  %v1267_v12 = vcombine.high %v115_v58, %v115_v58 }
 0x2ca   :  { %10824 = vmatpush1.bf16.xpose.msra.mxu0 %v14212_v61  ;;  %7665 = vmatprep.subr.bf16.mxu1 %v14217_v62  ;;  %v14257_v60 = vld [vmem:[#allocation5 + $0xdc8] ss:$1272 sps:$4 sm:$0xff]   ;;  %v14262_v61 = vld [vmem:[#allocation5 + $0x16c] ss:$1272 sps:$4 sm:$0xff]  }
 0x2cb   :  { %10825 = vmatprep.subr.bf16.mxu0 %v14220_v63  ;;  %7695 = vmatprep.mubr.bf16.mxu1 %v1965_v0  ;;  %v14266_v62 = vld [vmem:[#allocation5 + $0x3e4] ss:$1272 sps:$4 sm:$0xff]   ;;  %v601_v63 = vrot.slane %v587_v57, %v14868_v9  ;;  %v1274_v0 = vrot.slane %v115_v58, %v14868_v9 }
 0x2cc   :  { %10855 = vmatprep.mubr.bf16.mxu0 %v2123_v1 }
 0x2cd   :  { %v603_v1 = vcombine.high %v601_v63, %v601_v63  ;;  %v1282_v2 = vcombine.high %v1274_v0, %v1274_v0  ;;  %v1972_v22 = vpack.c.bf16 %v601_v63, %v601_v63  ;;  %v14311_v63 = vld [vmem:[#allocation5 + $0xdec] ss:$1272 sps:$4 sm:$0xff]  }
 0x2cf   :  { %v1973_v10 = vpack.c.bf16 %v603_v1, %v603_v1  ;;  %v2131_v11 = vpack.c.bf16 %v1282_v2, %v1282_v2 }
 0x2d1   :  { %7666 = vmatpush1.bf16.xpose.msra.mxu1 %v14215_v4  ;;  %v2128_v4 = vpack.c.bf16 %v1264_v46, %v1264_v46 }
 0x2d2   :  { %10826 = vmatpush1.bf16.xpose.msra.mxu0 %v14218_v5  ;;  %7703 = vmatprep.subr.bf16.mxu1 %v14224_v6  ;;  %v14260_v5 = vld [vmem:[#allocation5 + $0x168] ss:$1272 sps:$4 sm:$0xff]  }
 0x2d3   :  { %10863 = vmatprep.subr.bf16.mxu0 %v14227_v7  ;;  %v14264_v6 = vld [vmem:[#allocation5 + $0x3e0] ss:$1272 sps:$4 sm:$0xff]   ;;  %v14269_v7 = vld [vmem:[#allocation5 + $0xb5c] ss:$1272 sps:$4 sm:$0xff]  }
 0x2d8   :  { %7696 = vmatmul.mubr.bf16.vlgmr.msra.gmra.mrb[0].mxu1 %v1964_v13  ;;  %v76_v13 = vld [vmem:[#allocation2 + $0xb8] sm:$0xff] }
 0x2d9   :  { %10856 = vmatmul.mubr.bf16.vlgmr.msra.gmra.mrb[0].mxu0 %v2122_v14  ;;  %7704 = vmatpush1.bf16.xpose.msra.mxu1 %v14222_v15  ;;  %v14267_v14 = vld [vmem:[#allocation5 + $0xb58] ss:$1272 sps:$4 sm:$0xff]   ;;  %v604_v30 = vcombine.high %v76_v13, %v76_v13 }
 0x2da   :  { %10864 = vmatpush1.bf16.xpose.msra.mxu0 %v14225_v16  ;;  %7705 = vmatprep.subr.bf16.mxu1 %v14230_v17  ;;  %v14270_v15 = vld [vmem:[#allocation5 + $0xdd0] ss:$1272 sps:$4 sm:$0xff]   ;;  %v14276_v16 = vld [vmem:[#allocation5 + $0x174] ss:$1272 sps:$4 sm:$0xff]  }
 0x2db   :  { %10865 = vmatprep.subr.bf16.mxu0 %v14233_v18  ;;  %7735 = vmatprep.mubr.bf16.mxu1 %v1967_v19  ;;  %v14279_v17 = vld [vmem:[#allocation5 + $0x3ec] ss:$1272 sps:$4 sm:$0xff]   ;;  %v611_v18 = vrot.slane %v76_v13, %v14868_v9  ;;  %v1281_v19 = vrot.slane %v1267_v12, %v14868_v9 }
 0x2dc   :  { %10895 = vmatprep.mubr.bf16.mxu0 %v2125_v20 }
 0x2dd   :  { %v619_v20 = vcombine.high %v611_v18, %v611_v18  ;;  %v1283_v21 = vcombine.high %v1281_v19, %v1281_v19  ;;  %v1974_v40 = vpack.c.bf16 %v611_v18, %v611_v18  ;;  %v14324_v18 = vld [vmem:[#allocation5 + $0xdf4] ss:$1272 sps:$4 sm:$0xff]  }
 0x2df   :  { %v1975_v28 = vpack.c.bf16 %v619_v20, %v619_v20  ;;  %v2133_v29 = vpack.c.bf16 %v1283_v21, %v1283_v21 }
 0x2e1   :  { %7706 = vmatpush1.bf16.xpose.msra.mxu1 %v14228_v23  ;;  %v2130_v23 = vpack.c.bf16 %v1274_v0, %v1274_v0 }
 0x2e2   :  { %10866 = vmatpush1.bf16.xpose.msra.mxu0 %v14231_v24  ;;  %7743 = vmatprep.subr.bf16.mxu1 %v14236_v25  ;;  %v14274_v24 = vld [vmem:[#allocation5 + $0x170] ss:$1272 sps:$4 sm:$0xff]  }
 0x2e3   :  { %10903 = vmatprep.subr.bf16.mxu0 %v14240_v26  ;;  %v14277_v25 = vld [vmem:[#allocation5 + $0x3e8] ss:$1272 sps:$4 sm:$0xff]   ;;  %v14282_v26 = vld [vmem:[#allocation5 + $0xb64] ss:$1272 sps:$4 sm:$0xff]  }
 0x2e8   :  { %7736 = vmatmul.mubr.bf16.vlgmr.msra.gmra.mrb[0].mxu1 %v1966_v31  ;;  %v116_v31 = vld [vmem:[#allocation2 + $0x1f8] sm:$0xff] }
 0x2e9   :  { %10896 = vmatmul.mubr.bf16.vlgmr.msra.gmra.mrb[0].mxu0 %v2124_v32  ;;  %7744 = vmatpush1.bf16.xpose.msra.mxu1 %v14234_v33  ;;  %v14280_v32 = vld [vmem:[#allocation5 + $0xb60] ss:$1272 sps:$4 sm:$0xff]   ;;  %v1284_v48 = vcombine.high %v116_v31, %v116_v31 }
 0x2ea   :  { %10904 = vmatpush1.bf16.xpose.msra.mxu0 %v14238_v34  ;;  %7745 = vmatprep.subr.bf16.mxu1 %v14243_v35  ;;  %v14283_v33 = vld [vmem:[#allocation5 + $0xdd8] ss:$1272 sps:$4 sm:$0xff]   ;;  %v14288_v34 = vld [vmem:[#allocation5 + $0x17c] ss:$1272 sps:$4 sm:$0xff]  }
 0x2eb   :  { %10905 = vmatprep.subr.bf16.mxu0 %v14246_v36  ;;  %7775 = vmatprep.mubr.bf16.mxu1 %v1969_v37  ;;  %v14292_v35 = vld [vmem:[#allocation5 + $0x3f4] ss:$1272 sps:$4 sm:$0xff]   ;;  %v618_v36 = vrot.slane %v604_v30, %v14868_v9  ;;  %v1291_v37 = vrot.slane %v116_v31, %v14868_v9 }
 0x2ec   :  { %10935 = vmatprep.mubr.bf16.mxu0 %v2127_v38 }
 0x2ed   :  { %v620_v38 = vcombine.high %v618_v36, %v618_v36  ;;  %v1299_v39 = vcombine.high %v1291_v37, %v1291_v37  ;;  %v1976_v58 = vpack.c.bf16 %v618_v36, %v618_v36  ;;  %v14337_v36 = vld [vmem:[#allocation5 + $0xdfc] ss:$1272 sps:$4 sm:$0xff]  }
 0x2ef   :  { %v1977_v46 = vpack.c.bf16 %v620_v38, %v620_v38  ;;  %v2135_v47 = vpack.c.bf16 %v1299_v39, %v1299_v39 }
 0x2f1   :  { %7746 = vmatpush1.bf16.xpose.msra.mxu1 %v14241_v41  ;;  %v2132_v41 = vpack.c.bf16 %v1281_v19, %v1281_v19 }
 0x2f2   :  { %10906 = vmatpush1.bf16.xpose.msra.mxu0 %v14244_v42  ;;  %7783 = vmatprep.subr.bf16.mxu1 %v14250_v43  ;;  %v14286_v42 = vld [vmem:[#allocation5 + $0x178] ss:$1272 sps:$4 sm:$0xff]  }
 0x2f3   :  { %10943 = vmatprep.subr.bf16.mxu0 %v14253_v44  ;;  %v14290_v43 = vld [vmem:[#allocation5 + $0x3f0] ss:$1272 sps:$4 sm:$0xff]   ;;  %v14295_v44 = vld [vmem:[#allocation5 + $0xb6c] ss:$1272 sps:$4 sm:$0xff]  }
 0x2f8   :  { %7776 = vmatmul.mubr.bf16.vlgmr.msra.gmra.mrb[0].mxu1 %v1968_v49  ;;  %v77_v49 = vld [vmem:[#allocation2 + $0xc0] sm:$0xff] }
 0x2f9   :  { %10936 = vmatmul.mubr.bf16.vlgmr.msra.gmra.mrb[0].mxu0 %v2126_v50  ;;  %7784 = vmatpush1.bf16.xpose.msra.mxu1 %v14248_v51  ;;  %v14293_v50 = vld [vmem:[#allocation5 + $0xb68] ss:$1272 sps:$4 sm:$0xff]   ;;  %v621_v2 = vcombine.high %v77_v49, %v77_v49 }
 0x2fa   :  { %10944 = vmatpush1.bf16.xpose.msra.mxu0 %v14251_v52  ;;  %7785 = vmatprep.subr.bf16.mxu1 %v14256_v53  ;;  %v14296_v51 = vld [vmem:[#allocation5 + $0xde0] ss:$1272 sps:$4 sm:$0xff]   ;;  %v14302_v52 = vld [vmem:[#allocation5 + $0x184] ss:$1272 sps:$4 sm:$0xff]  }
 0x2fb   :  { %10945 = vmatprep.subr.bf16.mxu0 %v14259_v54  ;;  %7815 = vmatprep.mubr.bf16.mxu1 %v1971_v55  ;;  %v14305_v53 = vld [vmem:[#allocation5 + $0x3fc] ss:$1272 sps:$4 sm:$0xff]   ;;  %v628_v54 = vrot.slane %v77_v49, %v14868_v9  ;;  %v1298_v55 = vrot.slane %v1284_v48, %v14868_v9 }
 0x2fc   :  { %10975 = vmatprep.mubr.bf16.mxu0 %v2129_v56 }
 0x2fd   :  { %v636_v56 = vcombine.high %v628_v54, %v628_v54  ;;  %v1300_v57 = vcombine.high %v1298_v55, %v1298_v55  ;;  %v1978_v13 = vpack.c.bf16 %v628_v54, %v628_v54  ;;  %v14350_v54 = vld [vmem:[#allocation5 + $0xe04] ss:$1272 sps:$4 sm:$0xff]  }
 0x2ff   :  { %v1979_v0 = vpack.c.bf16 %v636_v56, %v636_v56  ;;  %v2137_v1 = vpack.c.bf16 %v1300_v57, %v1300_v57 }
 0x301   :  { %7786 = vmatpush1.bf16.xpose.msra.mxu1 %v14254_v59  ;;  %v2134_v59 = vpack.c.bf16 %v1291_v37, %v1291_v37 }
 0x302   :  { %10946 = vmatpush1.bf16.xpose.msra.mxu0 %v14257_v60  ;;  %7823 = vmatprep.subr.bf16.mxu1 %v14262_v61  ;;  %v14300_v60 = vld [vmem:[#allocation5 + $0x180] ss:$1272 sps:$4 sm:$0xff]  }
 0x303   :  { %10983 = vmatprep.subr.bf16.mxu0 %v14266_v62  ;;  %v14303_v61 = vld [vmem:[#allocation5 + $0x3f8] ss:$1272 sps:$4 sm:$0xff]   ;;  %v14308_v62 = vld [vmem:[#allocation5 + $0xb74] ss:$1272 sps:$4 sm:$0xff]  }
 0x308   :  { %7816 = vmatmul.mubr.bf16.vlgmr.msra.gmra.mrb[0].mxu1 %v1970_v3  ;;  %v117_v3 = vld [vmem:[#allocation2 + $0x200] sm:$0xff] }
 0x309   :  { %10976 = vmatmul.mubr.bf16.vlgmr.msra.gmra.mrb[0].mxu0 %v2128_v4  ;;  %7824 = vmatpush1.bf16.xpose.msra.mxu1 %v14260_v5  ;;  %v14306_v4 = vld [vmem:[#allocation5 + $0xb70] ss:$1272 sps:$4 sm:$0xff]   ;;  %v1301_v21 = vcombine.high %v117_v3, %v117_v3 }
 0x30a   :  { %10984 = vmatpush1.bf16.xpose.msra.mxu0 %v14264_v6  ;;  %7825 = vmatprep.subr.bf16.mxu1 %v14269_v7  ;;  %v14309_v5 = vld [vmem:[#allocation5 + $0xde8] ss:$1272 sps:$4 sm:$0xff]   ;;  %v14314_v6 = vld [vmem:[#allocation5 + $0x18c] ss:$1272 sps:$4 sm:$0xff]  }
 0x30b   :  { %10985 = vmatprep.subr.bf16.mxu0 %v14272_v8  ;;  %7855 = vmatprep.mubr.bf16.mxu1 %v1973_v10  ;;  %v14318_v7 = vld [vmem:[#allocation5 + $0x404] ss:$1272 sps:$4 sm:$0xff]   ;;  %v635_v8 = vrot.slane %v621_v2, %v14868_v9  ;;  %v1308_v10 = vrot.slane %v117_v3, %v14868_v9 }
 0x30c   :  { %11015 = vmatprep.mubr.bf16.mxu0 %v2131_v11 }
 0x30d   :  { %v637_v11 = vcombine.high %v635_v8, %v635_v8  ;;  %v1316_v12 = vcombine.high %v1308_v10, %v1308_v10  ;;  %v1980_v31 = vpack.c.bf16 %v635_v8, %v635_v8  ;;  %v14363_v8 = vld [vmem:[#allocation5 + $0xe0c] ss:$1272 sps:$4 sm:$0xff]  }
 0x30f   :  { %v1981_v19 = vpack.c.bf16 %v637_v11, %v637_v11  ;;  %v2139_v20 = vpack.c.bf16 %v1316_v12, %v1316_v12 }
 0x311   :  { %7826 = vmatpush1.bf16.xpose.msra.mxu1 %v14267_v14  ;;  %v2136_v14 = vpack.c.bf16 %v1298_v55, %v1298_v55 }
 0x312   :  { %10986 = vmatpush1.bf16.xpose.msra.mxu0 %v14270_v15  ;;  %7863 = vmatprep.subr.bf16.mxu1 %v14276_v16  ;;  %v14312_v15 = vld [vmem:[#allocation5 + $0x188] ss:$1272 sps:$4 sm:$0xff]  }
 0x313   :  { %11023 = vmatprep.subr.bf16.mxu0 %v14279_v17  ;;  %v14316_v16 = vld [vmem:[#allocation5 + $0x400] ss:$1272 sps:$4 sm:$0xff]   ;;  %v14321_v17 = vld [vmem:[#allocation5 + $0xb7c] ss:$1272 sps:$4 sm:$0xff]  }
 0x318   :  { %7856 = vmatmul.mubr.bf16.vlgmr.msra.gmra.mrb[0].mxu1 %v1972_v22  ;;  %v78_v22 = vld [vmem:[#allocation2 + $0xc8] sm:$0xff] }
 0x319   :  { %11016 = vmatmul.mubr.bf16.vlgmr.msra.gmra.mrb[0].mxu0 %v2130_v23  ;;  %7864 = vmatpush1.bf16.xpose.msra.mxu1 %v14274_v24  ;;  %v14319_v23 = vld [vmem:[#allocation5 + $0xb78] ss:$1272 sps:$4 sm:$0xff]   ;;  %v638_v39 = vcombine.high %v78_v22, %v78_v22 }
 0x31a   :  { %11024 = vmatpush1.bf16.xpose.msra.mxu0 %v14277_v25  ;;  %7865 = vmatprep.subr.bf16.mxu1 %v14282_v26  ;;  %v14322_v24 = vld [vmem:[#allocation5 + $0xdf0] ss:$1272 sps:$4 sm:$0xff]   ;;  %v14328_v25 = vld [vmem:[#allocation5 + $0x194] ss:$1272 sps:$4 sm:$0xff]  }
 0x31b   :  { %11025 = vmatprep.subr.bf16.mxu0 %v14285_v27  ;;  %7895 = vmatprep.mubr.bf16.mxu1 %v1975_v28  ;;  %v14331_v26 = vld [vmem:[#allocation5 + $0x40c] ss:$1272 sps:$4 sm:$0xff]   ;;  %v645_v27 = vrot.slane %v78_v22, %v14868_v9  ;;  %v1315_v28 = vrot.slane %v1301_v21, %v14868_v9 }
 0x31c   :  { %11055 = vmatprep.mubr.bf16.mxu0 %v2133_v29 }
 0x31d   :  { %v653_v29 = vcombine.high %v645_v27, %v645_v27  ;;  %v1317_v30 = vcombine.high %v1315_v28, %v1315_v28  ;;  %v1982_v49 = vpack.c.bf16 %v645_v27, %v645_v27  ;;  %v14376_v27 = vld [vmem:[#allocation5 + $0xe14] ss:$1272 sps:$4 sm:$0xff]  }
 0x31f   :  { %v1983_v37 = vpack.c.bf16 %v653_v29, %v653_v29  ;;  %v2141_v38 = vpack.c.bf16 %v1317_v30, %v1317_v30 }
 0x321   :  { %7866 = vmatpush1.bf16.xpose.msra.mxu1 %v14280_v32  ;;  %v2138_v32 = vpack.c.bf16 %v1308_v10, %v1308_v10 }
 0x322   :  { %11026 = vmatpush1.bf16.xpose.msra.mxu0 %v14283_v33  ;;  %7903 = vmatprep.subr.bf16.mxu1 %v14288_v34  ;;  %v14326_v33 = vld [vmem:[#allocation5 + $0x190] ss:$1272 sps:$4 sm:$0xff]  }
 0x323   :  { %11063 = vmatprep.subr.bf16.mxu0 %v14292_v35  ;;  %v14329_v34 = vld [vmem:[#allocation5 + $0x408] ss:$1272 sps:$4 sm:$0xff]   ;;  %v14334_v35 = vld [vmem:[#allocation5 + $0xb84] ss:$1272 sps:$4 sm:$0xff]  }
 0x328   :  { %7896 = vmatmul.mubr.bf16.vlgmr.msra.gmra.mrb[0].mxu1 %v1974_v40  ;;  %v118_v40 = vld [vmem:[#allocation2 + $0x208] sm:$0xff] }
 0x329   :  { %11056 = vmatmul.mubr.bf16.vlgmr.msra.gmra.mrb[0].mxu0 %v2132_v41  ;;  %7904 = vmatpush1.bf16.xpose.msra.mxu1 %v14286_v42  ;;  %v14332_v41 = vld [vmem:[#allocation5 + $0xb80] ss:$1272 sps:$4 sm:$0xff]   ;;  %v1318_v57 = vcombine.high %v118_v40, %v118_v40 }
 0x32a   :  { %11064 = vmatpush1.bf16.xpose.msra.mxu0 %v14290_v43  ;;  %7905 = vmatprep.subr.bf16.mxu1 %v14295_v44  ;;  %v14335_v42 = vld [vmem:[#allocation5 + $0xdf8] ss:$1272 sps:$4 sm:$0xff]   ;;  %v14340_v43 = vld [vmem:[#allocation5 + $0x19c] ss:$1272 sps:$4 sm:$0xff]  }
 0x32b   :  { %11065 = vmatprep.subr.bf16.mxu0 %v14298_v45  ;;  %7935 = vmatprep.mubr.bf16.mxu1 %v1977_v46  ;;  %v14344_v44 = vld [vmem:[#allocation5 + $0x414] ss:$1272 sps:$4 sm:$0xff]   ;;  %v652_v45 = vrot.slane %v638_v39, %v14868_v9  ;;  %v1325_v46 = vrot.slane %v118_v40, %v14868_v9 }
 0x32c   :  { %11095 = vmatprep.mubr.bf16.mxu0 %v2135_v47 }
 0x32d   :  { %v654_v47 = vcombine.high %v652_v45, %v652_v45  ;;  %v1333_v48 = vcombine.high %v1325_v46, %v1325_v46  ;;  %v1984_v3 = vpack.c.bf16 %v652_v45, %v652_v45  ;;  %v14389_v45 = vld [vmem:[#allocation5 + $0xe1c] ss:$1272 sps:$4 sm:$0xff]  }
 0x32f   :  { %v1985_v55 = vpack.c.bf16 %v654_v47, %v654_v47  ;;  %v2143_v56 = vpack.c.bf16 %v1333_v48, %v1333_v48 }
 0x331   :  { %7906 = vmatpush1.bf16.xpose.msra.mxu1 %v14293_v50  ;;  %v2140_v50 = vpack.c.bf16 %v1315_v28, %v1315_v28 }
 0x332   :  { %11066 = vmatpush1.bf16.xpose.msra.mxu0 %v14296_v51  ;;  %7943 = vmatprep.subr.bf16.mxu1 %v14302_v52  ;;  %v14338_v51 = vld [vmem:[#allocation5 + $0x198] ss:$1272 sps:$4 sm:$0xff]  }
 0x333   :  { %11103 = vmatprep.subr.bf16.mxu0 %v14305_v53  ;;  %v14342_v52 = vld [vmem:[#allocation5 + $0x410] ss:$1272 sps:$4 sm:$0xff]   ;;  %v14347_v53 = vld [vmem:[#allocation5 + $0xb8c] ss:$1272 sps:$4 sm:$0xff]  }
 0x338   :  { %7936 = vmatmul.mubr.bf16.vlgmr.msra.gmra.mrb[0].mxu1 %v1976_v58  ;;  %v79_v58 = vld [vmem:[#allocation2 + $0xd0] sm:$0xff] }
 0x339   :  { %11096 = vmatmul.mubr.bf16.vlgmr.msra.gmra.mrb[0].mxu0 %v2134_v59  ;;  %7944 = vmatpush1.bf16.xpose.msra.mxu1 %v14300_v60  ;;  %v14345_v59 = vld [vmem:[#allocation5 + $0xb88] ss:$1272 sps:$4 sm:$0xff]   ;;  %v655_v12 = vcombine.high %v79_v58, %v79_v58 }
 0x33a   :  { %11104 = vmatpush1.bf16.xpose.msra.mxu0 %v14303_v61  ;;  %7945 = vmatprep.subr.bf16.mxu1 %v14308_v62  ;;  %v14348_v60 = vld [vmem:[#allocation5 + $0xe00] ss:$1272 sps:$4 sm:$0xff]   ;;  %v14354_v61 = vld [vmem:[#allocation5 + $0x1a4] ss:$1272 sps:$4 sm:$0xff]  }
 0x33b   :  { %11105 = vmatprep.subr.bf16.mxu0 %v14311_v63  ;;  %7975 = vmatprep.mubr.bf16.mxu1 %v1979_v0  ;;  %v14357_v62 = vld [vmem:[#allocation5 + $0x41c] ss:$1272 sps:$4 sm:$0xff]   ;;  %v662_v63 = vrot.slane %v79_v58, %v14868_v9  ;;  %v1332_v0 = vrot.slane %v1318_v57, %v14868_v9 }
 0x33c   :  { %11135 = vmatprep.mubr.bf16.mxu0 %v2137_v1 }
 0x33d   :  { %v670_v1 = vcombine.high %v662_v63, %v662_v63  ;;  %v1334_v2 = vcombine.high %v1332_v0, %v1332_v0  ;;  %v1986_v22 = vpack.c.bf16 %v662_v63, %v662_v63  ;;  %v14402_v63 = vld [vmem:[#allocation5 + $0xe24] ss:$1272 sps:$4 sm:$0xff]  }
 0x33f   :  { %v1987_v10 = vpack.c.bf16 %v670_v1, %v670_v1  ;;  %v2145_v11 = vpack.c.bf16 %v1334_v2, %v1334_v2 }
 0x341   :  { %7946 = vmatpush1.bf16.xpose.msra.mxu1 %v14306_v4  ;;  %v2142_v4 = vpack.c.bf16 %v1325_v46, %v1325_v46 }
 0x342   :  { %11106 = vmatpush1.bf16.xpose.msra.mxu0 %v14309_v5  ;;  %7983 = vmatprep.subr.bf16.mxu1 %v14314_v6  ;;  %v14352_v5 = vld [vmem:[#allocation5 + $0x1a0] ss:$1272 sps:$4 sm:$0xff]  }
 0x343   :  { %11143 = vmatprep.subr.bf16.mxu0 %v14318_v7  ;;  %v14355_v6 = vld [vmem:[#allocation5 + $0x418] ss:$1272 sps:$4 sm:$0xff]   ;;  %v14360_v7 = vld [vmem:[#allocation5 + $0xb94] ss:$1272 sps:$4 sm:$0xff]  }
 0x348   :  { %7976 = vmatmul.mubr.bf16.vlgmr.msra.gmra.mrb[0].mxu1 %v1978_v13  ;;  %v119_v13 = vld [vmem:[#allocation2 + $0x210] sm:$0xff] }
 0x349   :  { %11136 = vmatmul.mubr.bf16.vlgmr.msra.gmra.mrb[0].mxu0 %v2136_v14  ;;  %7984 = vmatpush1.bf16.xpose.msra.mxu1 %v14312_v15  ;;  %v14358_v14 = vld [vmem:[#allocation5 + $0xb90] ss:$1272 sps:$4 sm:$0xff]   ;;  %v1335_v30 = vcombine.high %v119_v13, %v119_v13 }
 0x34a   :  { %11144 = vmatpush1.bf16.xpose.msra.mxu0 %v14316_v16  ;;  %7985 = vmatprep.subr.bf16.mxu1 %v14321_v17  ;;  %v14361_v15 = vld [vmem:[#allocation5 + $0xe08] ss:$1272 sps:$4 sm:$0xff]   ;;  %v14366_v16 = vld [vmem:[#allocation5 + $0x1ac] ss:$1272 sps:$4 sm:$0xff]  }
 0x34b   :  { %11145 = vmatprep.subr.bf16.mxu0 %v14324_v18  ;;  %8015 = vmatprep.mubr.bf16.mxu1 %v1981_v19  ;;  %v14370_v17 = vld [vmem:[#allocation5 + $0x424] ss:$1272 sps:$4 sm:$0xff]   ;;  %v669_v18 = vrot.slane %v655_v12, %v14868_v9  ;;  %v1342_v19 = vrot.slane %v119_v13, %v14868_v9 }
 0x34c   :  { %11175 = vmatprep.mubr.bf16.mxu0 %v2139_v20 }
 0x34d   :  { %v671_v20 = vcombine.high %v669_v18, %v669_v18  ;;  %v1350_v21 = vcombine.high %v1342_v19, %v1342_v19  ;;  %v1988_v40 = vpack.c.bf16 %v669_v18, %v669_v18  ;;  %v14415_v18 = vld [vmem:[#allocation5 + $0xe2c] ss:$1272 sps:$4 sm:$0xff]  }
 0x34f   :  { %v1989_v28 = vpack.c.bf16 %v671_v20, %v671_v20  ;;  %v2147_v29 = vpack.c.bf16 %v1350_v21, %v1350_v21 }
 0x351   :  { %7986 = vmatpush1.bf16.xpose.msra.mxu1 %v14319_v23  ;;  %v2144_v23 = vpack.c.bf16 %v1332_v0, %v1332_v0 }
 0x352   :  { %11146 = vmatpush1.bf16.xpose.msra.mxu0 %v14322_v24  ;;  %8023 = vmatprep.subr.bf16.mxu1 %v14328_v25  ;;  %v14364_v24 = vld [vmem:[#allocation5 + $0x1a8] ss:$1272 sps:$4 sm:$0xff]  }
 0x353   :  { %11183 = vmatprep.subr.bf16.mxu0 %v14331_v26  ;;  %v14368_v25 = vld [vmem:[#allocation5 + $0x420] ss:$1272 sps:$4 sm:$0xff]   ;;  %v14373_v26 = vld [vmem:[#allocation5 + $0xb9c] ss:$1272 sps:$4 sm:$0xff]  }
 0x358   :  { %8016 = vmatmul.mubr.bf16.vlgmr.msra.gmra.mrb[0].mxu1 %v1980_v31  ;;  %v80_v31 = vld [vmem:[#allocation2 + $0xd8] sm:$0xff] }
 0x359   :  { %11176 = vmatmul.mubr.bf16.vlgmr.msra.gmra.mrb[0].mxu0 %v2138_v32  ;;  %8024 = vmatpush1.bf16.xpose.msra.mxu1 %v14326_v33  ;;  %v14371_v32 = vld [vmem:[#allocation5 + $0xb98] ss:$1272 sps:$4 sm:$0xff]   ;;  %v672_v48 = vcombine.high %v80_v31, %v80_v31 }
 0x35a   :  { %11184 = vmatpush1.bf16.xpose.msra.mxu0 %v14329_v34  ;;  %8025 = vmatprep.subr.bf16.mxu1 %v14334_v35  ;;  %v14374_v33 = vld [vmem:[#allocation5 + $0xe10] ss:$1272 sps:$4 sm:$0xff]   ;;  %v14380_v34 = vld [vmem:[#allocation5 + $0x1b4] ss:$1272 sps:$4 sm:$0xff]  }
 0x35b   :  { %11185 = vmatprep.subr.bf16.mxu0 %v14337_v36  ;;  %8055 = vmatprep.mubr.bf16.mxu1 %v1983_v37  ;;  %v14383_v35 = vld [vmem:[#allocation5 + $0x42c] ss:$1272 sps:$4 sm:$0xff]   ;;  %v679_v36 = vrot.slane %v80_v31, %v14868_v9  ;;  %v1349_v37 = vrot.slane %v1335_v30, %v14868_v9 }
 0x35c   :  { %11215 = vmatprep.mubr.bf16.mxu0 %v2141_v38 }
 0x35d   :  { %v687_v38 = vcombine.high %v679_v36, %v679_v36  ;;  %v1351_v39 = vcombine.high %v1349_v37, %v1349_v37  ;;  %v1990_v58 = vpack.c.bf16 %v679_v36, %v679_v36  ;;  %v14428_v36 = vld [vmem:[#allocation5 + $0xe34] ss:$1272 sps:$4 sm:$0xff]  }
 0x35f   :  { %v1991_v46 = vpack.c.bf16 %v687_v38, %v687_v38  ;;  %v2149_v47 = vpack.c.bf16 %v1351_v39, %v1351_v39 }
 0x361   :  { %8026 = vmatpush1.bf16.xpose.msra.mxu1 %v14332_v41  ;;  %v2146_v41 = vpack.c.bf16 %v1342_v19, %v1342_v19 }
 0x362   :  { %11186 = vmatpush1.bf16.xpose.msra.mxu0 %v14335_v42  ;;  %8063 = vmatprep.subr.bf16.mxu1 %v14340_v43  ;;  %v14378_v42 = vld [vmem:[#allocation5 + $0x1b0] ss:$1272 sps:$4 sm:$0xff]  }
 0x363   :  { %11223 = vmatprep.subr.bf16.mxu0 %v14344_v44  ;;  %v14381_v43 = vld [vmem:[#allocation5 + $0x428] ss:$1272 sps:$4 sm:$0xff]   ;;  %v14386_v44 = vld [vmem:[#allocation5 + $0xba4] ss:$1272 sps:$4 sm:$0xff]  }
 0x368   :  { %8056 = vmatmul.mubr.bf16.vlgmr.msra.gmra.mrb[0].mxu1 %v1982_v49  ;;  %v120_v49 = vld [vmem:[#allocation2 + $0x218] sm:$0xff] }
 0x369   :  { %11216 = vmatmul.mubr.bf16.vlgmr.msra.gmra.mrb[0].mxu0 %v2140_v50  ;;  %8064 = vmatpush1.bf16.xpose.msra.mxu1 %v14338_v51  ;;  %v14384_v50 = vld [vmem:[#allocation5 + $0xba0] ss:$1272 sps:$4 sm:$0xff]   ;;  %v1352_v2 = vcombine.high %v120_v49, %v120_v49 }
 0x36a   :  { %11224 = vmatpush1.bf16.xpose.msra.mxu0 %v14342_v52  ;;  %8065 = vmatprep.subr.bf16.mxu1 %v14347_v53  ;;  %v14387_v51 = vld [vmem:[#allocation5 + $0xe18] ss:$1272 sps:$4 sm:$0xff]   ;;  %v14392_v52 = vld [vmem:[#allocation5 + $0x1bc] ss:$1272 sps:$4 sm:$0xff]  }
 0x36b   :  { %11225 = vmatprep.subr.bf16.mxu0 %v14350_v54  ;;  %8095 = vmatprep.mubr.bf16.mxu1 %v1985_v55  ;;  %v14396_v53 = vld [vmem:[#allocation5 + $0x434] ss:$1272 sps:$4 sm:$0xff]   ;;  %v686_v54 = vrot.slane %v672_v48, %v14868_v9  ;;  %v1359_v55 = vrot.slane %v120_v49, %v14868_v9 }
 0x36c   :  { %11255 = vmatprep.mubr.bf16.mxu0 %v2143_v56 }
 0x36d   :  { %v688_v56 = vcombine.high %v686_v54, %v686_v54  ;;  %v1367_v57 = vcombine.high %v1359_v55, %v1359_v55  ;;  %v1992_v13 = vpack.c.bf16 %v686_v54, %v686_v54  ;;  %v14441_v54 = vld [vmem:[#allocation5 + $0xe3c] ss:$1272 sps:$4 sm:$0xff]  }
 0x36f   :  { %v1993_v0 = vpack.c.bf16 %v688_v56, %v688_v56  ;;  %v2151_v1 = vpack.c.bf16 %v1367_v57, %v1367_v57 }
 0x371   :  { %8066 = vmatpush1.bf16.xpose.msra.mxu1 %v14345_v59  ;;  %v2148_v59 = vpack.c.bf16 %v1349_v37, %v1349_v37 }
 0x372   :  { %11226 = vmatpush1.bf16.xpose.msra.mxu0 %v14348_v60  ;;  %8103 = vmatprep.subr.bf16.mxu1 %v14354_v61  ;;  %v14390_v60 = vld [vmem:[#allocation5 + $0x1b8] ss:$1272 sps:$4 sm:$0xff]  }
 0x373   :  { %11263 = vmatprep.subr.bf16.mxu0 %v14357_v62  ;;  %v14394_v61 = vld [vmem:[#allocation5 + $0x430] ss:$1272 sps:$4 sm:$0xff]   ;;  %v14399_v62 = vld [vmem:[#allocation5 + $0xbac] ss:$1272 sps:$4 sm:$0xff]  }
 0x378   :  { %8096 = vmatmul.mubr.bf16.vlgmr.msra.gmra.mrb[0].mxu1 %v1984_v3  ;;  %v81_v3 = vld [vmem:[#allocation2 + $0xe0] sm:$0xff] }
 0x379   :  { %11256 = vmatmul.mubr.bf16.vlgmr.msra.gmra.mrb[0].mxu0 %v2142_v4  ;;  %8104 = vmatpush1.bf16.xpose.msra.mxu1 %v14352_v5  ;;  %v14397_v4 = vld [vmem:[#allocation5 + $0xba8] ss:$1272 sps:$4 sm:$0xff]   ;;  %v689_v21 = vcombine.high %v81_v3, %v81_v3 }
 0x37a   :  { %11264 = vmatpush1.bf16.xpose.msra.mxu0 %v14355_v6  ;;  %8105 = vmatprep.subr.bf16.mxu1 %v14360_v7  ;;  %v14400_v5 = vld [vmem:[#allocation5 + $0xe20] ss:$1272 sps:$4 sm:$0xff]   ;;  %v14406_v6 = vld [vmem:[#allocation5 + $0x1c4] ss:$1272 sps:$4 sm:$0xff]  }
 0x37b   :  { %11265 = vmatprep.subr.bf16.mxu0 %v14363_v8  ;;  %8135 = vmatprep.mubr.bf16.mxu1 %v1987_v10  ;;  %v14409_v7 = vld [vmem:[#allocation5 + $0x43c] ss:$1272 sps:$4 sm:$0xff]   ;;  %v696_v8 = vrot.slane %v81_v3, %v14868_v9  ;;  %v1366_v10 = vrot.slane %v1352_v2, %v14868_v9 }
 0x37c   :  { %11295 = vmatprep.mubr.bf16.mxu0 %v2145_v11 }
 0x37d   :  { %v704_v11 = vcombine.high %v696_v8, %v696_v8  ;;  %v1368_v12 = vcombine.high %v1366_v10, %v1366_v10  ;;  %v1994_v31 = vpack.c.bf16 %v696_v8, %v696_v8  ;;  %v14454_v8 = vld [vmem:[#allocation5 + $0xe44] ss:$1272 sps:$4 sm:$0xff]  }
 0x37f   :  { %v1995_v19 = vpack.c.bf16 %v704_v11, %v704_v11  ;;  %v2153_v20 = vpack.c.bf16 %v1368_v12, %v1368_v12 }
 0x381   :  { %8106 = vmatpush1.bf16.xpose.msra.mxu1 %v14358_v14  ;;  %v2150_v14 = vpack.c.bf16 %v1359_v55, %v1359_v55 }
 0x382   :  { %11266 = vmatpush1.bf16.xpose.msra.mxu0 %v14361_v15  ;;  %8143 = vmatprep.subr.bf16.mxu1 %v14366_v16  ;;  %v14404_v15 = vld [vmem:[#allocation5 + $0x1c0] ss:$1272 sps:$4 sm:$0xff]  }
 0x383   :  { %11303 = vmatprep.subr.bf16.mxu0 %v14370_v17  ;;  %v14407_v16 = vld [vmem:[#allocation5 + $0x438] ss:$1272 sps:$4 sm:$0xff]   ;;  %v14412_v17 = vld [vmem:[#allocation5 + $0xbb4] ss:$1272 sps:$4 sm:$0xff]  }
 0x388   :  { %8136 = vmatmul.mubr.bf16.vlgmr.msra.gmra.mrb[0].mxu1 %v1986_v22  ;;  %v121_v22 = vld [vmem:[#allocation2 + $0x220] sm:$0xff] }
 0x389   :  { %11296 = vmatmul.mubr.bf16.vlgmr.msra.gmra.mrb[0].mxu0 %v2144_v23  ;;  %8144 = vmatpush1.bf16.xpose.msra.mxu1 %v14364_v24  ;;  %v14410_v23 = vld [vmem:[#allocation5 + $0xbb0] ss:$1272 sps:$4 sm:$0xff]   ;;  %v1369_v39 = vcombine.high %v121_v22, %v121_v22 }
 0x38a   :  { %11304 = vmatpush1.bf16.xpose.msra.mxu0 %v14368_v25  ;;  %8145 = vmatprep.subr.bf16.mxu1 %v14373_v26  ;;  %v14413_v24 = vld [vmem:[#allocation5 + $0xe28] ss:$1272 sps:$4 sm:$0xff]   ;;  %v14418_v25 = vld [vmem:[#allocation5 + $0x1cc] ss:$1272 sps:$4 sm:$0xff]  }
 0x38b   :  { %11305 = vmatprep.subr.bf16.mxu0 %v14376_v27  ;;  %8175 = vmatprep.mubr.bf16.mxu1 %v1989_v28  ;;  %v14422_v26 = vld [vmem:[#allocation5 + $0x444] ss:$1272 sps:$4 sm:$0xff]   ;;  %v703_v27 = vrot.slane %v689_v21, %v14868_v9  ;;  %v1376_v28 = vrot.slane %v121_v22, %v14868_v9 }
 0x38c   :  { %11335 = vmatprep.mubr.bf16.mxu0 %v2147_v29 }
 0x38d   :  { %v705_v29 = vcombine.high %v703_v27, %v703_v27  ;;  %v1384_v30 = vcombine.high %v1376_v28, %v1376_v28  ;;  %v1996_v49 = vpack.c.bf16 %v703_v27, %v703_v27  ;;  %v14467_v27 = vld [vmem:[#allocation5 + $0xe4c] ss:$1272 sps:$4 sm:$0xff]  }
 0x38f   :  { %v1997_v37 = vpack.c.bf16 %v705_v29, %v705_v29  ;;  %v2155_v38 = vpack.c.bf16 %v1384_v30, %v1384_v30 }
 0x391   :  { %8146 = vmatpush1.bf16.xpose.msra.mxu1 %v14371_v32  ;;  %v2152_v32 = vpack.c.bf16 %v1366_v10, %v1366_v10 }
 0x392   :  { %11306 = vmatpush1.bf16.xpose.msra.mxu0 %v14374_v33  ;;  %8183 = vmatprep.subr.bf16.mxu1 %v14380_v34  ;;  %v14416_v33 = vld [vmem:[#allocation5 + $0x1c8] ss:$1272 sps:$4 sm:$0xff]  }
 0x393   :  { %11343 = vmatprep.subr.bf16.mxu0 %v14383_v35  ;;  %v14420_v34 = vld [vmem:[#allocation5 + $0x440] ss:$1272 sps:$4 sm:$0xff]   ;;  %v14425_v35 = vld [vmem:[#allocation5 + $0xbbc] ss:$1272 sps:$4 sm:$0xff]  }
 0x398   :  { %8176 = vmatmul.mubr.bf16.vlgmr.msra.gmra.mrb[0].mxu1 %v1988_v40  ;;  %v82_v40 = vld [vmem:[#allocation2 + $0xe8] sm:$0xff] }
 0x399   :  { %11336 = vmatmul.mubr.bf16.vlgmr.msra.gmra.mrb[0].mxu0 %v2146_v41  ;;  %8184 = vmatpush1.bf16.xpose.msra.mxu1 %v14378_v42  ;;  %v14423_v41 = vld [vmem:[#allocation5 + $0xbb8] ss:$1272 sps:$4 sm:$0xff]   ;;  %v706_v57 = vcombine.high %v82_v40, %v82_v40 }
 0x39a   :  { %11344 = vmatpush1.bf16.xpose.msra.mxu0 %v14381_v43  ;;  %8185 = vmatprep.subr.bf16.mxu1 %v14386_v44  ;;  %v14426_v42 = vld [vmem:[#allocation5 + $0xe30] ss:$1272 sps:$4 sm:$0xff]   ;;  %v14432_v43 = vld [vmem:[#allocation5 + $0x1d4] ss:$1272 sps:$4 sm:$0xff]  }
 0x39b   :  { %11345 = vmatprep.subr.bf16.mxu0 %v14389_v45  ;;  %8215 = vmatprep.mubr.bf16.mxu1 %v1991_v46  ;;  %v14435_v44 = vld [vmem:[#allocation5 + $0x44c] ss:$1272 sps:$4 sm:$0xff]   ;;  %v713_v45 = vrot.slane %v82_v40, %v14868_v9  ;;  %v1383_v46 = vrot.slane %v1369_v39, %v14868_v9 }
 0x39c   :  { %11375 = vmatprep.mubr.bf16.mxu0 %v2149_v47 }
 0x39d   :  { %v721_v47 = vcombine.high %v713_v45, %v713_v45  ;;  %v1385_v48 = vcombine.high %v1383_v46, %v1383_v46  ;;  %v1998_v3 = vpack.c.bf16 %v713_v45, %v713_v45  ;;  %v14480_v45 = vld [vmem:[#allocation5 + $0xe54] ss:$1272 sps:$4 sm:$0xff]  }
 0x39f   :  { %v1999_v55 = vpack.c.bf16 %v721_v47, %v721_v47  ;;  %v2157_v56 = vpack.c.bf16 %v1385_v48, %v1385_v48 }
 0x3a1   :  { %8186 = vmatpush1.bf16.xpose.msra.mxu1 %v14384_v50  ;;  %v2154_v50 = vpack.c.bf16 %v1376_v28, %v1376_v28 }
 0x3a2   :  { %11346 = vmatpush1.bf16.xpose.msra.mxu0 %v14387_v51  ;;  %8223 = vmatprep.subr.bf16.mxu1 %v14392_v52  ;;  %v14430_v51 = vld [vmem:[#allocation5 + $0x1d0] ss:$1272 sps:$4 sm:$0xff]  }
 0x3a3   :  { %11383 = vmatprep.subr.bf16.mxu0 %v14396_v53  ;;  %v14433_v52 = vld [vmem:[#allocation5 + $0x448] ss:$1272 sps:$4 sm:$0xff]   ;;  %v14438_v53 = vld [vmem:[#allocation5 + $0xbc4] ss:$1272 sps:$4 sm:$0xff]  }
 0x3a8   :  { %8216 = vmatmul.mubr.bf16.vlgmr.msra.gmra.mrb[0].mxu1 %v1990_v58  ;;  %v122_v58 = vld [vmem:[#allocation2 + $0x228] sm:$0xff] }
 0x3a9   :  { %11376 = vmatmul.mubr.bf16.vlgmr.msra.gmra.mrb[0].mxu0 %v2148_v59  ;;  %8224 = vmatpush1.bf16.xpose.msra.mxu1 %v14390_v60  ;;  %v14436_v59 = vld [vmem:[#allocation5 + $0xbc0] ss:$1272 sps:$4 sm:$0xff]   ;;  %v1386_v12 = vcombine.high %v122_v58, %v122_v58 }
 0x3aa   :  { %11384 = vmatpush1.bf16.xpose.msra.mxu0 %v14394_v61  ;;  %8225 = vmatprep.subr.bf16.mxu1 %v14399_v62  ;;  %v14439_v60 = vld [vmem:[#allocation5 + $0xe38] ss:$1272 sps:$4 sm:$0xff]   ;;  %v14444_v61 = vld [vmem:[#allocation5 + $0x1dc] ss:$1272 sps:$4 sm:$0xff]  }
 0x3ab   :  { %11385 = vmatprep.subr.bf16.mxu0 %v14402_v63  ;;  %8255 = vmatprep.mubr.bf16.mxu1 %v1993_v0  ;;  %v14448_v62 = vld [vmem:[#allocation5 + $0x454] ss:$1272 sps:$4 sm:$0xff]   ;;  %v720_v63 = vrot.slane %v706_v57, %v14868_v9  ;;  %v1393_v0 = vrot.slane %v122_v58, %v14868_v9 }
 0x3ac   :  { %11415 = vmatprep.mubr.bf16.mxu0 %v2151_v1 }
 0x3ad   :  { %v722_v1 = vcombine.high %v720_v63, %v720_v63  ;;  %v1401_v2 = vcombine.high %v1393_v0, %v1393_v0  ;;  %v2000_v22 = vpack.c.bf16 %v720_v63, %v720_v63  ;;  %v14493_v63 = vld [vmem:[#allocation5 + $0xe5c] ss:$1272 sps:$4 sm:$0xff]  }
 0x3af   :  { %v2001_v10 = vpack.c.bf16 %v722_v1, %v722_v1  ;;  %v2159_v11 = vpack.c.bf16 %v1401_v2, %v1401_v2 }
 0x3b1   :  { %8226 = vmatpush1.bf16.xpose.msra.mxu1 %v14397_v4  ;;  %v2156_v4 = vpack.c.bf16 %v1383_v46, %v1383_v46 }
 0x3b2   :  { %11386 = vmatpush1.bf16.xpose.msra.mxu0 %v14400_v5  ;;  %8263 = vmatprep.subr.bf16.mxu1 %v14406_v6  ;;  %v14442_v5 = vld [vmem:[#allocation5 + $0x1d8] ss:$1272 sps:$4 sm:$0xff]  }
 0x3b3   :  { %11423 = vmatprep.subr.bf16.mxu0 %v14409_v7  ;;  %v14446_v6 = vld [vmem:[#allocation5 + $0x450] ss:$1272 sps:$4 sm:$0xff]   ;;  %v14451_v7 = vld [vmem:[#allocation5 + $0xbcc] ss:$1272 sps:$4 sm:$0xff]  }
 0x3b8   :  { %8256 = vmatmul.mubr.bf16.vlgmr.msra.gmra.mrb[0].mxu1 %v1992_v13  ;;  %v83_v13 = vld [vmem:[#allocation2 + $0xf0] sm:$0xff] }
 0x3b9   :  { %11416 = vmatmul.mubr.bf16.vlgmr.msra.gmra.mrb[0].mxu0 %v2150_v14  ;;  %8264 = vmatpush1.bf16.xpose.msra.mxu1 %v14404_v15  ;;  %v14449_v14 = vld [vmem:[#allocation5 + $0xbc8] ss:$1272 sps:$4 sm:$0xff]   ;;  %v723_v30 = vcombine.high %v83_v13, %v83_v13 }
 0x3ba   :  { %11424 = vmatpush1.bf16.xpose.msra.mxu0 %v14407_v16  ;;  %8265 = vmatprep.subr.bf16.mxu1 %v14412_v17  ;;  %v14452_v15 = vld [vmem:[#allocation5 + $0xe40] ss:$1272 sps:$4 sm:$0xff]   ;;  %v14458_v16 = vld [vmem:[#allocation5 + $0x1e4] ss:$1272 sps:$4 sm:$0xff]  }
 0x3bb   :  { %11425 = vmatprep.subr.bf16.mxu0 %v14415_v18  ;;  %8295 = vmatprep.mubr.bf16.mxu1 %v1995_v19  ;;  %v14461_v17 = vld [vmem:[#allocation5 + $0x45c] ss:$1272 sps:$4 sm:$0xff]   ;;  %v730_v18 = vrot.slane %v83_v13, %v14868_v9  ;;  %v1400_v19 = vrot.slane %v1386_v12, %v14868_v9 }
 0x3bc   :  { %11455 = vmatprep.mubr.bf16.mxu0 %v2153_v20 }
 0x3bd   :  { %v738_v20 = vcombine.high %v730_v18, %v730_v18  ;;  %v1402_v21 = vcombine.high %v1400_v19, %v1400_v19  ;;  %v2002_v40 = vpack.c.bf16 %v730_v18, %v730_v18  ;;  %v14506_v18 = vld [vmem:[#allocation5 + $0xe64] ss:$1272 sps:$4 sm:$0xff]  }
 0x3bf   :  { %v2003_v28 = vpack.c.bf16 %v738_v20, %v738_v20  ;;  %v2161_v29 = vpack.c.bf16 %v1402_v21, %v1402_v21 }
 0x3c1   :  { %8266 = vmatpush1.bf16.xpose.msra.mxu1 %v14410_v23  ;;  %v2158_v23 = vpack.c.bf16 %v1393_v0, %v1393_v0 }
 0x3c2   :  { %11426 = vmatpush1.bf16.xpose.msra.mxu0 %v14413_v24  ;;  %8303 = vmatprep.subr.bf16.mxu1 %v14418_v25  ;;  %v14456_v24 = vld [vmem:[#allocation5 + $0x1e0] ss:$1272 sps:$4 sm:$0xff]  }
 0x3c3   :  { %11463 = vmatprep.subr.bf16.mxu0 %v14422_v26  ;;  %v14459_v25 = vld [vmem:[#allocation5 + $0x458] ss:$1272 sps:$4 sm:$0xff]   ;;  %v14464_v26 = vld [vmem:[#allocation5 + $0xbd4] ss:$1272 sps:$4 sm:$0xff]  }
 0x3c8   :  { %8296 = vmatmul.mubr.bf16.vlgmr.msra.gmra.mrb[0].mxu1 %v1994_v31  ;;  %v123_v31 = vld [vmem:[#allocation2 + $0x230] sm:$0xff] }
 0x3c9   :  { %11456 = vmatmul.mubr.bf16.vlgmr.msra.gmra.mrb[0].mxu0 %v2152_v32  ;;  %8304 = vmatpush1.bf16.xpose.msra.mxu1 %v14416_v33  ;;  %v14462_v32 = vld [vmem:[#allocation5 + $0xbd0] ss:$1272 sps:$4 sm:$0xff]   ;;  %v1403_v48 = vcombine.high %v123_v31, %v123_v31 }
 0x3ca   :  { %11464 = vmatpush1.bf16.xpose.msra.mxu0 %v14420_v34  ;;  %8305 = vmatprep.subr.bf16.mxu1 %v14425_v35  ;;  %v14465_v33 = vld [vmem:[#allocation5 + $0xe48] ss:$1272 sps:$4 sm:$0xff]   ;;  %v14470_v34 = vld [vmem:[#allocation5 + $0x1ec] ss:$1272 sps:$4 sm:$0xff]  }
 0x3cb   :  { %11465 = vmatprep.subr.bf16.mxu0 %v14428_v36  ;;  %8335 = vmatprep.mubr.bf16.mxu1 %v1997_v37  ;;  %v14474_v35 = vld [vmem:[#allocation5 + $0x464] ss:$1272 sps:$4 sm:$0xff]   ;;  %v737_v36 = vrot.slane %v723_v30, %v14868_v9  ;;  %v1410_v37 = vrot.slane %v123_v31, %v14868_v9 }
 0x3cc   :  { %11495 = vmatprep.mubr.bf16.mxu0 %v2155_v38 }
 0x3cd   :  { %v739_v38 = vcombine.high %v737_v36, %v737_v36  ;;  %v1418_v39 = vcombine.high %v1410_v37, %v1410_v37  ;;  %v2004_v58 = vpack.c.bf16 %v737_v36, %v737_v36  ;;  %v14519_v36 = vld [vmem:[#allocation5 + $0xe6c] ss:$1272 sps:$4 sm:$0xff]  }
 0x3cf   :  { %v2005_v46 = vpack.c.bf16 %v739_v38, %v739_v38  ;;  %v2163_v47 = vpack.c.bf16 %v1418_v39, %v1418_v39 }
 0x3d1   :  { %8306 = vmatpush1.bf16.xpose.msra.mxu1 %v14423_v41  ;;  %v2160_v41 = vpack.c.bf16 %v1400_v19, %v1400_v19 }
 0x3d2   :  { %11466 = vmatpush1.bf16.xpose.msra.mxu0 %v14426_v42  ;;  %8343 = vmatprep.subr.bf16.mxu1 %v14432_v43  ;;  %v14468_v42 = vld [vmem:[#allocation5 + $0x1e8] ss:$1272 sps:$4 sm:$0xff]  }
 0x3d3   :  { %11503 = vmatprep.subr.bf16.mxu0 %v14435_v44  ;;  %v14472_v43 = vld [vmem:[#allocation5 + $0x460] ss:$1272 sps:$4 sm:$0xff]   ;;  %v14477_v44 = vld [vmem:[#allocation5 + $0xbdc] ss:$1272 sps:$4 sm:$0xff]  }
 0x3d8   :  { %8336 = vmatmul.mubr.bf16.vlgmr.msra.gmra.mrb[0].mxu1 %v1996_v49  ;;  %v84_v49 = vld [vmem:[#allocation2 + $0xf8] sm:$0xff] }
 0x3d9   :  { %11496 = vmatmul.mubr.bf16.vlgmr.msra.gmra.mrb[0].mxu0 %v2154_v50  ;;  %8344 = vmatpush1.bf16.xpose.msra.mxu1 %v14430_v51  ;;  %v14475_v50 = vld [vmem:[#allocation5 + $0xbd8] ss:$1272 sps:$4 sm:$0xff]   ;;  %v740_v2 = vcombine.high %v84_v49, %v84_v49 }
 0x3da   :  { %11504 = vmatpush1.bf16.xpose.msra.mxu0 %v14433_v52  ;;  %8345 = vmatprep.subr.bf16.mxu1 %v14438_v53  ;;  %v14478_v51 = vld [vmem:[#allocation5 + $0xe50] ss:$1272 sps:$4 sm:$0xff]   ;;  %v14484_v52 = vld [vmem:[#allocation5 + $0x1f4] ss:$1272 sps:$4 sm:$0xff]  }
 0x3db   :  { %11505 = vmatprep.subr.bf16.mxu0 %v14441_v54  ;;  %8375 = vmatprep.mubr.bf16.mxu1 %v1999_v55  ;;  %v14487_v53 = vld [vmem:[#allocation5 + $0x46c] ss:$1272 sps:$4 sm:$0xff]   ;;  %v747_v54 = vrot.slane %v84_v49, %v14868_v9  ;;  %v1417_v55 = vrot.slane %v1403_v48, %v14868_v9 }
 0x3dc   :  { %11535 = vmatprep.mubr.bf16.mxu0 %v2157_v56 }
 0x3dd   :  { %v755_v56 = vcombine.high %v747_v54, %v747_v54  ;;  %v1419_v57 = vcombine.high %v1417_v55, %v1417_v55  ;;  %v2006_v13 = vpack.c.bf16 %v747_v54, %v747_v54  ;;  %v14532_v54 = vld [vmem:[#allocation5 + $0xe74] ss:$1272 sps:$4 sm:$0xff]  }
 0x3df   :  { %v2007_v0 = vpack.c.bf16 %v755_v56, %v755_v56  ;;  %v2165_v1 = vpack.c.bf16 %v1419_v57, %v1419_v57 }
 0x3e1   :  { %8346 = vmatpush1.bf16.xpose.msra.mxu1 %v14436_v59  ;;  %v2162_v59 = vpack.c.bf16 %v1410_v37, %v1410_v37 }
 0x3e2   :  { %11506 = vmatpush1.bf16.xpose.msra.mxu0 %v14439_v60  ;;  %8383 = vmatprep.subr.bf16.mxu1 %v14444_v61  ;;  %v14482_v60 = vld [vmem:[#allocation5 + $0x1f0] ss:$1272 sps:$4 sm:$0xff]  }
 0x3e3   :  { %11543 = vmatprep.subr.bf16.mxu0 %v14448_v62  ;;  %v14485_v61 = vld [vmem:[#allocation5 + $0x468] ss:$1272 sps:$4 sm:$0xff]   ;;  %v14490_v62 = vld [vmem:[#allocation5 + $0xbe4] ss:$1272 sps:$4 sm:$0xff]  }
 0x3e8   :  { %8376 = vmatmul.mubr.bf16.vlgmr.msra.gmra.mrb[0].mxu1 %v1998_v3  ;;  %v124_v3 = vld [vmem:[#allocation2 + $0x238] sm:$0xff] }
 0x3e9   :  { %11536 = vmatmul.mubr.bf16.vlgmr.msra.gmra.mrb[0].mxu0 %v2156_v4  ;;  %8384 = vmatpush1.bf16.xpose.msra.mxu1 %v14442_v5  ;;  %v14488_v4 = vld [vmem:[#allocation5 + $0xbe0] ss:$1272 sps:$4 sm:$0xff]   ;;  %v1420_v21 = vcombine.high %v124_v3, %v124_v3 }
 0x3ea   :  { %11544 = vmatpush1.bf16.xpose.msra.mxu0 %v14446_v6  ;;  %8385 = vmatprep.subr.bf16.mxu1 %v14451_v7  ;;  %v14491_v5 = vld [vmem:[#allocation5 + $0xe58] ss:$1272 sps:$4 sm:$0xff]   ;;  %v14496_v6 = vld [vmem:[#allocation5 + $0x1fc] ss:$1272 sps:$4 sm:$0xff]  }
 0x3eb   :  { %11545 = vmatprep.subr.bf16.mxu0 %v14454_v8  ;;  %8415 = vmatprep.mubr.bf16.mxu1 %v2001_v10  ;;  %v14500_v7 = vld [vmem:[#allocation5 + $0x474] ss:$1272 sps:$4 sm:$0xff]   ;;  %v754_v8 = vrot.slane %v740_v2, %v14868_v9  ;;  %v1427_v10 = vrot.slane %v124_v3, %v14868_v9 }
 0x3ec   :  { %11575 = vmatprep.mubr.bf16.mxu0 %v2159_v11 }
 0x3ed   :  { %v756_v11 = vcombine.high %v754_v8, %v754_v8  ;;  %v1435_v12 = vcombine.high %v1427_v10, %v1427_v10  ;;  %v2008_v31 = vpack.c.bf16 %v754_v8, %v754_v8  ;;  %v14545_v8 = vld [vmem:[#allocation5 + $0xe7c] ss:$1272 sps:$4 sm:$0xff]  }
 0x3ef   :  { %v2009_v19 = vpack.c.bf16 %v756_v11, %v756_v11  ;;  %v2167_v20 = vpack.c.bf16 %v1435_v12, %v1435_v12 }
 0x3f1   :  { %8386 = vmatpush1.bf16.xpose.msra.mxu1 %v14449_v14  ;;  %v2164_v14 = vpack.c.bf16 %v1417_v55, %v1417_v55 }
 0x3f2   :  { %11546 = vmatpush1.bf16.xpose.msra.mxu0 %v14452_v15  ;;  %8423 = vmatprep.subr.bf16.mxu1 %v14458_v16  ;;  %v14494_v15 = vld [vmem:[#allocation5 + $0x1f8] ss:$1272 sps:$4 sm:$0xff]  }
 0x3f3   :  { %11583 = vmatprep.subr.bf16.mxu0 %v14461_v17  ;;  %v14498_v16 = vld [vmem:[#allocation5 + $0x470] ss:$1272 sps:$4 sm:$0xff]   ;;  %v14503_v17 = vld [vmem:[#allocation5 + $0xbec] ss:$1272 sps:$4 sm:$0xff]  }
 0x3f8   :  { %8416 = vmatmul.mubr.bf16.vlgmr.msra.gmra.mrb[0].mxu1 %v2000_v22  ;;  %v85_v22 = vld [vmem:[#allocation2 + $0x100] sm:$0xff] }
 0x3f9   :  { %11576 = vmatmul.mubr.bf16.vlgmr.msra.gmra.mrb[0].mxu0 %v2158_v23  ;;  %8424 = vmatpush1.bf16.xpose.msra.mxu1 %v14456_v24  ;;  %v14501_v23 = vld [vmem:[#allocation5 + $0xbe8] ss:$1272 sps:$4 sm:$0xff]   ;;  %v757_v39 = vcombine.high %v85_v22, %v85_v22 }
 0x3fa   :  { %11584 = vmatpush1.bf16.xpose.msra.mxu0 %v14459_v25  ;;  %8425 = vmatprep.subr.bf16.mxu1 %v14464_v26  ;;  %v14504_v24 = vld [vmem:[#allocation5 + $0xe60] ss:$1272 sps:$4 sm:$0xff]   ;;  %v14510_v25 = vld [vmem:[#allocation5 + $0x204] ss:$1272 sps:$4 sm:$0xff]  }
 0x3fb   :  { %11585 = vmatprep.subr.bf16.mxu0 %v14467_v27  ;;  %8455 = vmatprep.mubr.bf16.mxu1 %v2003_v28  ;;  %v14513_v26 = vld [vmem:[#allocation5 + $0x47c] ss:$1272 sps:$4 sm:$0xff]   ;;  %v764_v27 = vrot.slane %v85_v22, %v14868_v9  ;;  %v1434_v28 = vrot.slane %v1420_v21, %v14868_v9 }
 0x3fc   :  { %11615 = vmatprep.mubr.bf16.mxu0 %v2161_v29 }
 0x3fd   :  { %v772_v29 = vcombine.high %v764_v27, %v764_v27  ;;  %v1436_v30 = vcombine.high %v1434_v28, %v1434_v28  ;;  %v2010_v49 = vpack.c.bf16 %v764_v27, %v764_v27  ;;  %v14558_v27 = vld [vmem:[#allocation5 + $0xe84] ss:$1272 sps:$4 sm:$0xff]  }
 0x3ff   :  { %v2011_v37 = vpack.c.bf16 %v772_v29, %v772_v29  ;;  %v2169_v38 = vpack.c.bf16 %v1436_v30, %v1436_v30 }
 0x401   :  { %8426 = vmatpush1.bf16.xpose.msra.mxu1 %v14462_v32  ;;  %v2166_v32 = vpack.c.bf16 %v1427_v10, %v1427_v10 }
 0x402   :  { %11586 = vmatpush1.bf16.xpose.msra.mxu0 %v14465_v33  ;;  %8463 = vmatprep.subr.bf16.mxu1 %v14470_v34  ;;  %v14508_v33 = vld [vmem:[#allocation5 + $0x200] ss:$1272 sps:$4 sm:$0xff]  }
 0x403   :  { %11623 = vmatprep.subr.bf16.mxu0 %v14474_v35  ;;  %v14511_v34 = vld [vmem:[#allocation5 + $0x478] ss:$1272 sps:$4 sm:$0xff]   ;;  %v14516_v35 = vld [vmem:[#allocation5 + $0xbf4] ss:$1272 sps:$4 sm:$0xff]  }
 0x408   :  { %8456 = vmatmul.mubr.bf16.vlgmr.msra.gmra.mrb[0].mxu1 %v2002_v40  ;;  %v125_v40 = vld [vmem:[#allocation2 + $0x240] sm:$0xff] }
 0x409   :  { %11616 = vmatmul.mubr.bf16.vlgmr.msra.gmra.mrb[0].mxu0 %v2160_v41  ;;  %8464 = vmatpush1.bf16.xpose.msra.mxu1 %v14468_v42  ;;  %v14514_v41 = vld [vmem:[#allocation5 + $0xbf0] ss:$1272 sps:$4 sm:$0xff]   ;;  %v1437_v57 = vcombine.high %v125_v40, %v125_v40 }
 0x40a   :  { %11624 = vmatpush1.bf16.xpose.msra.mxu0 %v14472_v43  ;;  %8465 = vmatprep.subr.bf16.mxu1 %v14477_v44  ;;  %v14517_v42 = vld [vmem:[#allocation5 + $0xe68] ss:$1272 sps:$4 sm:$0xff]   ;;  %v14522_v43 = vld [vmem:[#allocation5 + $0x20c] ss:$1272 sps:$4 sm:$0xff]  }
 0x40b   :  { %11625 = vmatprep.subr.bf16.mxu0 %v14480_v45  ;;  %8495 = vmatprep.mubr.bf16.mxu1 %v2005_v46  ;;  %v14526_v44 = vld [vmem:[#allocation5 + $0x484] ss:$1272 sps:$4 sm:$0xff]   ;;  %v771_v45 = vrot.slane %v757_v39, %v14868_v9  ;;  %v1444_v46 = vrot.slane %v125_v40, %v14868_v9 }
 0x40c   :  { %11655 = vmatprep.mubr.bf16.mxu0 %v2163_v47 }
 0x40d   :  { %v773_v47 = vcombine.high %v771_v45, %v771_v45  ;;  %v1452_v48 = vcombine.high %v1444_v46, %v1444_v46  ;;  %v2012_v3 = vpack.c.bf16 %v771_v45, %v771_v45  ;;  %v14571_v45 = vld [vmem:[#allocation5 + $0xe8c] ss:$1272 sps:$4 sm:$0xff]  }
 0x40f   :  { %v2013_v55 = vpack.c.bf16 %v773_v47, %v773_v47  ;;  %v2171_v56 = vpack.c.bf16 %v1452_v48, %v1452_v48 }
 0x411   :  { %8466 = vmatpush1.bf16.xpose.msra.mxu1 %v14475_v50  ;;  %v2168_v50 = vpack.c.bf16 %v1434_v28, %v1434_v28 }
 0x412   :  { %11626 = vmatpush1.bf16.xpose.msra.mxu0 %v14478_v51  ;;  %8503 = vmatprep.subr.bf16.mxu1 %v14484_v52  ;;  %v14520_v51 = vld [vmem:[#allocation5 + $0x208] ss:$1272 sps:$4 sm:$0xff]  }
 0x413   :  { %11663 = vmatprep.subr.bf16.mxu0 %v14487_v53  ;;  %v14524_v52 = vld [vmem:[#allocation5 + $0x480] ss:$1272 sps:$4 sm:$0xff]   ;;  %v14529_v53 = vld [vmem:[#allocation5 + $0xbfc] ss:$1272 sps:$4 sm:$0xff]  }
 0x418   :  { %8496 = vmatmul.mubr.bf16.vlgmr.msra.gmra.mrb[0].mxu1 %v2004_v58  ;;  %v86_v58 = vld [vmem:[#allocation2 + $0x108] sm:$0xff] }
 0x419   :  { %11656 = vmatmul.mubr.bf16.vlgmr.msra.gmra.mrb[0].mxu0 %v2162_v59  ;;  %8504 = vmatpush1.bf16.xpose.msra.mxu1 %v14482_v60  ;;  %v14527_v59 = vld [vmem:[#allocation5 + $0xbf8] ss:$1272 sps:$4 sm:$0xff]   ;;  %v774_v12 = vcombine.high %v86_v58, %v86_v58 }
 0x41a   :  { %11664 = vmatpush1.bf16.xpose.msra.mxu0 %v14485_v61  ;;  %8505 = vmatprep.subr.bf16.mxu1 %v14490_v62  ;;  %v14530_v60 = vld [vmem:[#allocation5 + $0xe70] ss:$1272 sps:$4 sm:$0xff]   ;;  %v14536_v61 = vld [vmem:[#allocation5 + $0x214] ss:$1272 sps:$4 sm:$0xff]  }
 0x41b   :  { %11665 = vmatprep.subr.bf16.mxu0 %v14493_v63  ;;  %8535 = vmatprep.mubr.bf16.mxu1 %v2007_v0  ;;  %v14539_v62 = vld [vmem:[#allocation5 + $0x48c] ss:$1272 sps:$4 sm:$0xff]   ;;  %v781_v63 = vrot.slane %v86_v58, %v14868_v9  ;;  %v1451_v0 = vrot.slane %v1437_v57, %v14868_v9 }
 0x41c   :  { %11695 = vmatprep.mubr.bf16.mxu0 %v2165_v1 }
 0x41d   :  { %v789_v1 = vcombine.high %v781_v63, %v781_v63  ;;  %v1453_v2 = vcombine.high %v1451_v0, %v1451_v0  ;;  %v2014_v22 = vpack.c.bf16 %v781_v63, %v781_v63  ;;  %v14584_v63 = vld [vmem:[#allocation5 + $0xe94] ss:$1272 sps:$4 sm:$0xff]  }
 0x41f   :  { %v2015_v10 = vpack.c.bf16 %v789_v1, %v789_v1  ;;  %v2173_v11 = vpack.c.bf16 %v1453_v2, %v1453_v2 }
 0x421   :  { %8506 = vmatpush1.bf16.xpose.msra.mxu1 %v14488_v4  ;;  %v2170_v4 = vpack.c.bf16 %v1444_v46, %v1444_v46 }
 0x422   :  { %11666 = vmatpush1.bf16.xpose.msra.mxu0 %v14491_v5  ;;  %8543 = vmatprep.subr.bf16.mxu1 %v14496_v6  ;;  %v14534_v5 = vld [vmem:[#allocation5 + $0x210] ss:$1272 sps:$4 sm:$0xff]  }
 0x423   :  { %11703 = vmatprep.subr.bf16.mxu0 %v14500_v7  ;;  %v14537_v6 = vld [vmem:[#allocation5 + $0x488] ss:$1272 sps:$4 sm:$0xff]   ;;  %v14542_v7 = vld [vmem:[#allocation5 + $0xc04] ss:$1272 sps:$4 sm:$0xff]  }
 0x428   :  { %8536 = vmatmul.mubr.bf16.vlgmr.msra.gmra.mrb[0].mxu1 %v2006_v13  ;;  %v126_v13 = vld [vmem:[#allocation2 + $0x248] sm:$0xff] }
 0x429   :  { %11696 = vmatmul.mubr.bf16.vlgmr.msra.gmra.mrb[0].mxu0 %v2164_v14  ;;  %8544 = vmatpush1.bf16.xpose.msra.mxu1 %v14494_v15  ;;  %v14540_v14 = vld [vmem:[#allocation5 + $0xc00] ss:$1272 sps:$4 sm:$0xff]   ;;  %v1454_v30 = vcombine.high %v126_v13, %v126_v13 }
 0x42a   :  { %11704 = vmatpush1.bf16.xpose.msra.mxu0 %v14498_v16  ;;  %8545 = vmatprep.subr.bf16.mxu1 %v14503_v17  ;;  %v14543_v15 = vld [vmem:[#allocation5 + $0xe78] ss:$1272 sps:$4 sm:$0xff]   ;;  %v14548_v16 = vld [vmem:[#allocation5 + $0x21c] ss:$1272 sps:$4 sm:$0xff]  }
 0x42b   :  { %11705 = vmatprep.subr.bf16.mxu0 %v14506_v18  ;;  %8575 = vmatprep.mubr.bf16.mxu1 %v2009_v19  ;;  %v14552_v17 = vld [vmem:[#allocation5 + $0x494] ss:$1272 sps:$4 sm:$0xff]   ;;  %v788_v18 = vrot.slane %v774_v12, %v14868_v9  ;;  %v1461_v19 = vrot.slane %v126_v13, %v14868_v9 }
 0x42c   :  { %11735 = vmatprep.mubr.bf16.mxu0 %v2167_v20 }
 0x42d   :  { %v790_v20 = vcombine.high %v788_v18, %v788_v18  ;;  %v1469_v21 = vcombine.high %v1461_v19, %v1461_v19  ;;  %v2016_v40 = vpack.c.bf16 %v788_v18, %v788_v18  ;;  %v14597_v18 = vld [vmem:[#allocation5 + $0xe9c] ss:$1272 sps:$4 sm:$0xff]  }
 0x42f   :  { %v2017_v28 = vpack.c.bf16 %v790_v20, %v790_v20  ;;  %v2175_v29 = vpack.c.bf16 %v1469_v21, %v1469_v21 }
 0x431   :  { %8546 = vmatpush1.bf16.xpose.msra.mxu1 %v14501_v23  ;;  %v2172_v23 = vpack.c.bf16 %v1451_v0, %v1451_v0 }
 0x432   :  { %11706 = vmatpush1.bf16.xpose.msra.mxu0 %v14504_v24  ;;  %8583 = vmatprep.subr.bf16.mxu1 %v14510_v25  ;;  %v14546_v24 = vld [vmem:[#allocation5 + $0x218] ss:$1272 sps:$4 sm:$0xff]  }
 0x433   :  { %11743 = vmatprep.subr.bf16.mxu0 %v14513_v26  ;;  %v14550_v25 = vld [vmem:[#allocation5 + $0x490] ss:$1272 sps:$4 sm:$0xff]   ;;  %v14555_v26 = vld [vmem:[#allocation5 + $0xc0c] ss:$1272 sps:$4 sm:$0xff]  }
 0x438   :  { %8576 = vmatmul.mubr.bf16.vlgmr.msra.gmra.mrb[0].mxu1 %v2008_v31  ;;  %v87_v31 = vld [vmem:[#allocation2 + $0x110] sm:$0xff] }
 0x439   :  { %11736 = vmatmul.mubr.bf16.vlgmr.msra.gmra.mrb[0].mxu0 %v2166_v32  ;;  %8584 = vmatpush1.bf16.xpose.msra.mxu1 %v14508_v33  ;;  %v14553_v32 = vld [vmem:[#allocation5 + $0xc08] ss:$1272 sps:$4 sm:$0xff]   ;;  %v791_v48 = vcombine.high %v87_v31, %v87_v31 }
 0x43a   :  { %11744 = vmatpush1.bf16.xpose.msra.mxu0 %v14511_v34  ;;  %8585 = vmatprep.subr.bf16.mxu1 %v14516_v35  ;;  %v14556_v33 = vld [vmem:[#allocation5 + $0xe80] ss:$1272 sps:$4 sm:$0xff]   ;;  %v14562_v34 = vld [vmem:[#allocation5 + $0x224] ss:$1272 sps:$4 sm:$0xff]  }
 0x43b   :  { %11745 = vmatprep.subr.bf16.mxu0 %v14519_v36  ;;  %8615 = vmatprep.mubr.bf16.mxu1 %v2011_v37  ;;  %v14565_v35 = vld [vmem:[#allocation5 + $0x49c] ss:$1272 sps:$4 sm:$0xff]   ;;  %v798_v36 = vrot.slane %v87_v31, %v14868_v9  ;;  %v1468_v37 = vrot.slane %v1454_v30, %v14868_v9 }
 0x43c   :  { %11775 = vmatprep.mubr.bf16.mxu0 %v2169_v38 }
 0x43d   :  { %v806_v38 = vcombine.high %v798_v36, %v798_v36  ;;  %v1470_v39 = vcombine.high %v1468_v37, %v1468_v37  ;;  %v2018_v58 = vpack.c.bf16 %v798_v36, %v798_v36  ;;  %v14610_v36 = vld [vmem:[#allocation5 + $0xea4] ss:$1272 sps:$4 sm:$0xff]  }
 0x43f   :  { %v2019_v46 = vpack.c.bf16 %v806_v38, %v806_v38  ;;  %v2177_v47 = vpack.c.bf16 %v1470_v39, %v1470_v39 }
 0x441   :  { %8586 = vmatpush1.bf16.xpose.msra.mxu1 %v14514_v41  ;;  %v2174_v41 = vpack.c.bf16 %v1461_v19, %v1461_v19 }
 0x442   :  { %11746 = vmatpush1.bf16.xpose.msra.mxu0 %v14517_v42  ;;  %8623 = vmatprep.subr.bf16.mxu1 %v14522_v43  ;;  %v14560_v42 = vld [vmem:[#allocation5 + $0x220] ss:$1272 sps:$4 sm:$0xff]  }
 0x443   :  { %11783 = vmatprep.subr.bf16.mxu0 %v14526_v44  ;;  %v14563_v43 = vld [vmem:[#allocation5 + $0x498] ss:$1272 sps:$4 sm:$0xff]   ;;  %v14568_v44 = vld [vmem:[#allocation5 + $0xc14] ss:$1272 sps:$4 sm:$0xff]  }
 0x448   :  { %8616 = vmatmul.mubr.bf16.vlgmr.msra.gmra.mrb[0].mxu1 %v2010_v49  ;;  %v127_v49 = vld [vmem:[#allocation2 + $0x250] sm:$0xff] }
 0x449   :  { %11776 = vmatmul.mubr.bf16.vlgmr.msra.gmra.mrb[0].mxu0 %v2168_v50  ;;  %8624 = vmatpush1.bf16.xpose.msra.mxu1 %v14520_v51  ;;  %v14566_v50 = vld [vmem:[#allocation5 + $0xc10] ss:$1272 sps:$4 sm:$0xff]   ;;  %v1471_v2 = vcombine.high %v127_v49, %v127_v49 }
 0x44a   :  { %11784 = vmatpush1.bf16.xpose.msra.mxu0 %v14524_v52  ;;  %8625 = vmatprep.subr.bf16.mxu1 %v14529_v53  ;;  %v14569_v51 = vld [vmem:[#allocation5 + $0xe88] ss:$1272 sps:$4 sm:$0xff]   ;;  %v14574_v52 = vld [vmem:[#allocation5 + $0x22c] ss:$1272 sps:$4 sm:$0xff]  }
 0x44b   :  { %11785 = vmatprep.subr.bf16.mxu0 %v14532_v54  ;;  %8655 = vmatprep.mubr.bf16.mxu1 %v2013_v55  ;;  %v14578_v53 = vld [vmem:[#allocation5 + $0x4a4] ss:$1272 sps:$4 sm:$0xff]   ;;  %v805_v54 = vrot.slane %v791_v48, %v14868_v9  ;;  %v1478_v55 = vrot.slane %v127_v49, %v14868_v9 }
 0x44c   :  { %11815 = vmatprep.mubr.bf16.mxu0 %v2171_v56 }
 0x44d   :  { %v807_v56 = vcombine.high %v805_v54, %v805_v54  ;;  %v1486_v57 = vcombine.high %v1478_v55, %v1478_v55  ;;  %v2020_v13 = vpack.c.bf16 %v805_v54, %v805_v54  ;;  %v14623_v54 = vld [vmem:[#allocation5 + $0xeac] ss:$1272 sps:$4 sm:$0xff]  }
 0x44f   :  { %v2021_v0 = vpack.c.bf16 %v807_v56, %v807_v56  ;;  %v2179_v1 = vpack.c.bf16 %v1486_v57, %v1486_v57 }
 0x451   :  { %8626 = vmatpush1.bf16.xpose.msra.mxu1 %v14527_v59  ;;  %v2176_v59 = vpack.c.bf16 %v1468_v37, %v1468_v37 }
 0x452   :  { %11786 = vmatpush1.bf16.xpose.msra.mxu0 %v14530_v60  ;;  %8663 = vmatprep.subr.bf16.mxu1 %v14536_v61  ;;  %v14572_v60 = vld [vmem:[#allocation5 + $0x228] ss:$1272 sps:$4 sm:$0xff]  }
 0x453   :  { %11823 = vmatprep.subr.bf16.mxu0 %v14539_v62  ;;  %v14576_v61 = vld [vmem:[#allocation5 + $0x4a0] ss:$1272 sps:$4 sm:$0xff]   ;;  %v14581_v62 = vld [vmem:[#allocation5 + $0xc1c] ss:$1272 sps:$4 sm:$0xff]  }
 0x458   :  { %8656 = vmatmul.mubr.bf16.vlgmr.msra.gmra.mrb[0].mxu1 %v2012_v3  ;;  %v88_v3 = vld [vmem:[#allocation2 + $0x118] sm:$0xff] }
 0x459   :  { %11816 = vmatmul.mubr.bf16.vlgmr.msra.gmra.mrb[0].mxu0 %v2170_v4  ;;  %8664 = vmatpush1.bf16.xpose.msra.mxu1 %v14534_v5  ;;  %v14579_v4 = vld [vmem:[#allocation5 + $0xc18] ss:$1272 sps:$4 sm:$0xff]   ;;  %v808_v21 = vcombine.high %v88_v3, %v88_v3 }
 0x45a   :  { %11824 = vmatpush1.bf16.xpose.msra.mxu0 %v14537_v6  ;;  %8665 = vmatprep.subr.bf16.mxu1 %v14542_v7  ;;  %v14582_v5 = vld [vmem:[#allocation5 + $0xe90] ss:$1272 sps:$4 sm:$0xff]   ;;  %v14588_v6 = vld [vmem:[#allocation5 + $0x234] ss:$1272 sps:$4 sm:$0xff]  }
 0x45b   :  { %11825 = vmatprep.subr.bf16.mxu0 %v14545_v8  ;;  %8695 = vmatprep.mubr.bf16.mxu1 %v2015_v10  ;;  %v14591_v7 = vld [vmem:[#allocation5 + $0x4ac] ss:$1272 sps:$4 sm:$0xff]   ;;  %v815_v8 = vrot.slane %v88_v3, %v14868_v9  ;;  %v1485_v10 = vrot.slane %v1471_v2, %v14868_v9 }
 0x45c   :  { %11855 = vmatprep.mubr.bf16.mxu0 %v2173_v11 }
 0x45d   :  { %v823_v11 = vcombine.high %v815_v8, %v815_v8  ;;  %v1487_v12 = vcombine.high %v1485_v10, %v1485_v10  ;;  %v2022_v31 = vpack.c.bf16 %v815_v8, %v815_v8  ;;  %v14636_v8 = vld [vmem:[#allocation5 + $0xeb4] ss:$1272 sps:$4 sm:$0xff]  }
 0x45f   :  { %v2023_v19 = vpack.c.bf16 %v823_v11, %v823_v11  ;;  %v2181_v20 = vpack.c.bf16 %v1487_v12, %v1487_v12 }
 0x461   :  { %8666 = vmatpush1.bf16.xpose.msra.mxu1 %v14540_v14  ;;  %v2178_v14 = vpack.c.bf16 %v1478_v55, %v1478_v55 }
 0x462   :  { %11826 = vmatpush1.bf16.xpose.msra.mxu0 %v14543_v15  ;;  %8703 = vmatprep.subr.bf16.mxu1 %v14548_v16  ;;  %v14586_v15 = vld [vmem:[#allocation5 + $0x230] ss:$1272 sps:$4 sm:$0xff]  }
 0x463   :  { %11863 = vmatprep.subr.bf16.mxu0 %v14552_v17  ;;  %v14589_v16 = vld [vmem:[#allocation5 + $0x4a8] ss:$1272 sps:$4 sm:$0xff]   ;;  %v14594_v17 = vld [vmem:[#allocation5 + $0xc24] ss:$1272 sps:$4 sm:$0xff]  }
 0x468   :  { %8696 = vmatmul.mubr.bf16.vlgmr.msra.gmra.mrb[0].mxu1 %v2014_v22  ;;  %v128_v22 = vld [vmem:[#allocation2 + $0x258] sm:$0xff] }
 0x469   :  { %11856 = vmatmul.mubr.bf16.vlgmr.msra.gmra.mrb[0].mxu0 %v2172_v23  ;;  %8704 = vmatpush1.bf16.xpose.msra.mxu1 %v14546_v24  ;;  %v14592_v23 = vld [vmem:[#allocation5 + $0xc20] ss:$1272 sps:$4 sm:$0xff]   ;;  %v1488_v39 = vcombine.high %v128_v22, %v128_v22 }
 0x46a   :  { %11864 = vmatpush1.bf16.xpose.msra.mxu0 %v14550_v25  ;;  %8705 = vmatprep.subr.bf16.mxu1 %v14555_v26  ;;  %v14595_v24 = vld [vmem:[#allocation5 + $0xe98] ss:$1272 sps:$4 sm:$0xff]   ;;  %v14600_v25 = vld [vmem:[#allocation5 + $0x23c] ss:$1272 sps:$4 sm:$0xff]  }
 0x46b   :  { %11865 = vmatprep.subr.bf16.mxu0 %v14558_v27  ;;  %8735 = vmatprep.mubr.bf16.mxu1 %v2017_v28  ;;  %v14604_v26 = vld [vmem:[#allocation5 + $0x4b4] ss:$1272 sps:$4 sm:$0xff]   ;;  %v822_v27 = vrot.slane %v808_v21, %v14868_v9  ;;  %v1495_v28 = vrot.slane %v128_v22, %v14868_v9 }
 0x46c   :  { %11895 = vmatprep.mubr.bf16.mxu0 %v2175_v29 }
 0x46d   :  { %v824_v29 = vcombine.high %v822_v27, %v822_v27  ;;  %v1503_v30 = vcombine.high %v1495_v28, %v1495_v28  ;;  %v2024_v49 = vpack.c.bf16 %v822_v27, %v822_v27  ;;  %v14649_v27 = vld [vmem:[#allocation5 + $0xebc] ss:$1272 sps:$4 sm:$0xff]  }
 0x46f   :  { %v2025_v37 = vpack.c.bf16 %v824_v29, %v824_v29  ;;  %v2183_v38 = vpack.c.bf16 %v1503_v30, %v1503_v30 }
 0x471   :  { %8706 = vmatpush1.bf16.xpose.msra.mxu1 %v14553_v32  ;;  %v2180_v32 = vpack.c.bf16 %v1485_v10, %v1485_v10 }
 0x472   :  { %11866 = vmatpush1.bf16.xpose.msra.mxu0 %v14556_v33  ;;  %8743 = vmatprep.subr.bf16.mxu1 %v14562_v34  ;;  %v14598_v33 = vld [vmem:[#allocation5 + $0x238] ss:$1272 sps:$4 sm:$0xff]  }
 0x473   :  { %11903 = vmatprep.subr.bf16.mxu0 %v14565_v35  ;;  %v14602_v34 = vld [vmem:[#allocation5 + $0x4b0] ss:$1272 sps:$4 sm:$0xff]   ;;  %v14607_v35 = vld [vmem:[#allocation5 + $0xc2c] ss:$1272 sps:$4 sm:$0xff]  }
 0x478   :  { %8736 = vmatmul.mubr.bf16.vlgmr.msra.gmra.mrb[0].mxu1 %v2016_v40  ;;  %v89_v40 = vld [vmem:[#allocation2 + $0x120] sm:$0xff] }
 0x479   :  { %11896 = vmatmul.mubr.bf16.vlgmr.msra.gmra.mrb[0].mxu0 %v2174_v41  ;;  %8744 = vmatpush1.bf16.xpose.msra.mxu1 %v14560_v42  ;;  %v14605_v41 = vld [vmem:[#allocation5 + $0xc28] ss:$1272 sps:$4 sm:$0xff]   ;;  %v825_v57 = vcombine.high %v89_v40, %v89_v40 }
 0x47a   :  { %11904 = vmatpush1.bf16.xpose.msra.mxu0 %v14563_v43  ;;  %8745 = vmatprep.subr.bf16.mxu1 %v14568_v44  ;;  %v14608_v42 = vld [vmem:[#allocation5 + $0xea0] ss:$1272 sps:$4 sm:$0xff]   ;;  %v14614_v43 = vld [vmem:[#allocation5 + $0x244] ss:$1272 sps:$4 sm:$0xff]  }
 0x47b   :  { %11905 = vmatprep.subr.bf16.mxu0 %v14571_v45  ;;  %8775 = vmatprep.mubr.bf16.mxu1 %v2019_v46  ;;  %v14617_v44 = vld [vmem:[#allocation5 + $0x4bc] ss:$1272 sps:$4 sm:$0xff]   ;;  %v832_v45 = vrot.slane %v89_v40, %v14868_v9  ;;  %v1502_v46 = vrot.slane %v1488_v39, %v14868_v9 }
 0x47c   :  { %11935 = vmatprep.mubr.bf16.mxu0 %v2177_v47 }
 0x47d   :  { %v840_v47 = vcombine.high %v832_v45, %v832_v45  ;;  %v1504_v48 = vcombine.high %v1502_v46, %v1502_v46  ;;  %v2026_v3 = vpack.c.bf16 %v832_v45, %v832_v45  ;;  %v14662_v45 = vld [vmem:[#allocation5 + $0xec4] ss:$1272 sps:$4 sm:$0xff]  }
 0x47f   :  { %v2027_v55 = vpack.c.bf16 %v840_v47, %v840_v47  ;;  %v2185_v56 = vpack.c.bf16 %v1504_v48, %v1504_v48 }
 0x481   :  { %8746 = vmatpush1.bf16.xpose.msra.mxu1 %v14566_v50  ;;  %v2182_v50 = vpack.c.bf16 %v1495_v28, %v1495_v28 }
 0x482   :  { %11906 = vmatpush1.bf16.xpose.msra.mxu0 %v14569_v51  ;;  %8783 = vmatprep.subr.bf16.mxu1 %v14574_v52  ;;  %v14612_v51 = vld [vmem:[#allocation5 + $0x240] ss:$1272 sps:$4 sm:$0xff]  }
 0x483   :  { %11943 = vmatprep.subr.bf16.mxu0 %v14578_v53  ;;  %v14615_v52 = vld [vmem:[#allocation5 + $0x4b8] ss:$1272 sps:$4 sm:$0xff]   ;;  %v14620_v53 = vld [vmem:[#allocation5 + $0xc34] ss:$1272 sps:$4 sm:$0xff]  }
 0x488   :  { %8776 = vmatmul.mubr.bf16.vlgmr.msra.gmra.mrb[0].mxu1 %v2018_v58  ;;  %v129_v58 = vld [vmem:[#allocation2 + $0x260] sm:$0xff] }
 0x489   :  { %11936 = vmatmul.mubr.bf16.vlgmr.msra.gmra.mrb[0].mxu0 %v2176_v59  ;;  %8784 = vmatpush1.bf16.xpose.msra.mxu1 %v14572_v60  ;;  %v14618_v59 = vld [vmem:[#allocation5 + $0xc30] ss:$1272 sps:$4 sm:$0xff]   ;;  %v1505_v12 = vcombine.high %v129_v58, %v129_v58 }
 0x48a   :  { %11944 = vmatpush1.bf16.xpose.msra.mxu0 %v14576_v61  ;;  %8785 = vmatprep.subr.bf16.mxu1 %v14581_v62  ;;  %v14621_v60 = vld [vmem:[#allocation5 + $0xea8] ss:$1272 sps:$4 sm:$0xff]   ;;  %v14626_v61 = vld [vmem:[#allocation5 + $0x24c] ss:$1272 sps:$4 sm:$0xff]  }
 0x48b   :  { %11945 = vmatprep.subr.bf16.mxu0 %v14584_v63  ;;  %8815 = vmatprep.mubr.bf16.mxu1 %v2021_v0  ;;  %v14630_v62 = vld [vmem:[#allocation5 + $0x4c4] ss:$1272 sps:$4 sm:$0xff]   ;;  %v839_v63 = vrot.slane %v825_v57, %v14868_v9  ;;  %v1512_v0 = vrot.slane %v129_v58, %v14868_v9 }
 0x48c   :  { %11975 = vmatprep.mubr.bf16.mxu0 %v2179_v1 }
 0x48d   :  { %v841_v1 = vcombine.high %v839_v63, %v839_v63  ;;  %v1520_v2 = vcombine.high %v1512_v0, %v1512_v0  ;;  %v2028_v22 = vpack.c.bf16 %v839_v63, %v839_v63  ;;  %v14675_v63 = vld [vmem:[#allocation5 + $0xecc] ss:$1272 sps:$4 sm:$0xff]  }
 0x48f   :  { %v2029_v10 = vpack.c.bf16 %v841_v1, %v841_v1  ;;  %v2187_v11 = vpack.c.bf16 %v1520_v2, %v1520_v2 }
 0x491   :  { %8786 = vmatpush1.bf16.xpose.msra.mxu1 %v14579_v4  ;;  %v2184_v4 = vpack.c.bf16 %v1502_v46, %v1502_v46 }
 0x492   :  { %11946 = vmatpush1.bf16.xpose.msra.mxu0 %v14582_v5  ;;  %8823 = vmatprep.subr.bf16.mxu1 %v14588_v6  ;;  %v14624_v5 = vld [vmem:[#allocation5 + $0x248] ss:$1272 sps:$4 sm:$0xff]  }
 0x493   :  { %11983 = vmatprep.subr.bf16.mxu0 %v14591_v7  ;;  %v14628_v6 = vld [vmem:[#allocation5 + $0x4c0] ss:$1272 sps:$4 sm:$0xff]   ;;  %v14633_v7 = vld [vmem:[#allocation5 + $0xc3c] ss:$1272 sps:$4 sm:$0xff]  }
 0x498   :  { %8816 = vmatmul.mubr.bf16.vlgmr.msra.gmra.mrb[0].mxu1 %v2020_v13  ;;  %v90_v13 = vld [vmem:[#allocation2 + $0x128] sm:$0xff] }
 0x499   :  { %11976 = vmatmul.mubr.bf16.vlgmr.msra.gmra.mrb[0].mxu0 %v2178_v14  ;;  %8824 = vmatpush1.bf16.xpose.msra.mxu1 %v14586_v15  ;;  %v14631_v14 = vld [vmem:[#allocation5 + $0xc38] ss:$1272 sps:$4 sm:$0xff]   ;;  %v842_v30 = vcombine.high %v90_v13, %v90_v13 }
 0x49a   :  { %11984 = vmatpush1.bf16.xpose.msra.mxu0 %v14589_v16  ;;  %8825 = vmatprep.subr.bf16.mxu1 %v14594_v17  ;;  %v14634_v15 = vld [vmem:[#allocation5 + $0xeb0] ss:$1272 sps:$4 sm:$0xff]   ;;  %v14640_v16 = vld [vmem:[#allocation5 + $0x254] ss:$1272 sps:$4 sm:$0xff]  }
 0x49b   :  { %11985 = vmatprep.subr.bf16.mxu0 %v14597_v18  ;;  %8855 = vmatprep.mubr.bf16.mxu1 %v2023_v19  ;;  %v14643_v17 = vld [vmem:[#allocation5 + $0x4cc] ss:$1272 sps:$4 sm:$0xff]   ;;  %v849_v18 = vrot.slane %v90_v13, %v14868_v9  ;;  %v1519_v19 = vrot.slane %v1505_v12, %v14868_v9 }
 0x49c   :  { %12015 = vmatprep.mubr.bf16.mxu0 %v2181_v20 }
 0x49d   :  { %v857_v20 = vcombine.high %v849_v18, %v849_v18  ;;  %v1521_v21 = vcombine.high %v1519_v19, %v1519_v19  ;;  %v2030_v40 = vpack.c.bf16 %v849_v18, %v849_v18  ;;  %v14688_v18 = vld [vmem:[#allocation5 + $0xed4] ss:$1272 sps:$4 sm:$0xff]  }
 0x49f   :  { %v2031_v28 = vpack.c.bf16 %v857_v20, %v857_v20  ;;  %v2189_v29 = vpack.c.bf16 %v1521_v21, %v1521_v21 }
 0x4a1   :  { %8826 = vmatpush1.bf16.xpose.msra.mxu1 %v14592_v23  ;;  %v2186_v23 = vpack.c.bf16 %v1512_v0, %v1512_v0 }
 0x4a2   :  { %11986 = vmatpush1.bf16.xpose.msra.mxu0 %v14595_v24  ;;  %8863 = vmatprep.subr.bf16.mxu1 %v14600_v25  ;;  %v14638_v24 = vld [vmem:[#allocation5 + $0x250] ss:$1272 sps:$4 sm:$0xff]  }
 0x4a3   :  { %12023 = vmatprep.subr.bf16.mxu0 %v14604_v26  ;;  %v14641_v25 = vld [vmem:[#allocation5 + $0x4c8] ss:$1272 sps:$4 sm:$0xff]   ;;  %v14646_v26 = vld [vmem:[#allocation5 + $0xc44] ss:$1272 sps:$4 sm:$0xff]  }
 0x4a8   :  { %8856 = vmatmul.mubr.bf16.vlgmr.msra.gmra.mrb[0].mxu1 %v2022_v31  ;;  %v130_v31 = vld [vmem:[#allocation2 + $0x268] sm:$0xff] }
 0x4a9   :  { %12016 = vmatmul.mubr.bf16.vlgmr.msra.gmra.mrb[0].mxu0 %v2180_v32  ;;  %8864 = vmatpush1.bf16.xpose.msra.mxu1 %v14598_v33  ;;  %v14644_v32 = vld [vmem:[#allocation5 + $0xc40] ss:$1272 sps:$4 sm:$0xff]   ;;  %v1522_v48 = vcombine.high %v130_v31, %v130_v31 }
 0x4aa   :  { %12024 = vmatpush1.bf16.xpose.msra.mxu0 %v14602_v34  ;;  %8865 = vmatprep.subr.bf16.mxu1 %v14607_v35  ;;  %v14647_v33 = vld [vmem:[#allocation5 + $0xeb8] ss:$1272 sps:$4 sm:$0xff]   ;;  %v14652_v34 = vld [vmem:[#allocation5 + $0x25c] ss:$1272 sps:$4 sm:$0xff]  }
 0x4ab   :  { %12025 = vmatprep.subr.bf16.mxu0 %v14610_v36  ;;  %8895 = vmatprep.mubr.bf16.mxu1 %v2025_v37  ;;  %v14656_v35 = vld [vmem:[#allocation5 + $0x4d4] ss:$1272 sps:$4 sm:$0xff]   ;;  %v856_v36 = vrot.slane %v842_v30, %v14868_v9  ;;  %v1529_v37 = vrot.slane %v130_v31, %v14868_v9 }
 0x4ac   :  { %12055 = vmatprep.mubr.bf16.mxu0 %v2183_v38 }
 0x4ad   :  { %v858_v38 = vcombine.high %v856_v36, %v856_v36  ;;  %v1537_v39 = vcombine.high %v1529_v37, %v1529_v37  ;;  %v2032_v58 = vpack.c.bf16 %v856_v36, %v856_v36 }
 0x4af   :  { %v2033_v46 = vpack.c.bf16 %v858_v38, %v858_v38  ;;  %v2191_v47 = vpack.c.bf16 %v1537_v39, %v1537_v39  ;;  %v14699_v38 = vld [vmem:[#allocation5 + $0xed8] ss:$1272 sps:$4 sm:$0xff]   ;;  %v14705_v39 = vld [vmem:[#allocation5 + $0x4f4] ss:$1272 sps:$4 sm:$0xff]  }
 0x4b1   :  { %8866 = vmatpush1.bf16.xpose.msra.mxu1 %v14605_v41  ;;  %v2188_v41 = vpack.c.bf16 %v1519_v19, %v1519_v19 }
 0x4b2   :  { %12026 = vmatpush1.bf16.xpose.msra.mxu0 %v14608_v42  ;;  %8903 = vmatprep.subr.bf16.mxu1 %v14614_v43  ;;  %v14650_v42 = vld [vmem:[#allocation5 + $0x258] ss:$1272 sps:$4 sm:$0xff]  }
 0x4b3   :  { %12063 = vmatprep.subr.bf16.mxu0 %v14617_v44  ;;  %v14654_v43 = vld [vmem:[#allocation5 + $0x4d0] ss:$1272 sps:$4 sm:$0xff]   ;;  %v14659_v44 = vld [vmem:[#allocation5 + $0xc4c] ss:$1272 sps:$4 sm:$0xff]  }
 0x4b8   :  { %8896 = vmatmul.mubr.bf16.vlgmr.msra.gmra.mrb[0].mxu1 %v2024_v49  ;;  %v91_v49 = vld [vmem:[#allocation2 + $0x130] sm:$0xff] }
 0x4b9   :  { %12056 = vmatmul.mubr.bf16.vlgmr.msra.gmra.mrb[0].mxu0 %v2182_v50  ;;  %8904 = vmatpush1.bf16.xpose.msra.mxu1 %v14612_v51  ;;  %v14657_v50 = vld [vmem:[#allocation5 + $0xc48] ss:$1272 sps:$4 sm:$0xff]   ;;  %v859_v2 = vcombine.high %v91_v49, %v91_v49 }
 0x4ba   :  { %12064 = vmatpush1.bf16.xpose.msra.mxu0 %v14615_v52  ;;  %8905 = vmatprep.subr.bf16.mxu1 %v14620_v53  ;;  %v14660_v51 = vld [vmem:[#allocation5 + $0xec0] ss:$1272 sps:$4 sm:$0xff]   ;;  %v14666_v52 = vld [vmem:[#allocation5 + $0x264] ss:$1272 sps:$4 sm:$0xff]  }
 0x4bb   :  { %12065 = vmatprep.subr.bf16.mxu0 %v14623_v54  ;;  %8935 = vmatprep.mubr.bf16.mxu1 %v2027_v55  ;;  %v14669_v53 = vld [vmem:[#allocation5 + $0x4dc] ss:$1272 sps:$4 sm:$0xff]   ;;  %v866_v54 = vrot.slane %v91_v49, %v14868_v9  ;;  %v1536_v55 = vrot.slane %v1522_v48, %v14868_v9 }
 0x4bc   :  { %12095 = vmatprep.mubr.bf16.mxu0 %v2185_v56 }
 0x4bd   :  { %v874_v56 = vcombine.high %v866_v54, %v866_v54  ;;  %v1538_v57 = vcombine.high %v1536_v55, %v1536_v55  ;;  %v2034_v13 = vpack.c.bf16 %v866_v54, %v866_v54 }
 0x4bf   :  { %v2035_v0 = vpack.c.bf16 %v874_v56, %v874_v56  ;;  %v2193_v1 = vpack.c.bf16 %v1538_v57, %v1538_v57 }
 0x4c1   :  { %8906 = vmatpush1.bf16.xpose.msra.mxu1 %v14618_v59  ;;  %v2190_v59 = vpack.c.bf16 %v1529_v37, %v1529_v37 }
 0x4c2   :  { %12066 = vmatpush1.bf16.xpose.msra.mxu0 %v14621_v60  ;;  %8943 = vmatprep.subr.bf16.mxu1 %v14626_v61  ;;  %v14664_v60 = vld [vmem:[#allocation5 + $0x260] ss:$1272 sps:$4 sm:$0xff]  }
 0x4c3   :  { %12103 = vmatprep.subr.bf16.mxu0 %v14630_v62  ;;  %v14667_v61 = vld [vmem:[#allocation5 + $0x4d8] ss:$1272 sps:$4 sm:$0xff]   ;;  %v14672_v62 = vld [vmem:[#allocation5 + $0xc54] ss:$1272 sps:$4 sm:$0xff]  }
 0x4c8   :  { %8936 = vmatmul.mubr.bf16.vlgmr.msra.gmra.mrb[0].mxu1 %v2026_v3  ;;  %v131_v3 = vld [vmem:[#allocation2 + $0x270] sm:$0xff] }
 0x4c9   :  { %12096 = vmatmul.mubr.bf16.vlgmr.msra.gmra.mrb[0].mxu0 %v2184_v4  ;;  %8944 = vmatpush1.bf16.xpose.msra.mxu1 %v14624_v5  ;;  %v14670_v4 = vld [vmem:[#allocation5 + $0xc50] ss:$1272 sps:$4 sm:$0xff]   ;;  %v1539_v21 = vcombine.high %v131_v3, %v131_v3 }
 0x4ca   :  { %12104 = vmatpush1.bf16.xpose.msra.mxu0 %v14628_v6  ;;  %8945 = vmatprep.subr.bf16.mxu1 %v14633_v7  ;;  %v14673_v5 = vld [vmem:[#allocation5 + $0xec8] ss:$1272 sps:$4 sm:$0xff]   ;;  %v14678_v6 = vld [vmem:[#allocation5 + $0x26c] ss:$1272 sps:$4 sm:$0xff]  }
 0x4cb   :  { %12105 = vmatprep.subr.bf16.mxu0 %v14636_v8  ;;  %8975 = vmatprep.mubr.bf16.mxu1 %v2029_v10  ;;  %v14682_v7 = vld [vmem:[#allocation5 + $0x4e4] ss:$1272 sps:$4 sm:$0xff]   ;;  %v873_v8 = vrot.slane %v859_v2, %v14868_v9  ;;  %v1546_v10 = vrot.slane %v131_v3, %v14868_v9 }
 0x4cc   :  { %12135 = vmatprep.mubr.bf16.mxu0 %v2187_v11 }
 0x4cd   :  { %v875_v11 = vcombine.high %v873_v8, %v873_v8  ;;  %v1554_v12 = vcombine.high %v1546_v10, %v1546_v10  ;;  %v2036_v30 = vpack.c.bf16 %v873_v8, %v873_v8  ;;  %v2194_v31 = vpack.c.bf16 %v1546_v10, %v1546_v10 }
 0x4cf   :  { %v2037_v19 = vpack.c.bf16 %v875_v11, %v875_v11  ;;  %v2195_v20 = vpack.c.bf16 %v1554_v12, %v1554_v12 }
 0x4d1   :  { %8946 = vmatpush1.bf16.xpose.msra.mxu1 %v14631_v14  ;;  %v2192_v14 = vpack.c.bf16 %v1536_v55, %v1536_v55 }
 0x4d2   :  { %12106 = vmatpush1.bf16.xpose.msra.mxu0 %v14634_v15  ;;  %8983 = vmatprep.subr.bf16.mxu1 %v14640_v16  ;;  %v14676_v15 = vld [vmem:[#allocation5 + $0x268] ss:$1272 sps:$4 sm:$0xff]  }
 0x4d3   :  { %12143 = vmatprep.subr.bf16.mxu0 %v14643_v17  ;;  %v14680_v16 = vld [vmem:[#allocation5 + $0x4e0] ss:$1272 sps:$4 sm:$0xff]   ;;  %v14685_v17 = vld [vmem:[#allocation5 + $0xc5c] ss:$1272 sps:$4 sm:$0xff]  }
 0x4d8   :  { %8976 = vmatmul.mubr.bf16.vlgmr.msra.gmra.mrb[0].mxu1 %v2028_v22  ;;  %v14683_v22 = vld [vmem:[#allocation5 + $0xc58] ss:$1272 sps:$4 sm:$0xff]  }
 0x4d9   :  { %12136 = vmatmul.mubr.bf16.vlgmr.msra.gmra.mrb[0].mxu0 %v2186_v23  ;;  %8984 = vmatpush1.bf16.xpose.msra.mxu1 %v14638_v24  ;;  %v14686_v23 = vld [vmem:[#allocation5 + $0xed0] ss:$1272 sps:$4 sm:$0xff]   ;;  %v14692_v24 = vld [vmem:[#allocation5 + $0x274] ss:$1272 sps:$4 sm:$0xff]  }
 0x4da   :  { %12144 = vmatpush1.bf16.xpose.msra.mxu0 %v14641_v25  ;;  %8985 = vmatprep.subr.bf16.mxu1 %v14646_v26  ;;  %v14695_v25 = vld [vmem:[#allocation5 + $0x4ec] ss:$1272 sps:$4 sm:$0xff]   ;;  %v14710_v26 = vld.sshfl [vmem:[#allocation2 + $0x138] sm:$0xff pattern:$0x76325410] }
 0x4db   :  { %12145 = vmatprep.subr.bf16.mxu0 %v14649_v27  ;;  %9015 = vmatprep.mubr.bf16.mxu1 %v2031_v28  ;;  %v1553_v27 = vrot.slane %v1539_v21, %v14868_v9  ;;  %v891_v28 = vcombine.high %v14710_v26, %v14710_v26  ;;  %v14696_v9 = vld [vmem:[#allocation5 + $0xc60] ss:$1272 sps:$4 sm:$0xff]  }
 0x4dc   :  { %12175 = vmatprep.mubr.bf16.mxu0 %v2189_v29 }
 0x4dd   :  { %v1555_v29 = vcombine.high %v1553_v27, %v1553_v27  ;;  %v2039_v36 = vpack.c.bf16 %v891_v28, %v891_v28 }
 0x4df   :  { %v2197_v37 = vpack.c.bf16 %v1555_v29, %v1555_v29 }
 0x4e1   :  { %8986 = vmatpush1.bf16.xpose.msra.mxu1 %v14644_v32  ;;  %v14690_v32 = vld [vmem:[#allocation5 + $0x270] ss:$1272 sps:$4 sm:$0xff]  }
 0x4e2   :  { %12146 = vmatpush1.bf16.xpose.msra.mxu0 %v14647_v33  ;;  %9023 = vmatprep.subr.bf16.mxu1 %v14652_v34  ;;  %v14693_v33 = vld [vmem:[#allocation5 + $0x4e8] ss:$1272 sps:$4 sm:$0xff]   ;;  %v14698_v34 = vld [vmem:[#allocation5 + $0xc64] ss:$1272 sps:$4 sm:$0xff]  }
 0x4e3   :  { %12183 = vmatprep.subr.bf16.mxu0 %v14656_v35  ;;  %v14701_v35 = vld [vmem:[#allocation5 + $0xedc] ss:$1272 sps:$4 sm:$0xff]  }
 0x4e8   :  { %9016 = vmatmul.mubr.bf16.vlgmr.msra.gmra.mrb[0].mxu1 %v2030_v40  ;;  %v12401_v40 = vld.sshfl [vmem:[#allocation2 + $0x278] sm:$0x33 pattern:$0x76325410] }
 0x4e9   :  { %12176 = vmatmul.mubr.bf16.vlgmr.msra.gmra.mrb[0].mxu0 %v2188_v41  ;;  %9024 = vmatpush1.bf16.xpose.msra.mxu1 %v14650_v42  ;;  %v1563_v41 = vcombine.high %v12401_v40, %v12401_v40  ;;  %v2038_v42 = vpack.c.bf16 %v14710_v26, %v14710_v26  ;;  %v2198_v48 = vpack.c.bf16 %v12401_v40, %v12401_v40 }
 0x4ea   :  { %12184 = vmatpush1.bf16.xpose.msra.mxu0 %v14654_v43  ;;  %9025 = vmatprep.subr.bf16.mxu1 %v14659_v44  ;;  %v2196_v43 = vpack.c.bf16 %v1553_v27, %v1553_v27  ;;  %v14703_v44 = vld [vmem:[#allocation5 + $0x4f0] ss:$1272 sps:$4 sm:$0xff]  }
 0x4eb   :  { %12185 = vmatprep.subr.bf16.mxu0 %v14662_v45  ;;  %9055 = vmatprep.mubr.bf16.mxu1 %v2033_v46  ;;  %v2199_v45 = vpack.c.bf16 %v1563_v41, %v1563_v41  ;;  %v14708_v46 = vld [vmem:[#allocation5 + $0xee4] ss:$1272 sps:$4 sm:$0xff]  }
 0x4ec   :  { %12215 = vmatprep.mubr.bf16.mxu0 %v2191_v47  ;;  %v14706_v47 = vld [vmem:[#allocation5 + $0xee0] ss:$1272 sps:$4 sm:$0xff]  }
 0x4f1   :  { %9026 = vmatpush1.bf16.xpose.msra.mxu1 %v14657_v50 }
 0x4f2   :  { %12186 = vmatpush1.bf16.xpose.msra.mxu0 %v14660_v51  ;;  %9063 = vmatprep.subr.bf16.mxu1 %v14666_v52 }
 0x4f3   :  { %12223 = vmatprep.subr.bf16.mxu0 %v14669_v53  ;;  %v12402_v53 = vld [vmem:[#allocation7] ss:$0 sm:$0xff] }
 0x4f8   :  { %9056 = vmatmul.mubr.bf16.vlgmr.msra.gmra.mrb[0].mxu1 %v2032_v58 }
 0x4f9   :  { %12216 = vmatmul.mubr.bf16.vlgmr.msra.gmra.mrb[0].mxu0 %v2190_v59  ;;  %9064 = vmatpush1.bf16.xpose.msra.mxu1 %v14664_v60 }
 0x4fa   :  { %12224 = vmatpush1.bf16.xpose.msra.mxu0 %v14667_v61  ;;  %9065 = vmatprep.subr.bf16.mxu1 %v14672_v62 }
 0x4fb   :  { %12225 = vmatprep.subr.bf16.mxu0 %v14675_v63  ;;  %9095 = vmatprep.mubr.bf16.mxu1 %v2035_v0 }
 0x4fc   :  { %12255 = vmatprep.mubr.bf16.mxu0 %v2193_v1 }
 0x501   :  { %9066 = vmatpush1.bf16.xpose.msra.mxu1 %v14670_v4 }
 0x502   :  { %12226 = vmatpush1.bf16.xpose.msra.mxu0 %v14673_v5  ;;  %9103 = vmatprep.subr.bf16.mxu1 %v14678_v6 }
 0x503   :  { %12263 = vmatprep.subr.bf16.mxu0 %v14682_v7 }
 0x508   :  { %9096 = vmatmul.mubr.bf16.vlgmr.msra.gmra.mrb[0].mxu1 %v2034_v13 }
 0x509   :  { %12256 = vmatmul.mubr.bf16.vlgmr.msra.gmra.mrb[0].mxu0 %v2192_v14  ;;  %9104 = vmatpush1.bf16.xpose.msra.mxu1 %v14676_v15 }
 0x50a   :  { %12264 = vmatpush1.bf16.xpose.msra.mxu0 %v14680_v16  ;;  %9105 = vmatprep.subr.bf16.mxu1 %v14685_v17 }
 0x50b   :  { %12265 = vmatprep.subr.bf16.mxu0 %v14688_v18  ;;  %9135 = vmatprep.mubr.bf16.mxu1 %v2037_v19 }
 0x50c   :  { %12295 = vmatprep.mubr.bf16.mxu0 %v2195_v20 }
 0x511   :  { %9106 = vmatpush1.bf16.xpose.msra.mxu1 %v14683_v22 }
 0x512   :  { %12266 = vmatpush1.bf16.xpose.msra.mxu0 %v14686_v23  ;;  %9143 = vmatprep.subr.bf16.mxu1 %v14692_v24 }
 0x513   :  { %12303 = vmatprep.subr.bf16.mxu0 %v14695_v25 }
 0x518   :  { %9136 = vmatmul.mubr.bf16.vlgmr.msra.gmra.mrb[0].mxu1 %v2036_v30 }
 0x519   :  { %12296 = vmatmul.mubr.bf16.vlgmr.msra.gmra.mrb[0].mxu0 %v2194_v31  ;;  %9144 = vmatpush1.bf16.xpose.msra.mxu1 %v14690_v32 }
 0x51a   :  { %12304 = vmatpush1.bf16.xpose.msra.mxu0 %v14693_v33  ;;  %9145 = vmatprep.subr.bf16.mxu1 %v14698_v34 }
 0x51b   :  { %12305 = vmatprep.subr.bf16.mxu0 %v14701_v35  ;;  %9175 = vmatprep.mubr.bf16.mxu1 %v2039_v36 }
 0x51c   :  { %12335 = vmatprep.mubr.bf16.mxu0 %v2197_v37 }
 0x521   :  { %9146 = vmatpush1.bf16.xpose.msra.mxu1 %v14696_v9 }
 0x522   :  { %12306 = vmatpush1.bf16.xpose.msra.mxu0 %v14699_v38 }
 0x523   :  { %12343 = vmatprep.subr.bf16.mxu0 %v14705_v39 }
 0x528   :  { %9176 = vmatmul.mubr.bf16.vlgmr.msra.gmra.mrb[0].mxu1 %v2038_v42 }
 0x529   :  { %12336 = vmatmul.mubr.bf16.vlgmr.msra.gmra.mrb[0].mxu0 %v2196_v43 }
 0x52a   :  { %12344 = vmatpush1.bf16.xpose.msra.mxu0 %v14703_v44  ;;  %12375 = vmatprep.mubr.bf16.mxu0 %v2199_v45 }
 0x52b   :  { %12345 = vmatprep.subr.bf16.mxu0 %v14708_v46 }
 0x532   :  { %12346 = vmatpush1.bf16.xpose.msra.mxu0 %v14706_v47 }
 0x539   :  { %12376 = vmatmul.mubr.bf16.vlgmr.msra.gmra.mrb[0].mxu0 %v2198_v48 }
 0x5fb   :  { %v9177_v49 = vpop.f32.mrb[0].mxu1 }
 0x5fc   :  { %v9179_v50 = vpop.f32.mrb[1].mxu1  ;;  %v13039_v54 = vadd.f32 %v12402_v53, %v9177_v49 }
 0x5fd   :  { %v9180_v51 = vpop.f32.mrb[2].mxu1 }
 0x5fe   :  { %v9181_v52 = vpop.f32.mrb[3].mxu1 }
 0x60c   :  { %v12377_v55 = vpop.f32.mrb[0].mxu0 }
 0x60d   :  { %v13040_v56 = vadd.f32 %v13039_v54, %v12377_v55  ;;  %v12379_v57 = vpop.f32.mrb[1].mxu0 }
 0x60e   :  { %v12380_v58 = vpop.f32.mrb[2].mxu0 }
 0x60f   :  { %v12381_v59 = vpop.f32.mrb[3].mxu0  ;;  %12384 = vst.msk [vmem:[#allocation8] sm:$0x3] %vm12383_vm0, %v13040_v56 }
 0x610   :  { %14788 = shalt.err (!%p14785_p0)
}
 0x611   :  { %s14789_s26 = scalar_lea.hbm %s15042_s3, 32 }
 0x612   :  { %p14790_p1 = scmp.ne.s32.totalorder %s15042_s3, %s14789_s26  ;;  %p14793_p2 = scmp.lt.u32.totalorder %s14789_s26, %s15042_s3 }
 0x614   :  { %p14795_p3 = pnand %p14793_p2, %p14790_p1 }
 0x616   :  { %14798 = shalt.err (!%p14795_p3)
}
 0x617   :  { %12394 = dma.vmem_to_hbm [thread:$0]  %s12392_s22, 32, %s15042_s3, [#allocation4]  }
 0x618   :  { %14803 = dma.done.wait [#allocation4], 32  }
 0x619   :  { %14804 = vsyncadd [#allocation4], 4294967264 }
 0x61a   :  { %12398 = vsyncpa [#allocation3], 1 }
 0x61b   :  { %12399 = vsyncpa [#allocation6], 1 }
 0x61c   :  { %12400 = vsyncpa [#allocation4], 1 }

</bundles_post_ra>
